<compile_context>
chip_gen: v5e
topology: v5e:2x2
jax: 0.10.0
libtpu: 0.0.40
codegen_flags: <defaults>
</compile_context>

<pallas_src>
import jax
import jax.numpy as jnp
from jax.experimental import pallas as pl
from jax.experimental.pallas import tpu as pltpu


def _encoder_fused_kernel(x_ph_ref, w1_ref, b1_ref, w2_ref, b2_ref, o_ref, p2_ref):
    """Fused Conv(1->16,3x3,s2,p1)+ReLU -> Conv(16->32,3x3,s2,p1)+ReLU.

    x_ph_ref: (4, N, Hq, Wq, 4)  mod-4 phase split of the zero-padded input:
              x_ph[r, n, i, j, s] = x_padded[n, 4*i + r, 4*j + s]
    w1_ref:   (9, 1, 16)   layer-1 weights, tap-major ((kh,kw) -> row)
    b1_ref:   (1, 16)
    w2_ref:   (144, 32)    layer-2 weights, (kh,kw) major / cin minor rows
    b2_ref:   (1, 32)
    o_ref:    (N*Ho2*Wo2, 32)            output (rows are (n, ho, wo)-major)
    p2_ref:   VMEM scratch (N*Ho2*Wo2, 144)  layer-2 im2col, built in-kernel
    """
    _, n, hq, wq, _ = x_ph_ref.shape
    ho2, wo2 = hq - 1, wq - 1          # final spatial size == per-parity conv1 extent
    c1 = w1_ref.shape[-1]              # 16

    # ---------------- layer 1: VPU broadcast multiply-adds ----------------
    # Computed per output-parity group (p, q) = (ho % 2, wo % 2) so that the
    # stride-2 patch gather of layer 2 below becomes static slicing.
    h1 = [[None, None], [None, None]]  # h1[p][q][n, m, l, c] = conv1 at (2m+p, 2l+q)
    for p in range(2):
        for q in range(2):
            acc = jnp.zeros((n, ho2, wo2, c1), jnp.float32)
            for kh in range(3):
                for kw in range(3):
                    e, f = 2 * p + kh, 2 * q + kw
                    # padded-input row 4*i + (e%4), i in [e//4, e//4 + ho2)
                    tap = x_ph_ref[e % 4, :,
                                   e // 4:e // 4 + ho2,
                                   f // 4:f // 4 + wo2,
                                   f % 4:f % 4 + 1]            # (N, ho2, wo2, 1)
                    acc = acc + tap * w1_ref[kh * 3 + kw]       # (1, 16) broadcast
            h1[p][q] = jnp.maximum(acc + b1_ref[...], 0.0)

    # -------- layer-2 im2col: scatter parity groups into VMEM scratch -----
    # The conv-2 zero padding (top row / left column) comes from the memset.
    p2_ref[...] = jnp.zeros_like(p2_ref)
    for kh in range(3):
        pr = 0 if kh == 1 else 1            # h1 row-parity feeding this tap
        for kw in range(3):
            pc = 0 if kw == 1 else 1        # h1 col-parity feeding this tap
            c0 = (kh * 3 + kw) * c1
            for bi in range(n):
                for oh in range(ho2):
                    if kh == 0 and oh == 0:
                        continue            # zero row from conv-2 top padding
                    mr = oh - 1 if kh == 0 else oh
                    g = h1[pr][pc][bi, mr]  # (wo2, 16)
                    r0 = (bi * ho2 + oh) * wo2
                    if kw == 0:             # zero col from conv-2 left padding
                        p2_ref[r0 + 1:r0 + wo2, c0:c0 + c1] = g[:wo2 - 1]
                    else:
                        p2_ref[r0:r0 + wo2, c0:c0 + c1] = g

    # -------------- layer 2: one MXU GEMM + bias + ReLU --------------------
    y = jnp.dot(p2_ref[...], w2_ref[...], preferred_element_type=jnp.float32)
    o_ref[...] = jnp.maximum(y + b2_ref[...], 0.0).astype(o_ref.dtype)


def encoder_forward(x_nchw, params):
    """Forward pass of the two-layer conv encoder.  Public layout: NCHW in/out."""
    (w1, b1), (w2, b2) = params
    n, cin, h, w = x_nchw.shape
    assert cin == 1, "Encoder expects a single input channel"
    assert h % 4 == 0 and w % 4 == 0, "H and W must be divisible by 4"
    c1 = w1.shape[0]                        # 16
    c2 = w2.shape[0]                        # 32
    ho2, wo2 = h // 4, w // 4               # final spatial size
    hq, wq = ho2 + 1, wo2 + 1

    # ---- layout glue (pure JAX, no FLOPs, no data expansion) -------------
    # conv padding of 1 on each side, plus extra trailing zeros so the padded
    # height/width are divisible by 4 (the extra rows/cols are never read).
    xpad = jnp.pad(x_nchw[:, 0], ((0, 0), (1, 3), (1, 3)))           # (N, H+4, W+4)
    # mod-4 phase split: x_ph[r, n, i, j, s] = xpad[n, 4*i + r, 4*j + s]
    x_ph = xpad.reshape(n, hq, 4, wq, 4).transpose(2, 0, 1, 3, 4)    # (4, N, Hq, Wq, 4)

    # PyTorch (Cout, Cin, KH, KW) -> tap-major matrices matching the in-kernel
    # patch ordering ((kh, kw) major, cin minor).
    w1m = jnp.transpose(w1[:, 0], (1, 2, 0)).reshape(9, 1, c1)       # (9, 1, 16)
    w2m = jnp.transpose(w2, (2, 3, 1, 0)).reshape(9 * c1, c2)        # (144, 32)
    b1r = b1.reshape(1, c1)
    b2r = b2.reshape(1, c2)

    m2 = n * ho2 * wo2                      # batch folded into the GEMM rows
    out = pl.pallas_call(
        _encoder_fused_kernel,
        out_shape=jax.ShapeDtypeStruct((m2, c2), jnp.float32),
        grid=(1,),                          # single step: whole problem fits VMEM
        in_specs=[
            pl.BlockSpec(x_ph.shape, lambda i: (0, 0, 0, 0, 0)),
            pl.BlockSpec(w1m.shape, lambda i: (0, 0, 0)),
            pl.BlockSpec(b1r.shape, lambda i: (0, 0)),
            pl.BlockSpec(w2m.shape, lambda i: (0, 0)),
            pl.BlockSpec(b2r.shape, lambda i: (0, 0)),
        ],
        out_specs=pl.BlockSpec((m2, c2), lambda i: (0, 0)),
        scratch_shapes=[pltpu.VMEM((m2, 9 * c1), jnp.float32)],
        compiler_params=pltpu.CompilerParams(
            dimension_semantics=("arbitrary",)),
    )(x_ph, w1m, b1r, w2m, b2r)

    # rows are (n, ho, wo)-major -> back to NCHW
    return out.reshape(n, ho2, wo2, c2).transpose(0, 3, 1, 2)


def init_params(key):
    # Deterministic synthetic init; shapes match nn.Conv2d(1,16,3) / nn.Conv2d(16,32,3).
    k1, k2, k3, k4 = jax.random.split(key, 4)
    w1 = jax.random.normal(k1, (16, 1, 3, 3), jnp.float32) * 0.2
    b1 = jax.random.normal(k2, (16,), jnp.float32) * 0.1
    w2 = jax.random.normal(k3, (32, 16, 3, 3), jnp.float32) * 0.1
    b2 = jax.random.normal(k4, (32,), jnp.float32) * 0.1
    return (w1, b1), (w2, b2)


def _reference_forward(x_nchw, params):
    (w1, b1), (w2, b2) = params

    def conv(x, w, b):
        y = jax.lax.conv_general_dilated(
            x, w, window_strides=(2, 2), padding=((1, 1), (1, 1)),
            dimension_numbers=("NCHW", "OIHW", "NCHW"),
            preferred_element_type=jnp.float32,
            precision=jax.lax.Precision.HIGHEST)
        return jnp.maximum(y + b.reshape(1, -1, 1, 1), 0.0)

    return conv(conv(x_nchw, w1, b1), w2, b2)


if __name__ == "__main__":
    key = jax.random.PRNGKey(0)
    kx, kp = jax.random.split(key)
    x = jax.random.normal(kx, (2, 1, 16, 16), jnp.float32)   # NCHW, Conv2d(1,...) input
    params = init_params(kp)

    y = jax.jit(encoder_forward)(x, params)
    y = jax.block_until_ready(y)
    assert y.shape == (2, 32, 4, 4), y.shape

    y_ref = _reference_forward(x, params)
    assert jnp.allclose(y, y_ref, rtol=5e-2, atol=5e-3), float(jnp.max(jnp.abs(y - y_ref)))

    print("KERNEL_OK")
</pallas_src>

<mosaic_0001>
module attributes {stable_mosaic.version = 11 : i64} {
  func.func @_encoder_fused_kernel(%arg0: i32, %arg1: memref<4x2x5x5x4xf32, #tpu.memory_space<vmem>>, %arg2: memref<9x1x16xf32, #tpu.memory_space<vmem>>, %arg3: memref<1x16xf32, #tpu.memory_space<vmem>>, %arg4: memref<144x32xf32, #tpu.memory_space<vmem>>, %arg5: memref<1x32xf32, #tpu.memory_space<vmem>>, %arg6: memref<32x32xf32, #tpu.memory_space<vmem>>, %arg7: memref<32x144xf32, #tpu.memory_space<vmem>>) attributes {dimension_semantics = [#tpu.dimension_semantics<arbitrary>], iteration_bounds = array<i64: 1>, scalar_prefetch = 0 : i64, scratch_operands = 1 : i64, tpu.core_type = #tpu.core_type<tc>, window_params = [{pipeline_mode = #tpu.pipeline_mode<synchronous>, transform_indices = @transform_0, window_bounds = array<i64: 4, 2, 5, 5, 4>}, {pipeline_mode = #tpu.pipeline_mode<synchronous>, transform_indices = @transform_1, window_bounds = array<i64: 9, 1, 16>}, {pipeline_mode = #tpu.pipeline_mode<synchronous>, transform_indices = @transform_2, window_bounds = array<i64: 1, 16>}, {pipeline_mode = #tpu.pipeline_mode<synchronous>, transform_indices = @transform_3, window_bounds = array<i64: 144, 32>}, {pipeline_mode = #tpu.pipeline_mode<synchronous>, transform_indices = @transform_4, window_bounds = array<i64: 1, 32>}, {pipeline_mode = #tpu.pipeline_mode<synchronous>, transform_indices = @transform_5, window_bounds = array<i64: 32, 32>}]} {
    %cst = arith.constant 0.000000e+00 : f32
    %0 = vector.broadcast %cst : f32 to vector<2x4x4x16xf32>
    %c0 = arith.constant 0 : index
    %c0_0 = arith.constant 0 : index
    %c0_1 = arith.constant 0 : index
    %c0_2 = arith.constant 0 : index
    %c0_3 = arith.constant 0 : index
    %1 = vector.load %arg1[%c0, %c0_0, %c0_1, %c0_2, %c0_3] : memref<4x2x5x5x4xf32, #tpu.memory_space<vmem>>, vector<1x2x4x4x1xf32>
    %2 = vector.shape_cast %1 : vector<1x2x4x4x1xf32> to vector<2x4x4x1xf32>
    %c0_4 = arith.constant 0 : index
    %c0_5 = arith.constant 0 : index
    %c0_6 = arith.constant 0 : index
    %3 = vector.load %arg2[%c0_4, %c0_5, %c0_6] : memref<9x1x16xf32, #tpu.memory_space<vmem>>, vector<1x1x16xf32>
    %4 = vector.shape_cast %3 : vector<1x1x16xf32> to vector<1x16xf32>
    %5 = vector.shape_cast %4 : vector<1x16xf32> to vector<1x1x1x16xf32>
    %6 = vector.broadcast %2 : vector<2x4x4x1xf32> to vector<2x4x4x16xf32>
    %7 = vector.broadcast %5 : vector<1x1x1x16xf32> to vector<2x4x4x16xf32>
    %8 = arith.mulf %6, %7 : vector<2x4x4x16xf32>
    %9 = arith.addf %0, %8 : vector<2x4x4x16xf32>
    %c0_7 = arith.constant 0 : index
    %c0_8 = arith.constant 0 : index
    %c0_9 = arith.constant 0 : index
    %c0_10 = arith.constant 0 : index
    %c1 = arith.constant 1 : index
    %10 = vector.load %arg1[%c0_7, %c0_8, %c0_9, %c0_10, %c1] : memref<4x2x5x5x4xf32, #tpu.memory_space<vmem>>, vector<1x2x4x4x1xf32>
    %11 = vector.shape_cast %10 : vector<1x2x4x4x1xf32> to vector<2x4x4x1xf32>
    %c1_11 = arith.constant 1 : index
    %c0_12 = arith.constant 0 : index
    %c0_13 = arith.constant 0 : index
    %12 = vector.load %arg2[%c1_11, %c0_12, %c0_13] : memref<9x1x16xf32, #tpu.memory_space<vmem>>, vector<1x1x16xf32>
    %13 = vector.shape_cast %12 : vector<1x1x16xf32> to vector<1x16xf32>
    %14 = vector.shape_cast %13 : vector<1x16xf32> to vector<1x1x1x16xf32>
    %15 = vector.broadcast %11 : vector<2x4x4x1xf32> to vector<2x4x4x16xf32>
    %16 = vector.broadcast %14 : vector<1x1x1x16xf32> to vector<2x4x4x16xf32>
    %17 = arith.mulf %15, %16 : vector<2x4x4x16xf32>
    %18 = arith.addf %9, %17 : vector<2x4x4x16xf32>
    %c0_14 = arith.constant 0 : index
    %c0_15 = arith.constant 0 : index
    %c0_16 = arith.constant 0 : index
    %c0_17 = arith.constant 0 : index
    %c2 = arith.constant 2 : index
    %19 = vector.load %arg1[%c0_14, %c0_15, %c0_16, %c0_17, %c2] : memref<4x2x5x5x4xf32, #tpu.memory_space<vmem>>, vector<1x2x4x4x1xf32>
    %20 = vector.shape_cast %19 : vector<1x2x4x4x1xf32> to vector<2x4x4x1xf32>
    %c2_18 = arith.constant 2 : index
    %c0_19 = arith.constant 0 : index
    %c0_20 = arith.constant 0 : index
    %21 = vector.load %arg2[%c2_18, %c0_19, %c0_20] : memref<9x1x16xf32, #tpu.memory_space<vmem>>, vector<1x1x16xf32>
    %22 = vector.shape_cast %21 : vector<1x1x16xf32> to vector<1x16xf32>
    %23 = vector.shape_cast %22 : vector<1x16xf32> to vector<1x1x1x16xf32>
    %24 = vector.broadcast %20 : vector<2x4x4x1xf32> to vector<2x4x4x16xf32>
    %25 = vector.broadcast %23 : vector<1x1x1x16xf32> to vector<2x4x4x16xf32>
    %26 = arith.mulf %24, %25 : vector<2x4x4x16xf32>
    %27 = arith.addf %18, %26 : vector<2x4x4x16xf32>
    %c1_21 = arith.constant 1 : index
    %c0_22 = arith.constant 0 : index
    %c0_23 = arith.constant 0 : index
    %c0_24 = arith.constant 0 : index
    %c0_25 = arith.constant 0 : index
    %28 = vector.load %arg1[%c1_21, %c0_22, %c0_23, %c0_24, %c0_25] : memref<4x2x5x5x4xf32, #tpu.memory_space<vmem>>, vector<1x2x4x4x1xf32>
    %29 = vector.shape_cast %28 : vector<1x2x4x4x1xf32> to vector<2x4x4x1xf32>
    %c3 = arith.constant 3 : index
    %c0_26 = arith.constant 0 : index
    %c0_27 = arith.constant 0 : index
    %30 = vector.load %arg2[%c3, %c0_26, %c0_27] : memref<9x1x16xf32, #tpu.memory_space<vmem>>, vector<1x1x16xf32>
    %31 = vector.shape_cast %30 : vector<1x1x16xf32> to vector<1x16xf32>
    %32 = vector.shape_cast %31 : vector<1x16xf32> to vector<1x1x1x16xf32>
    %33 = vector.broadcast %29 : vector<2x4x4x1xf32> to vector<2x4x4x16xf32>
    %34 = vector.broadcast %32 : vector<1x1x1x16xf32> to vector<2x4x4x16xf32>
    %35 = arith.mulf %33, %34 : vector<2x4x4x16xf32>
    %36 = arith.addf %27, %35 : vector<2x4x4x16xf32>
    %c1_28 = arith.constant 1 : index
    %c0_29 = arith.constant 0 : index
    %c0_30 = arith.constant 0 : index
    %c0_31 = arith.constant 0 : index
    %c1_32 = arith.constant 1 : index
    %37 = vector.load %arg1[%c1_28, %c0_29, %c0_30, %c0_31, %c1_32] : memref<4x2x5x5x4xf32, #tpu.memory_space<vmem>>, vector<1x2x4x4x1xf32>
    %38 = vector.shape_cast %37 : vector<1x2x4x4x1xf32> to vector<2x4x4x1xf32>
    %c4 = arith.constant 4 : index
    %c0_33 = arith.constant 0 : index
    %c0_34 = arith.constant 0 : index
    %39 = vector.load %arg2[%c4, %c0_33, %c0_34] : memref<9x1x16xf32, #tpu.memory_space<vmem>>, vector<1x1x16xf32>
    %40 = vector.shape_cast %39 : vector<1x1x16xf32> to vector<1x16xf32>
    %41 = vector.shape_cast %40 : vector<1x16xf32> to vector<1x1x1x16xf32>
    %42 = vector.broadcast %38 : vector<2x4x4x1xf32> to vector<2x4x4x16xf32>
    %43 = vector.broadcast %41 : vector<1x1x1x16xf32> to vector<2x4x4x16xf32>
    %44 = arith.mulf %42, %43 : vector<2x4x4x16xf32>
    %45 = arith.addf %36, %44 : vector<2x4x4x16xf32>
    %c1_35 = arith.constant 1 : index
    %c0_36 = arith.constant 0 : index
    %c0_37 = arith.constant 0 : index
    %c0_38 = arith.constant 0 : index
    %c2_39 = arith.constant 2 : index
    %46 = vector.load %arg1[%c1_35, %c0_36, %c0_37, %c0_38, %c2_39] : memref<4x2x5x5x4xf32, #tpu.memory_space<vmem>>, vector<1x2x4x4x1xf32>
    %47 = vector.shape_cast %46 : vector<1x2x4x4x1xf32> to vector<2x4x4x1xf32>
    %c5 = arith.constant 5 : index
    %c0_40 = arith.constant 0 : index
    %c0_41 = arith.constant 0 : index
    %48 = vector.load %arg2[%c5, %c0_40, %c0_41] : memref<9x1x16xf32, #tpu.memory_space<vmem>>, vector<1x1x16xf32>
    %49 = vector.shape_cast %48 : vector<1x1x16xf32> to vector<1x16xf32>
    %50 = vector.shape_cast %49 : vector<1x16xf32> to vector<1x1x1x16xf32>
    %51 = vector.broadcast %47 : vector<2x4x4x1xf32> to vector<2x4x4x16xf32>
    %52 = vector.broadcast %50 : vector<1x1x1x16xf32> to vector<2x4x4x16xf32>
    %53 = arith.mulf %51, %52 : vector<2x4x4x16xf32>
    %54 = arith.addf %45, %53 : vector<2x4x4x16xf32>
    %c2_42 = arith.constant 2 : index
    %c0_43 = arith.constant 0 : index
    %c0_44 = arith.constant 0 : index
    %c0_45 = arith.constant 0 : index
    %c0_46 = arith.constant 0 : index
    %55 = vector.load %arg1[%c2_42, %c0_43, %c0_44, %c0_45, %c0_46] : memref<4x2x5x5x4xf32, #tpu.memory_space<vmem>>, vector<1x2x4x4x1xf32>
    %56 = vector.shape_cast %55 : vector<1x2x4x4x1xf32> to vector<2x4x4x1xf32>
    %c6 = arith.constant 6 : index
    %c0_47 = arith.constant 0 : index
    %c0_48 = arith.constant 0 : index
    %57 = vector.load %arg2[%c6, %c0_47, %c0_48] : memref<9x1x16xf32, #tpu.memory_space<vmem>>, vector<1x1x16xf32>
    %58 = vector.shape_cast %57 : vector<1x1x16xf32> to vector<1x16xf32>
    %59 = vector.shape_cast %58 : vector<1x16xf32> to vector<1x1x1x16xf32>
    %60 = vector.broadcast %56 : vector<2x4x4x1xf32> to vector<2x4x4x16xf32>
    %61 = vector.broadcast %59 : vector<1x1x1x16xf32> to vector<2x4x4x16xf32>
    %62 = arith.mulf %60, %61 : vector<2x4x4x16xf32>
    %63 = arith.addf %54, %62 : vector<2x4x4x16xf32>
    %c2_49 = arith.constant 2 : index
    %c0_50 = arith.constant 0 : index
    %c0_51 = arith.constant 0 : index
    %c0_52 = arith.constant 0 : index
    %c1_53 = arith.constant 1 : index
    %64 = vector.load %arg1[%c2_49, %c0_50, %c0_51, %c0_52, %c1_53] : memref<4x2x5x5x4xf32, #tpu.memory_space<vmem>>, vector<1x2x4x4x1xf32>
    %65 = vector.shape_cast %64 : vector<1x2x4x4x1xf32> to vector<2x4x4x1xf32>
    %c7 = arith.constant 7 : index
    %c0_54 = arith.constant 0 : index
    %c0_55 = arith.constant 0 : index
    %66 = vector.load %arg2[%c7, %c0_54, %c0_55] : memref<9x1x16xf32, #tpu.memory_space<vmem>>, vector<1x1x16xf32>
    %67 = vector.shape_cast %66 : vector<1x1x16xf32> to vector<1x16xf32>
    %68 = vector.shape_cast %67 : vector<1x16xf32> to vector<1x1x1x16xf32>
    %69 = vector.broadcast %65 : vector<2x4x4x1xf32> to vector<2x4x4x16xf32>
    %70 = vector.broadcast %68 : vector<1x1x1x16xf32> to vector<2x4x4x16xf32>
    %71 = arith.mulf %69, %70 : vector<2x4x4x16xf32>
    %72 = arith.addf %63, %71 : vector<2x4x4x16xf32>
    %c2_56 = arith.constant 2 : index
    %c0_57 = arith.constant 0 : index
    %c0_58 = arith.constant 0 : index
    %c0_59 = arith.constant 0 : index
    %c2_60 = arith.constant 2 : index
    %73 = vector.load %arg1[%c2_56, %c0_57, %c0_58, %c0_59, %c2_60] : memref<4x2x5x5x4xf32, #tpu.memory_space<vmem>>, vector<1x2x4x4x1xf32>
    %74 = vector.shape_cast %73 : vector<1x2x4x4x1xf32> to vector<2x4x4x1xf32>
    %c8 = arith.constant 8 : index
    %c0_61 = arith.constant 0 : index
    %c0_62 = arith.constant 0 : index
    %75 = vector.load %arg2[%c8, %c0_61, %c0_62] : memref<9x1x16xf32, #tpu.memory_space<vmem>>, vector<1x1x16xf32>
    %76 = vector.shape_cast %75 : vector<1x1x16xf32> to vector<1x16xf32>
    %77 = vector.shape_cast %76 : vector<1x16xf32> to vector<1x1x1x16xf32>
    %78 = vector.broadcast %74 : vector<2x4x4x1xf32> to vector<2x4x4x16xf32>
    %79 = vector.broadcast %77 : vector<1x1x1x16xf32> to vector<2x4x4x16xf32>
    %80 = arith.mulf %78, %79 : vector<2x4x4x16xf32>
    %81 = arith.addf %72, %80 : vector<2x4x4x16xf32>
    %c0_63 = arith.constant 0 : index
    %c0_64 = arith.constant 0 : index
    %82 = vector.load %arg3[%c0_63, %c0_64] : memref<1x16xf32, #tpu.memory_space<vmem>>, vector<1x16xf32>
    %83 = vector.shape_cast %82 : vector<1x16xf32> to vector<1x1x1x16xf32>
    %84 = vector.broadcast %83 : vector<1x1x1x16xf32> to vector<2x4x4x16xf32>
    %85 = arith.addf %81, %84 : vector<2x4x4x16xf32>
    %cst_65 = arith.constant 0.000000e+00 : f32
    %86 = vector.broadcast %cst_65 : f32 to vector<2x4x4x16xf32>
    %87 = arith.maximumf %85, %86 : vector<2x4x4x16xf32>
    %cst_66 = arith.constant 0.000000e+00 : f32
    %88 = vector.broadcast %cst_66 : f32 to vector<2x4x4x16xf32>
    %c0_67 = arith.constant 0 : index
    %c0_68 = arith.constant 0 : index
    %c0_69 = arith.constant 0 : index
    %c0_70 = arith.constant 0 : index
    %c2_71 = arith.constant 2 : index
    %89 = vector.load %arg1[%c0_67, %c0_68, %c0_69, %c0_70, %c2_71] : memref<4x2x5x5x4xf32, #tpu.memory_space<vmem>>, vector<1x2x4x4x1xf32>
    %90 = vector.shape_cast %89 : vector<1x2x4x4x1xf32> to vector<2x4x4x1xf32>
    %c0_72 = arith.constant 0 : index
    %c0_73 = arith.constant 0 : index
    %c0_74 = arith.constant 0 : index
    %91 = vector.load %arg2[%c0_72, %c0_73, %c0_74] : memref<9x1x16xf32, #tpu.memory_space<vmem>>, vector<1x1x16xf32>
    %92 = vector.shape_cast %91 : vector<1x1x16xf32> to vector<1x16xf32>
    %93 = vector.shape_cast %92 : vector<1x16xf32> to vector<1x1x1x16xf32>
    %94 = vector.broadcast %90 : vector<2x4x4x1xf32> to vector<2x4x4x16xf32>
    %95 = vector.broadcast %93 : vector<1x1x1x16xf32> to vector<2x4x4x16xf32>
    %96 = arith.mulf %94, %95 : vector<2x4x4x16xf32>
    %97 = arith.addf %88, %96 : vector<2x4x4x16xf32>
    %c0_75 = arith.constant 0 : index
    %c0_76 = arith.constant 0 : index
    %c0_77 = arith.constant 0 : index
    %c0_78 = arith.constant 0 : index
    %c3_79 = arith.constant 3 : index
    %98 = vector.load %arg1[%c0_75, %c0_76, %c0_77, %c0_78, %c3_79] : memref<4x2x5x5x4xf32, #tpu.memory_space<vmem>>, vector<1x2x4x4x1xf32>
    %99 = vector.shape_cast %98 : vector<1x2x4x4x1xf32> to vector<2x4x4x1xf32>
    %c1_80 = arith.constant 1 : index
    %c0_81 = arith.constant 0 : index
    %c0_82 = arith.constant 0 : index
    %100 = vector.load %arg2[%c1_80, %c0_81, %c0_82] : memref<9x1x16xf32, #tpu.memory_space<vmem>>, vector<1x1x16xf32>
    %101 = vector.shape_cast %100 : vector<1x1x16xf32> to vector<1x16xf32>
    %102 = vector.shape_cast %101 : vector<1x16xf32> to vector<1x1x1x16xf32>
    %103 = vector.broadcast %99 : vector<2x4x4x1xf32> to vector<2x4x4x16xf32>
    %104 = vector.broadcast %102 : vector<1x1x1x16xf32> to vector<2x4x4x16xf32>
    %105 = arith.mulf %103, %104 : vector<2x4x4x16xf32>
    %106 = arith.addf %97, %105 : vector<2x4x4x16xf32>
    %c0_83 = arith.constant 0 : index
    %c0_84 = arith.constant 0 : index
    %c0_85 = arith.constant 0 : index
    %c1_86 = arith.constant 1 : index
    %c0_87 = arith.constant 0 : index
    %107 = vector.load %arg1[%c0_83, %c0_84, %c0_85, %c1_86, %c0_87] : memref<4x2x5x5x4xf32, #tpu.memory_space<vmem>>, vector<1x2x4x4x1xf32>
    %108 = vector.shape_cast %107 : vector<1x2x4x4x1xf32> to vector<2x4x4x1xf32>
    %c2_88 = arith.constant 2 : index
    %c0_89 = arith.constant 0 : index
    %c0_90 = arith.constant 0 : index
    %109 = vector.load %arg2[%c2_88, %c0_89, %c0_90] : memref<9x1x16xf32, #tpu.memory_space<vmem>>, vector<1x1x16xf32>
    %110 = vector.shape_cast %109 : vector<1x1x16xf32> to vector<1x16xf32>
    %111 = vector.shape_cast %110 : vector<1x16xf32> to vector<1x1x1x16xf32>
    %112 = vector.broadcast %108 : vector<2x4x4x1xf32> to vector<2x4x4x16xf32>
    %113 = vector.broadcast %111 : vector<1x1x1x16xf32> to vector<2x4x4x16xf32>
    %114 = arith.mulf %112, %113 : vector<2x4x4x16xf32>
    %115 = arith.addf %106, %114 : vector<2x4x4x16xf32>
    %c1_91 = arith.constant 1 : index
    %c0_92 = arith.constant 0 : index
    %c0_93 = arith.constant 0 : index
    %c0_94 = arith.constant 0 : index
    %c2_95 = arith.constant 2 : index
    %116 = vector.load %arg1[%c1_91, %c0_92, %c0_93, %c0_94, %c2_95] : memref<4x2x5x5x4xf32, #tpu.memory_space<vmem>>, vector<1x2x4x4x1xf32>
    %117 = vector.shape_cast %116 : vector<1x2x4x4x1xf32> to vector<2x4x4x1xf32>
    %c3_96 = arith.constant 3 : index
    %c0_97 = arith.constant 0 : index
    %c0_98 = arith.constant 0 : index
    %118 = vector.load %arg2[%c3_96, %c0_97, %c0_98] : memref<9x1x16xf32, #tpu.memory_space<vmem>>, vector<1x1x16xf32>
    %119 = vector.shape_cast %118 : vector<1x1x16xf32> to vector<1x16xf32>
    %120 = vector.shape_cast %119 : vector<1x16xf32> to vector<1x1x1x16xf32>
    %121 = vector.broadcast %117 : vector<2x4x4x1xf32> to vector<2x4x4x16xf32>
    %122 = vector.broadcast %120 : vector<1x1x1x16xf32> to vector<2x4x4x16xf32>
    %123 = arith.mulf %121, %122 : vector<2x4x4x16xf32>
    %124 = arith.addf %115, %123 : vector<2x4x4x16xf32>
    %c1_99 = arith.constant 1 : index
    %c0_100 = arith.constant 0 : index
    %c0_101 = arith.constant 0 : index
    %c0_102 = arith.constant 0 : index
    %c3_103 = arith.constant 3 : index
    %125 = vector.load %arg1[%c1_99, %c0_100, %c0_101, %c0_102, %c3_103] : memref<4x2x5x5x4xf32, #tpu.memory_space<vmem>>, vector<1x2x4x4x1xf32>
    %126 = vector.shape_cast %125 : vector<1x2x4x4x1xf32> to vector<2x4x4x1xf32>
    %c4_104 = arith.constant 4 : index
    %c0_105 = arith.constant 0 : index
    %c0_106 = arith.constant 0 : index
    %127 = vector.load %arg2[%c4_104, %c0_105, %c0_106] : memref<9x1x16xf32, #tpu.memory_space<vmem>>, vector<1x1x16xf32>
    %128 = vector.shape_cast %127 : vector<1x1x16xf32> to vector<1x16xf32>
    %129 = vector.shape_cast %128 : vector<1x16xf32> to vector<1x1x1x16xf32>
    %130 = vector.broadcast %126 : vector<2x4x4x1xf32> to vector<2x4x4x16xf32>
    %131 = vector.broadcast %129 : vector<1x1x1x16xf32> to vector<2x4x4x16xf32>
    %132 = arith.mulf %130, %131 : vector<2x4x4x16xf32>
    %133 = arith.addf %124, %132 : vector<2x4x4x16xf32>
    %c1_107 = arith.constant 1 : index
    %c0_108 = arith.constant 0 : index
    %c0_109 = arith.constant 0 : index
    %c1_110 = arith.constant 1 : index
    %c0_111 = arith.constant 0 : index
    %134 = vector.load %arg1[%c1_107, %c0_108, %c0_109, %c1_110, %c0_111] : memref<4x2x5x5x4xf32, #tpu.memory_space<vmem>>, vector<1x2x4x4x1xf32>
    %135 = vector.shape_cast %134 : vector<1x2x4x4x1xf32> to vector<2x4x4x1xf32>
    %c5_112 = arith.constant 5 : index
    %c0_113 = arith.constant 0 : index
    %c0_114 = arith.constant 0 : index
    %136 = vector.load %arg2[%c5_112, %c0_113, %c0_114] : memref<9x1x16xf32, #tpu.memory_space<vmem>>, vector<1x1x16xf32>
    %137 = vector.shape_cast %136 : vector<1x1x16xf32> to vector<1x16xf32>
    %138 = vector.shape_cast %137 : vector<1x16xf32> to vector<1x1x1x16xf32>
    %139 = vector.broadcast %135 : vector<2x4x4x1xf32> to vector<2x4x4x16xf32>
    %140 = vector.broadcast %138 : vector<1x1x1x16xf32> to vector<2x4x4x16xf32>
    %141 = arith.mulf %139, %140 : vector<2x4x4x16xf32>
    %142 = arith.addf %133, %141 : vector<2x4x4x16xf32>
    %c2_115 = arith.constant 2 : index
    %c0_116 = arith.constant 0 : index
    %c0_117 = arith.constant 0 : index
    %c0_118 = arith.constant 0 : index
    %c2_119 = arith.constant 2 : index
    %143 = vector.load %arg1[%c2_115, %c0_116, %c0_117, %c0_118, %c2_119] : memref<4x2x5x5x4xf32, #tpu.memory_space<vmem>>, vector<1x2x4x4x1xf32>
    %144 = vector.shape_cast %143 : vector<1x2x4x4x1xf32> to vector<2x4x4x1xf32>
    %c6_120 = arith.constant 6 : index
    %c0_121 = arith.constant 0 : index
    %c0_122 = arith.constant 0 : index
    %145 = vector.load %arg2[%c6_120, %c0_121, %c0_122] : memref<9x1x16xf32, #tpu.memory_space<vmem>>, vector<1x1x16xf32>
    %146 = vector.shape_cast %145 : vector<1x1x16xf32> to vector<1x16xf32>
    %147 = vector.shape_cast %146 : vector<1x16xf32> to vector<1x1x1x16xf32>
    %148 = vector.broadcast %144 : vector<2x4x4x1xf32> to vector<2x4x4x16xf32>
    %149 = vector.broadcast %147 : vector<1x1x1x16xf32> to vector<2x4x4x16xf32>
    %150 = arith.mulf %148, %149 : vector<2x4x4x16xf32>
    %151 = arith.addf %142, %150 : vector<2x4x4x16xf32>
    %c2_123 = arith.constant 2 : index
    %c0_124 = arith.constant 0 : index
    %c0_125 = arith.constant 0 : index
    %c0_126 = arith.constant 0 : index
    %c3_127 = arith.constant 3 : index
    %152 = vector.load %arg1[%c2_123, %c0_124, %c0_125, %c0_126, %c3_127] : memref<4x2x5x5x4xf32, #tpu.memory_space<vmem>>, vector<1x2x4x4x1xf32>
    %153 = vector.shape_cast %152 : vector<1x2x4x4x1xf32> to vector<2x4x4x1xf32>
    %c7_128 = arith.constant 7 : index
    %c0_129 = arith.constant 0 : index
    %c0_130 = arith.constant 0 : index
    %154 = vector.load %arg2[%c7_128, %c0_129, %c0_130] : memref<9x1x16xf32, #tpu.memory_space<vmem>>, vector<1x1x16xf32>
    %155 = vector.shape_cast %154 : vector<1x1x16xf32> to vector<1x16xf32>
    %156 = vector.shape_cast %155 : vector<1x16xf32> to vector<1x1x1x16xf32>
    %157 = vector.broadcast %153 : vector<2x4x4x1xf32> to vector<2x4x4x16xf32>
    %158 = vector.broadcast %156 : vector<1x1x1x16xf32> to vector<2x4x4x16xf32>
    %159 = arith.mulf %157, %158 : vector<2x4x4x16xf32>
    %160 = arith.addf %151, %159 : vector<2x4x4x16xf32>
    %c2_131 = arith.constant 2 : index
    %c0_132 = arith.constant 0 : index
    %c0_133 = arith.constant 0 : index
    %c1_134 = arith.constant 1 : index
    %c0_135 = arith.constant 0 : index
    %161 = vector.load %arg1[%c2_131, %c0_132, %c0_133, %c1_134, %c0_135] : memref<4x2x5x5x4xf32, #tpu.memory_space<vmem>>, vector<1x2x4x4x1xf32>
    %162 = vector.shape_cast %161 : vector<1x2x4x4x1xf32> to vector<2x4x4x1xf32>
    %c8_136 = arith.constant 8 : index
    %c0_137 = arith.constant 0 : index
    %c0_138 = arith.constant 0 : index
    %163 = vector.load %arg2[%c8_136, %c0_137, %c0_138] : memref<9x1x16xf32, #tpu.memory_space<vmem>>, vector<1x1x16xf32>
    %164 = vector.shape_cast %163 : vector<1x1x16xf32> to vector<1x16xf32>
    %165 = vector.shape_cast %164 : vector<1x16xf32> to vector<1x1x1x16xf32>
    %166 = vector.broadcast %162 : vector<2x4x4x1xf32> to vector<2x4x4x16xf32>
    %167 = vector.broadcast %165 : vector<1x1x1x16xf32> to vector<2x4x4x16xf32>
    %168 = arith.mulf %166, %167 : vector<2x4x4x16xf32>
    %169 = arith.addf %160, %168 : vector<2x4x4x16xf32>
    %c0_139 = arith.constant 0 : index
    %c0_140 = arith.constant 0 : index
    %170 = vector.load %arg3[%c0_139, %c0_140] : memref<1x16xf32, #tpu.memory_space<vmem>>, vector<1x16xf32>
    %171 = vector.shape_cast %170 : vector<1x16xf32> to vector<1x1x1x16xf32>
    %172 = vector.broadcast %171 : vector<1x1x1x16xf32> to vector<2x4x4x16xf32>
    %173 = arith.addf %169, %172 : vector<2x4x4x16xf32>
    %cst_141 = arith.constant 0.000000e+00 : f32
    %174 = vector.broadcast %cst_141 : f32 to vector<2x4x4x16xf32>
    %175 = arith.maximumf %173, %174 : vector<2x4x4x16xf32>
    %cst_142 = arith.constant 0.000000e+00 : f32
    %176 = vector.broadcast %cst_142 : f32 to vector<2x4x4x16xf32>
    %c2_143 = arith.constant 2 : index
    %c0_144 = arith.constant 0 : index
    %c0_145 = arith.constant 0 : index
    %c0_146 = arith.constant 0 : index
    %c0_147 = arith.constant 0 : index
    %177 = vector.load %arg1[%c2_143, %c0_144, %c0_145, %c0_146, %c0_147] : memref<4x2x5x5x4xf32, #tpu.memory_space<vmem>>, vector<1x2x4x4x1xf32>
    %178 = vector.shape_cast %177 : vector<1x2x4x4x1xf32> to vector<2x4x4x1xf32>
    %c0_148 = arith.constant 0 : index
    %c0_149 = arith.constant 0 : index
    %c0_150 = arith.constant 0 : index
    %179 = vector.load %arg2[%c0_148, %c0_149, %c0_150] : memref<9x1x16xf32, #tpu.memory_space<vmem>>, vector<1x1x16xf32>
    %180 = vector.shape_cast %179 : vector<1x1x16xf32> to vector<1x16xf32>
    %181 = vector.shape_cast %180 : vector<1x16xf32> to vector<1x1x1x16xf32>
    %182 = vector.broadcast %178 : vector<2x4x4x1xf32> to vector<2x4x4x16xf32>
    %183 = vector.broadcast %181 : vector<1x1x1x16xf32> to vector<2x4x4x16xf32>
    %184 = arith.mulf %182, %183 : vector<2x4x4x16xf32>
    %185 = arith.addf %176, %184 : vector<2x4x4x16xf32>
    %c2_151 = arith.constant 2 : index
    %c0_152 = arith.constant 0 : index
    %c0_153 = arith.constant 0 : index
    %c0_154 = arith.constant 0 : index
    %c1_155 = arith.constant 1 : index
    %186 = vector.load %arg1[%c2_151, %c0_152, %c0_153, %c0_154, %c1_155] : memref<4x2x5x5x4xf32, #tpu.memory_space<vmem>>, vector<1x2x4x4x1xf32>
    %187 = vector.shape_cast %186 : vector<1x2x4x4x1xf32> to vector<2x4x4x1xf32>
    %c1_156 = arith.constant 1 : index
    %c0_157 = arith.constant 0 : index
    %c0_158 = arith.constant 0 : index
    %188 = vector.load %arg2[%c1_156, %c0_157, %c0_158] : memref<9x1x16xf32, #tpu.memory_space<vmem>>, vector<1x1x16xf32>
    %189 = vector.shape_cast %188 : vector<1x1x16xf32> to vector<1x16xf32>
    %190 = vector.shape_cast %189 : vector<1x16xf32> to vector<1x1x1x16xf32>
    %191 = vector.broadcast %187 : vector<2x4x4x1xf32> to vector<2x4x4x16xf32>
    %192 = vector.broadcast %190 : vector<1x1x1x16xf32> to vector<2x4x4x16xf32>
    %193 = arith.mulf %191, %192 : vector<2x4x4x16xf32>
    %194 = arith.addf %185, %193 : vector<2x4x4x16xf32>
    %c2_159 = arith.constant 2 : index
    %c0_160 = arith.constant 0 : index
    %c0_161 = arith.constant 0 : index
    %c0_162 = arith.constant 0 : index
    %c2_163 = arith.constant 2 : index
    %195 = vector.load %arg1[%c2_159, %c0_160, %c0_161, %c0_162, %c2_163] : memref<4x2x5x5x4xf32, #tpu.memory_space<vmem>>, vector<1x2x4x4x1xf32>
    %196 = vector.shape_cast %195 : vector<1x2x4x4x1xf32> to vector<2x4x4x1xf32>
    %c2_164 = arith.constant 2 : index
    %c0_165 = arith.constant 0 : index
    %c0_166 = arith.constant 0 : index
    %197 = vector.load %arg2[%c2_164, %c0_165, %c0_166] : memref<9x1x16xf32, #tpu.memory_space<vmem>>, vector<1x1x16xf32>
    %198 = vector.shape_cast %197 : vector<1x1x16xf32> to vector<1x16xf32>
    %199 = vector.shape_cast %198 : vector<1x16xf32> to vector<1x1x1x16xf32>
    %200 = vector.broadcast %196 : vector<2x4x4x1xf32> to vector<2x4x4x16xf32>
    %201 = vector.broadcast %199 : vector<1x1x1x16xf32> to vector<2x4x4x16xf32>
    %202 = arith.mulf %200, %201 : vector<2x4x4x16xf32>
    %203 = arith.addf %194, %202 : vector<2x4x4x16xf32>
    %c3_167 = arith.constant 3 : index
    %c0_168 = arith.constant 0 : index
    %c0_169 = arith.constant 0 : index
    %c0_170 = arith.constant 0 : index
    %c0_171 = arith.constant 0 : index
    %204 = vector.load %arg1[%c3_167, %c0_168, %c0_169, %c0_170, %c0_171] : memref<4x2x5x5x4xf32, #tpu.memory_space<vmem>>, vector<1x2x4x4x1xf32>
    %205 = vector.shape_cast %204 : vector<1x2x4x4x1xf32> to vector<2x4x4x1xf32>
    %c3_172 = arith.constant 3 : index
    %c0_173 = arith.constant 0 : index
    %c0_174 = arith.constant 0 : index
    %206 = vector.load %arg2[%c3_172, %c0_173, %c0_174] : memref<9x1x16xf32, #tpu.memory_space<vmem>>, vector<1x1x16xf32>
    %207 = vector.shape_cast %206 : vector<1x1x16xf32> to vector<1x16xf32>
    %208 = vector.shape_cast %207 : vector<1x16xf32> to vector<1x1x1x16xf32>
    %209 = vector.broadcast %205 : vector<2x4x4x1xf32> to vector<2x4x4x16xf32>
    %210 = vector.broadcast %208 : vector<1x1x1x16xf32> to vector<2x4x4x16xf32>
    %211 = arith.mulf %209, %210 : vector<2x4x4x16xf32>
    %212 = arith.addf %203, %211 : vector<2x4x4x16xf32>
    %c3_175 = arith.constant 3 : index
    %c0_176 = arith.constant 0 : index
    %c0_177 = arith.constant 0 : index
    %c0_178 = arith.constant 0 : index
    %c1_179 = arith.constant 1 : index
    %213 = vector.load %arg1[%c3_175, %c0_176, %c0_177, %c0_178, %c1_179] : memref<4x2x5x5x4xf32, #tpu.memory_space<vmem>>, vector<1x2x4x4x1xf32>
    %214 = vector.shape_cast %213 : vector<1x2x4x4x1xf32> to vector<2x4x4x1xf32>
    %c4_180 = arith.constant 4 : index
    %c0_181 = arith.constant 0 : index
    %c0_182 = arith.constant 0 : index
    %215 = vector.load %arg2[%c4_180, %c0_181, %c0_182] : memref<9x1x16xf32, #tpu.memory_space<vmem>>, vector<1x1x16xf32>
    %216 = vector.shape_cast %215 : vector<1x1x16xf32> to vector<1x16xf32>
    %217 = vector.shape_cast %216 : vector<1x16xf32> to vector<1x1x1x16xf32>
    %218 = vector.broadcast %214 : vector<2x4x4x1xf32> to vector<2x4x4x16xf32>
    %219 = vector.broadcast %217 : vector<1x1x1x16xf32> to vector<2x4x4x16xf32>
    %220 = arith.mulf %218, %219 : vector<2x4x4x16xf32>
    %221 = arith.addf %212, %220 : vector<2x4x4x16xf32>
    %c3_183 = arith.constant 3 : index
    %c0_184 = arith.constant 0 : index
    %c0_185 = arith.constant 0 : index
    %c0_186 = arith.constant 0 : index
    %c2_187 = arith.constant 2 : index
    %222 = vector.load %arg1[%c3_183, %c0_184, %c0_185, %c0_186, %c2_187] : memref<4x2x5x5x4xf32, #tpu.memory_space<vmem>>, vector<1x2x4x4x1xf32>
    %223 = vector.shape_cast %222 : vector<1x2x4x4x1xf32> to vector<2x4x4x1xf32>
    %c5_188 = arith.constant 5 : index
    %c0_189 = arith.constant 0 : index
    %c0_190 = arith.constant 0 : index
    %224 = vector.load %arg2[%c5_188, %c0_189, %c0_190] : memref<9x1x16xf32, #tpu.memory_space<vmem>>, vector<1x1x16xf32>
    %225 = vector.shape_cast %224 : vector<1x1x16xf32> to vector<1x16xf32>
    %226 = vector.shape_cast %225 : vector<1x16xf32> to vector<1x1x1x16xf32>
    %227 = vector.broadcast %223 : vector<2x4x4x1xf32> to vector<2x4x4x16xf32>
    %228 = vector.broadcast %226 : vector<1x1x1x16xf32> to vector<2x4x4x16xf32>
    %229 = arith.mulf %227, %228 : vector<2x4x4x16xf32>
    %230 = arith.addf %221, %229 : vector<2x4x4x16xf32>
    %c0_191 = arith.constant 0 : index
    %c0_192 = arith.constant 0 : index
    %c1_193 = arith.constant 1 : index
    %c0_194 = arith.constant 0 : index
    %c0_195 = arith.constant 0 : index
    %231 = vector.load %arg1[%c0_191, %c0_192, %c1_193, %c0_194, %c0_195] : memref<4x2x5x5x4xf32, #tpu.memory_space<vmem>>, vector<1x2x4x4x1xf32>
    %232 = vector.shape_cast %231 : vector<1x2x4x4x1xf32> to vector<2x4x4x1xf32>
    %c6_196 = arith.constant 6 : index
    %c0_197 = arith.constant 0 : index
    %c0_198 = arith.constant 0 : index
    %233 = vector.load %arg2[%c6_196, %c0_197, %c0_198] : memref<9x1x16xf32, #tpu.memory_space<vmem>>, vector<1x1x16xf32>
    %234 = vector.shape_cast %233 : vector<1x1x16xf32> to vector<1x16xf32>
    %235 = vector.shape_cast %234 : vector<1x16xf32> to vector<1x1x1x16xf32>
    %236 = vector.broadcast %232 : vector<2x4x4x1xf32> to vector<2x4x4x16xf32>
    %237 = vector.broadcast %235 : vector<1x1x1x16xf32> to vector<2x4x4x16xf32>
    %238 = arith.mulf %236, %237 : vector<2x4x4x16xf32>
    %239 = arith.addf %230, %238 : vector<2x4x4x16xf32>
    %c0_199 = arith.constant 0 : index
    %c0_200 = arith.constant 0 : index
    %c1_201 = arith.constant 1 : index
    %c0_202 = arith.constant 0 : index
    %c1_203 = arith.constant 1 : index
    %240 = vector.load %arg1[%c0_199, %c0_200, %c1_201, %c0_202, %c1_203] : memref<4x2x5x5x4xf32, #tpu.memory_space<vmem>>, vector<1x2x4x4x1xf32>
    %241 = vector.shape_cast %240 : vector<1x2x4x4x1xf32> to vector<2x4x4x1xf32>
    %c7_204 = arith.constant 7 : index
    %c0_205 = arith.constant 0 : index
    %c0_206 = arith.constant 0 : index
    %242 = vector.load %arg2[%c7_204, %c0_205, %c0_206] : memref<9x1x16xf32, #tpu.memory_space<vmem>>, vector<1x1x16xf32>
    %243 = vector.shape_cast %242 : vector<1x1x16xf32> to vector<1x16xf32>
    %244 = vector.shape_cast %243 : vector<1x16xf32> to vector<1x1x1x16xf32>
    %245 = vector.broadcast %241 : vector<2x4x4x1xf32> to vector<2x4x4x16xf32>
    %246 = vector.broadcast %244 : vector<1x1x1x16xf32> to vector<2x4x4x16xf32>
    %247 = arith.mulf %245, %246 : vector<2x4x4x16xf32>
    %248 = arith.addf %239, %247 : vector<2x4x4x16xf32>
    %c0_207 = arith.constant 0 : index
    %c0_208 = arith.constant 0 : index
    %c1_209 = arith.constant 1 : index
    %c0_210 = arith.constant 0 : index
    %c2_211 = arith.constant 2 : index
    %249 = vector.load %arg1[%c0_207, %c0_208, %c1_209, %c0_210, %c2_211] : memref<4x2x5x5x4xf32, #tpu.memory_space<vmem>>, vector<1x2x4x4x1xf32>
    %250 = vector.shape_cast %249 : vector<1x2x4x4x1xf32> to vector<2x4x4x1xf32>
    %c8_212 = arith.constant 8 : index
    %c0_213 = arith.constant 0 : index
    %c0_214 = arith.constant 0 : index
    %251 = vector.load %arg2[%c8_212, %c0_213, %c0_214] : memref<9x1x16xf32, #tpu.memory_space<vmem>>, vector<1x1x16xf32>
    %252 = vector.shape_cast %251 : vector<1x1x16xf32> to vector<1x16xf32>
    %253 = vector.shape_cast %252 : vector<1x16xf32> to vector<1x1x1x16xf32>
    %254 = vector.broadcast %250 : vector<2x4x4x1xf32> to vector<2x4x4x16xf32>
    %255 = vector.broadcast %253 : vector<1x1x1x16xf32> to vector<2x4x4x16xf32>
    %256 = arith.mulf %254, %255 : vector<2x4x4x16xf32>
    %257 = arith.addf %248, %256 : vector<2x4x4x16xf32>
    %c0_215 = arith.constant 0 : index
    %c0_216 = arith.constant 0 : index
    %258 = vector.load %arg3[%c0_215, %c0_216] : memref<1x16xf32, #tpu.memory_space<vmem>>, vector<1x16xf32>
    %259 = vector.shape_cast %258 : vector<1x16xf32> to vector<1x1x1x16xf32>
    %260 = vector.broadcast %259 : vector<1x1x1x16xf32> to vector<2x4x4x16xf32>
    %261 = arith.addf %257, %260 : vector<2x4x4x16xf32>
    %cst_217 = arith.constant 0.000000e+00 : f32
    %262 = vector.broadcast %cst_217 : f32 to vector<2x4x4x16xf32>
    %263 = arith.maximumf %261, %262 : vector<2x4x4x16xf32>
    %cst_218 = arith.constant 0.000000e+00 : f32
    %264 = vector.broadcast %cst_218 : f32 to vector<2x4x4x16xf32>
    %c2_219 = arith.constant 2 : index
    %c0_220 = arith.constant 0 : index
    %c0_221 = arith.constant 0 : index
    %c0_222 = arith.constant 0 : index
    %c2_223 = arith.constant 2 : index
    %265 = vector.load %arg1[%c2_219, %c0_220, %c0_221, %c0_222, %c2_223] : memref<4x2x5x5x4xf32, #tpu.memory_space<vmem>>, vector<1x2x4x4x1xf32>
    %266 = vector.shape_cast %265 : vector<1x2x4x4x1xf32> to vector<2x4x4x1xf32>
    %c0_224 = arith.constant 0 : index
    %c0_225 = arith.constant 0 : index
    %c0_226 = arith.constant 0 : index
    %267 = vector.load %arg2[%c0_224, %c0_225, %c0_226] : memref<9x1x16xf32, #tpu.memory_space<vmem>>, vector<1x1x16xf32>
    %268 = vector.shape_cast %267 : vector<1x1x16xf32> to vector<1x16xf32>
    %269 = vector.shape_cast %268 : vector<1x16xf32> to vector<1x1x1x16xf32>
    %270 = vector.broadcast %266 : vector<2x4x4x1xf32> to vector<2x4x4x16xf32>
    %271 = vector.broadcast %269 : vector<1x1x1x16xf32> to vector<2x4x4x16xf32>
    %272 = arith.mulf %270, %271 : vector<2x4x4x16xf32>
    %273 = arith.addf %264, %272 : vector<2x4x4x16xf32>
    %c2_227 = arith.constant 2 : index
    %c0_228 = arith.constant 0 : index
    %c0_229 = arith.constant 0 : index
    %c0_230 = arith.constant 0 : index
    %c3_231 = arith.constant 3 : index
    %274 = vector.load %arg1[%c2_227, %c0_228, %c0_229, %c0_230, %c3_231] : memref<4x2x5x5x4xf32, #tpu.memory_space<vmem>>, vector<1x2x4x4x1xf32>
    %275 = vector.shape_cast %274 : vector<1x2x4x4x1xf32> to vector<2x4x4x1xf32>
    %c1_232 = arith.constant 1 : index
    %c0_233 = arith.constant 0 : index
    %c0_234 = arith.constant 0 : index
    %276 = vector.load %arg2[%c1_232, %c0_233, %c0_234] : memref<9x1x16xf32, #tpu.memory_space<vmem>>, vector<1x1x16xf32>
    %277 = vector.shape_cast %276 : vector<1x1x16xf32> to vector<1x16xf32>
    %278 = vector.shape_cast %277 : vector<1x16xf32> to vector<1x1x1x16xf32>
    %279 = vector.broadcast %275 : vector<2x4x4x1xf32> to vector<2x4x4x16xf32>
    %280 = vector.broadcast %278 : vector<1x1x1x16xf32> to vector<2x4x4x16xf32>
    %281 = arith.mulf %279, %280 : vector<2x4x4x16xf32>
    %282 = arith.addf %273, %281 : vector<2x4x4x16xf32>
    %c2_235 = arith.constant 2 : index
    %c0_236 = arith.constant 0 : index
    %c0_237 = arith.constant 0 : index
    %c1_238 = arith.constant 1 : index
    %c0_239 = arith.constant 0 : index
    %283 = vector.load %arg1[%c2_235, %c0_236, %c0_237, %c1_238, %c0_239] : memref<4x2x5x5x4xf32, #tpu.memory_space<vmem>>, vector<1x2x4x4x1xf32>
    %284 = vector.shape_cast %283 : vector<1x2x4x4x1xf32> to vector<2x4x4x1xf32>
    %c2_240 = arith.constant 2 : index
    %c0_241 = arith.constant 0 : index
    %c0_242 = arith.constant 0 : index
    %285 = vector.load %arg2[%c2_240, %c0_241, %c0_242] : memref<9x1x16xf32, #tpu.memory_space<vmem>>, vector<1x1x16xf32>
    %286 = vector.shape_cast %285 : vector<1x1x16xf32> to vector<1x16xf32>
    %287 = vector.shape_cast %286 : vector<1x16xf32> to vector<1x1x1x16xf32>
    %288 = vector.broadcast %284 : vector<2x4x4x1xf32> to vector<2x4x4x16xf32>
    %289 = vector.broadcast %287 : vector<1x1x1x16xf32> to vector<2x4x4x16xf32>
    %290 = arith.mulf %288, %289 : vector<2x4x4x16xf32>
    %291 = arith.addf %282, %290 : vector<2x4x4x16xf32>
    %c3_243 = arith.constant 3 : index
    %c0_244 = arith.constant 0 : index
    %c0_245 = arith.constant 0 : index
    %c0_246 = arith.constant 0 : index
    %c2_247 = arith.constant 2 : index
    %292 = vector.load %arg1[%c3_243, %c0_244, %c0_245, %c0_246, %c2_247] : memref<4x2x5x5x4xf32, #tpu.memory_space<vmem>>, vector<1x2x4x4x1xf32>
    %293 = vector.shape_cast %292 : vector<1x2x4x4x1xf32> to vector<2x4x4x1xf32>
    %c3_248 = arith.constant 3 : index
    %c0_249 = arith.constant 0 : index
    %c0_250 = arith.constant 0 : index
    %294 = vector.load %arg2[%c3_248, %c0_249, %c0_250] : memref<9x1x16xf32, #tpu.memory_space<vmem>>, vector<1x1x16xf32>
    %295 = vector.shape_cast %294 : vector<1x1x16xf32> to vector<1x16xf32>
    %296 = vector.shape_cast %295 : vector<1x16xf32> to vector<1x1x1x16xf32>
    %297 = vector.broadcast %293 : vector<2x4x4x1xf32> to vector<2x4x4x16xf32>
    %298 = vector.broadcast %296 : vector<1x1x1x16xf32> to vector<2x4x4x16xf32>
    %299 = arith.mulf %297, %298 : vector<2x4x4x16xf32>
    %300 = arith.addf %291, %299 : vector<2x4x4x16xf32>
    %c3_251 = arith.constant 3 : index
    %c0_252 = arith.constant 0 : index
    %c0_253 = arith.constant 0 : index
    %c0_254 = arith.constant 0 : index
    %c3_255 = arith.constant 3 : index
    %301 = vector.load %arg1[%c3_251, %c0_252, %c0_253, %c0_254, %c3_255] : memref<4x2x5x5x4xf32, #tpu.memory_space<vmem>>, vector<1x2x4x4x1xf32>
    %302 = vector.shape_cast %301 : vector<1x2x4x4x1xf32> to vector<2x4x4x1xf32>
    %c4_256 = arith.constant 4 : index
    %c0_257 = arith.constant 0 : index
    %c0_258 = arith.constant 0 : index
    %303 = vector.load %arg2[%c4_256, %c0_257, %c0_258] : memref<9x1x16xf32, #tpu.memory_space<vmem>>, vector<1x1x16xf32>
    %304 = vector.shape_cast %303 : vector<1x1x16xf32> to vector<1x16xf32>
    %305 = vector.shape_cast %304 : vector<1x16xf32> to vector<1x1x1x16xf32>
    %306 = vector.broadcast %302 : vector<2x4x4x1xf32> to vector<2x4x4x16xf32>
    %307 = vector.broadcast %305 : vector<1x1x1x16xf32> to vector<2x4x4x16xf32>
    %308 = arith.mulf %306, %307 : vector<2x4x4x16xf32>
    %309 = arith.addf %300, %308 : vector<2x4x4x16xf32>
    %c3_259 = arith.constant 3 : index
    %c0_260 = arith.constant 0 : index
    %c0_261 = arith.constant 0 : index
    %c1_262 = arith.constant 1 : index
    %c0_263 = arith.constant 0 : index
    %310 = vector.load %arg1[%c3_259, %c0_260, %c0_261, %c1_262, %c0_263] : memref<4x2x5x5x4xf32, #tpu.memory_space<vmem>>, vector<1x2x4x4x1xf32>
    %311 = vector.shape_cast %310 : vector<1x2x4x4x1xf32> to vector<2x4x4x1xf32>
    %c5_264 = arith.constant 5 : index
    %c0_265 = arith.constant 0 : index
    %c0_266 = arith.constant 0 : index
    %312 = vector.load %arg2[%c5_264, %c0_265, %c0_266] : memref<9x1x16xf32, #tpu.memory_space<vmem>>, vector<1x1x16xf32>
    %313 = vector.shape_cast %312 : vector<1x1x16xf32> to vector<1x16xf32>
    %314 = vector.shape_cast %313 : vector<1x16xf32> to vector<1x1x1x16xf32>
    %315 = vector.broadcast %311 : vector<2x4x4x1xf32> to vector<2x4x4x16xf32>
    %316 = vector.broadcast %314 : vector<1x1x1x16xf32> to vector<2x4x4x16xf32>
    %317 = arith.mulf %315, %316 : vector<2x4x4x16xf32>
    %318 = arith.addf %309, %317 : vector<2x4x4x16xf32>
    %c0_267 = arith.constant 0 : index
    %c0_268 = arith.constant 0 : index
    %c1_269 = arith.constant 1 : index
    %c0_270 = arith.constant 0 : index
    %c2_271 = arith.constant 2 : index
    %319 = vector.load %arg1[%c0_267, %c0_268, %c1_269, %c0_270, %c2_271] : memref<4x2x5x5x4xf32, #tpu.memory_space<vmem>>, vector<1x2x4x4x1xf32>
    %320 = vector.shape_cast %319 : vector<1x2x4x4x1xf32> to vector<2x4x4x1xf32>
    %c6_272 = arith.constant 6 : index
    %c0_273 = arith.constant 0 : index
    %c0_274 = arith.constant 0 : index
    %321 = vector.load %arg2[%c6_272, %c0_273, %c0_274] : memref<9x1x16xf32, #tpu.memory_space<vmem>>, vector<1x1x16xf32>
    %322 = vector.shape_cast %321 : vector<1x1x16xf32> to vector<1x16xf32>
    %323 = vector.shape_cast %322 : vector<1x16xf32> to vector<1x1x1x16xf32>
    %324 = vector.broadcast %320 : vector<2x4x4x1xf32> to vector<2x4x4x16xf32>
    %325 = vector.broadcast %323 : vector<1x1x1x16xf32> to vector<2x4x4x16xf32>
    %326 = arith.mulf %324, %325 : vector<2x4x4x16xf32>
    %327 = arith.addf %318, %326 : vector<2x4x4x16xf32>
    %c0_275 = arith.constant 0 : index
    %c0_276 = arith.constant 0 : index
    %c1_277 = arith.constant 1 : index
    %c0_278 = arith.constant 0 : index
    %c3_279 = arith.constant 3 : index
    %328 = vector.load %arg1[%c0_275, %c0_276, %c1_277, %c0_278, %c3_279] : memref<4x2x5x5x4xf32, #tpu.memory_space<vmem>>, vector<1x2x4x4x1xf32>
    %329 = vector.shape_cast %328 : vector<1x2x4x4x1xf32> to vector<2x4x4x1xf32>
    %c7_280 = arith.constant 7 : index
    %c0_281 = arith.constant 0 : index
    %c0_282 = arith.constant 0 : index
    %330 = vector.load %arg2[%c7_280, %c0_281, %c0_282] : memref<9x1x16xf32, #tpu.memory_space<vmem>>, vector<1x1x16xf32>
    %331 = vector.shape_cast %330 : vector<1x1x16xf32> to vector<1x16xf32>
    %332 = vector.shape_cast %331 : vector<1x16xf32> to vector<1x1x1x16xf32>
    %333 = vector.broadcast %329 : vector<2x4x4x1xf32> to vector<2x4x4x16xf32>
    %334 = vector.broadcast %332 : vector<1x1x1x16xf32> to vector<2x4x4x16xf32>
    %335 = arith.mulf %333, %334 : vector<2x4x4x16xf32>
    %336 = arith.addf %327, %335 : vector<2x4x4x16xf32>
    %c0_283 = arith.constant 0 : index
    %c0_284 = arith.constant 0 : index
    %c1_285 = arith.constant 1 : index
    %c1_286 = arith.constant 1 : index
    %c0_287 = arith.constant 0 : index
    %337 = vector.load %arg1[%c0_283, %c0_284, %c1_285, %c1_286, %c0_287] : memref<4x2x5x5x4xf32, #tpu.memory_space<vmem>>, vector<1x2x4x4x1xf32>
    %338 = vector.shape_cast %337 : vector<1x2x4x4x1xf32> to vector<2x4x4x1xf32>
    %c8_288 = arith.constant 8 : index
    %c0_289 = arith.constant 0 : index
    %c0_290 = arith.constant 0 : index
    %339 = vector.load %arg2[%c8_288, %c0_289, %c0_290] : memref<9x1x16xf32, #tpu.memory_space<vmem>>, vector<1x1x16xf32>
    %340 = vector.shape_cast %339 : vector<1x1x16xf32> to vector<1x16xf32>
    %341 = vector.shape_cast %340 : vector<1x16xf32> to vector<1x1x1x16xf32>
    %342 = vector.broadcast %338 : vector<2x4x4x1xf32> to vector<2x4x4x16xf32>
    %343 = vector.broadcast %341 : vector<1x1x1x16xf32> to vector<2x4x4x16xf32>
    %344 = arith.mulf %342, %343 : vector<2x4x4x16xf32>
    %345 = arith.addf %336, %344 : vector<2x4x4x16xf32>
    %c0_291 = arith.constant 0 : index
    %c0_292 = arith.constant 0 : index
    %346 = vector.load %arg3[%c0_291, %c0_292] : memref<1x16xf32, #tpu.memory_space<vmem>>, vector<1x16xf32>
    %347 = vector.shape_cast %346 : vector<1x16xf32> to vector<1x1x1x16xf32>
    %348 = vector.broadcast %347 : vector<1x1x1x16xf32> to vector<2x4x4x16xf32>
    %349 = arith.addf %345, %348 : vector<2x4x4x16xf32>
    %cst_293 = arith.constant 0.000000e+00 : f32
    %350 = vector.broadcast %cst_293 : f32 to vector<2x4x4x16xf32>
    %351 = arith.maximumf %349, %350 : vector<2x4x4x16xf32>
    %cst_294 = arith.constant 0.000000e+00 : f32
    %352 = vector.broadcast %cst_294 : f32 to vector<32x144xf32>
    %c0_295 = arith.constant 0 : index
    %c0_296 = arith.constant 0 : index
    %353 = vector.load %arg7[%c0_295, %c0_296] : memref<32x144xf32, #tpu.memory_space<vmem>>, vector<32x144xf32>
    tpu.vector_store %arg7[%c0_295, %c0_296], %352 {strides = array<i32>} : memref<32x144xf32, #tpu.memory_space<vmem>>, vector<32x144xf32>,
    %354 = vector.extract_strided_slice %351 {offsets = [0, 0, 0, 0], sizes = [1, 1, 4, 16], strides = [1, 1, 1, 1]} : vector<2x4x4x16xf32> to vector<1x1x4x16xf32>
    %355 = vector.shape_cast %354 : vector<1x1x4x16xf32> to vector<4x16xf32>
    %356 = vector.extract_strided_slice %355 {offsets = [0, 0], sizes = [3, 16], strides = [1, 1]} : vector<4x16xf32> to vector<3x16xf32>
    %c5_297 = arith.constant 5 : index
    %c0_298 = arith.constant 0 : index
    %357 = vector.load %arg7[%c5_297, %c0_298] : memref<32x144xf32, #tpu.memory_space<vmem>>, vector<3x16xf32>
    tpu.vector_store %arg7[%c5_297, %c0_298], %356 {strides = array<i32>} : memref<32x144xf32, #tpu.memory_space<vmem>>, vector<3x16xf32>,
    %358 = vector.extract_strided_slice %351 {offsets = [0, 1, 0, 0], sizes = [1, 1, 4, 16], strides = [1, 1, 1, 1]} : vector<2x4x4x16xf32> to vector<1x1x4x16xf32>
    %359 = vector.shape_cast %358 : vector<1x1x4x16xf32> to vector<4x16xf32>
    %360 = vector.extract_strided_slice %359 {offsets = [0, 0], sizes = [3, 16], strides = [1, 1]} : vector<4x16xf32> to vector<3x16xf32>
    %c9 = arith.constant 9 : index
    %c0_299 = arith.constant 0 : index
    %361 = vector.load %arg7[%c9, %c0_299] : memref<32x144xf32, #tpu.memory_space<vmem>>, vector<3x16xf32>
    tpu.vector_store %arg7[%c9, %c0_299], %360 {strides = array<i32>} : memref<32x144xf32, #tpu.memory_space<vmem>>, vector<3x16xf32>,
    %362 = vector.extract_strided_slice %351 {offsets = [0, 2, 0, 0], sizes = [1, 1, 4, 16], strides = [1, 1, 1, 1]} : vector<2x4x4x16xf32> to vector<1x1x4x16xf32>
    %363 = vector.shape_cast %362 : vector<1x1x4x16xf32> to vector<4x16xf32>
    %364 = vector.extract_strided_slice %363 {offsets = [0, 0], sizes = [3, 16], strides = [1, 1]} : vector<4x16xf32> to vector<3x16xf32>
    %c13 = arith.constant 13 : index
    %c0_300 = arith.constant 0 : index
    %365 = vector.load %arg7[%c13, %c0_300] : memref<32x144xf32, #tpu.memory_space<vmem>>, vector<3x16xf32>
    tpu.vector_store %arg7[%c13, %c0_300], %364 {strides = array<i32>} : memref<32x144xf32, #tpu.memory_space<vmem>>, vector<3x16xf32>,
    %366 = vector.extract_strided_slice %351 {offsets = [1, 0, 0, 0], sizes = [1, 1, 4, 16], strides = [1, 1, 1, 1]} : vector<2x4x4x16xf32> to vector<1x1x4x16xf32>
    %367 = vector.shape_cast %366 : vector<1x1x4x16xf32> to vector<4x16xf32>
    %368 = vector.extract_strided_slice %367 {offsets = [0, 0], sizes = [3, 16], strides = [1, 1]} : vector<4x16xf32> to vector<3x16xf32>
    %c21 = arith.constant 21 : index
    %c0_301 = arith.constant 0 : index
    %369 = vector.load %arg7[%c21, %c0_301] : memref<32x144xf32, #tpu.memory_space<vmem>>, vector<3x16xf32>
    tpu.vector_store %arg7[%c21, %c0_301], %368 {strides = array<i32>} : memref<32x144xf32, #tpu.memory_space<vmem>>, vector<3x16xf32>,
    %370 = vector.extract_strided_slice %351 {offsets = [1, 1, 0, 0], sizes = [1, 1, 4, 16], strides = [1, 1, 1, 1]} : vector<2x4x4x16xf32> to vector<1x1x4x16xf32>
    %371 = vector.shape_cast %370 : vector<1x1x4x16xf32> to vector<4x16xf32>
    %372 = vector.extract_strided_slice %371 {offsets = [0, 0], sizes = [3, 16], strides = [1, 1]} : vector<4x16xf32> to vector<3x16xf32>
    %c25 = arith.constant 25 : index
    %c0_302 = arith.constant 0 : index
    %373 = vector.load %arg7[%c25, %c0_302] : memref<32x144xf32, #tpu.memory_space<vmem>>, vector<3x16xf32>
    tpu.vector_store %arg7[%c25, %c0_302], %372 {strides = array<i32>} : memref<32x144xf32, #tpu.memory_space<vmem>>, vector<3x16xf32>,
    %374 = vector.extract_strided_slice %351 {offsets = [1, 2, 0, 0], sizes = [1, 1, 4, 16], strides = [1, 1, 1, 1]} : vector<2x4x4x16xf32> to vector<1x1x4x16xf32>
    %375 = vector.shape_cast %374 : vector<1x1x4x16xf32> to vector<4x16xf32>
    %376 = vector.extract_strided_slice %375 {offsets = [0, 0], sizes = [3, 16], strides = [1, 1]} : vector<4x16xf32> to vector<3x16xf32>
    %c29 = arith.constant 29 : index
    %c0_303 = arith.constant 0 : index
    %377 = vector.load %arg7[%c29, %c0_303] : memref<32x144xf32, #tpu.memory_space<vmem>>, vector<3x16xf32>
    tpu.vector_store %arg7[%c29, %c0_303], %376 {strides = array<i32>} : memref<32x144xf32, #tpu.memory_space<vmem>>, vector<3x16xf32>,
    %378 = vector.extract_strided_slice %263 {offsets = [0, 0, 0, 0], sizes = [1, 1, 4, 16], strides = [1, 1, 1, 1]} : vector<2x4x4x16xf32> to vector<1x1x4x16xf32>
    %379 = vector.shape_cast %378 : vector<1x1x4x16xf32> to vector<4x16xf32>
    %c4_304 = arith.constant 4 : index
    %c16 = arith.constant 16 : index
    %380 = vector.load %arg7[%c4_304, %c16] : memref<32x144xf32, #tpu.memory_space<vmem>>, vector<4x16xf32>
    tpu.vector_store %arg7[%c4_304, %c16], %379 {strides = array<i32>} : memref<32x144xf32, #tpu.memory_space<vmem>>, vector<4x16xf32>,
    %381 = vector.extract_strided_slice %263 {offsets = [0, 1, 0, 0], sizes = [1, 1, 4, 16], strides = [1, 1, 1, 1]} : vector<2x4x4x16xf32> to vector<1x1x4x16xf32>
    %382 = vector.shape_cast %381 : vector<1x1x4x16xf32> to vector<4x16xf32>
    %c8_305 = arith.constant 8 : index
    %c16_306 = arith.constant 16 : index
    %383 = vector.load %arg7[%c8_305, %c16_306] : memref<32x144xf32, #tpu.memory_space<vmem>>, vector<4x16xf32>
    tpu.vector_store %arg7[%c8_305, %c16_306], %382 {strides = array<i32>} : memref<32x144xf32, #tpu.memory_space<vmem>>, vector<4x16xf32>,
    %384 = vector.extract_strided_slice %263 {offsets = [0, 2, 0, 0], sizes = [1, 1, 4, 16], strides = [1, 1, 1, 1]} : vector<2x4x4x16xf32> to vector<1x1x4x16xf32>
    %385 = vector.shape_cast %384 : vector<1x1x4x16xf32> to vector<4x16xf32>
    %c12 = arith.constant 12 : index
    %c16_307 = arith.constant 16 : index
    %386 = vector.load %arg7[%c12, %c16_307] : memref<32x144xf32, #tpu.memory_space<vmem>>, vector<4x16xf32>
    tpu.vector_store %arg7[%c12, %c16_307], %385 {strides = array<i32>} : memref<32x144xf32, #tpu.memory_space<vmem>>, vector<4x16xf32>,
    %387 = vector.extract_strided_slice %263 {offsets = [1, 0, 0, 0], sizes = [1, 1, 4, 16], strides = [1, 1, 1, 1]} : vector<2x4x4x16xf32> to vector<1x1x4x16xf32>
    %388 = vector.shape_cast %387 : vector<1x1x4x16xf32> to vector<4x16xf32>
    %c20 = arith.constant 20 : index
    %c16_308 = arith.constant 16 : index
    %389 = vector.load %arg7[%c20, %c16_308] : memref<32x144xf32, #tpu.memory_space<vmem>>, vector<4x16xf32>
    tpu.vector_store %arg7[%c20, %c16_308], %388 {strides = array<i32>} : memref<32x144xf32, #tpu.memory_space<vmem>>, vector<4x16xf32>,
    %390 = vector.extract_strided_slice %263 {offsets = [1, 1, 0, 0], sizes = [1, 1, 4, 16], strides = [1, 1, 1, 1]} : vector<2x4x4x16xf32> to vector<1x1x4x16xf32>
    %391 = vector.shape_cast %390 : vector<1x1x4x16xf32> to vector<4x16xf32>
    %c24 = arith.constant 24 : index
    %c16_309 = arith.constant 16 : index
    %392 = vector.load %arg7[%c24, %c16_309] : memref<32x144xf32, #tpu.memory_space<vmem>>, vector<4x16xf32>
    tpu.vector_store %arg7[%c24, %c16_309], %391 {strides = array<i32>} : memref<32x144xf32, #tpu.memory_space<vmem>>, vector<4x16xf32>,
    %393 = vector.extract_strided_slice %263 {offsets = [1, 2, 0, 0], sizes = [1, 1, 4, 16], strides = [1, 1, 1, 1]} : vector<2x4x4x16xf32> to vector<1x1x4x16xf32>
    %394 = vector.shape_cast %393 : vector<1x1x4x16xf32> to vector<4x16xf32>
    %c28 = arith.constant 28 : index
    %c16_310 = arith.constant 16 : index
    %395 = vector.load %arg7[%c28, %c16_310] : memref<32x144xf32, #tpu.memory_space<vmem>>, vector<4x16xf32>
    tpu.vector_store %arg7[%c28, %c16_310], %394 {strides = array<i32>} : memref<32x144xf32, #tpu.memory_space<vmem>>, vector<4x16xf32>,
    %396 = vector.extract_strided_slice %351 {offsets = [0, 0, 0, 0], sizes = [1, 1, 4, 16], strides = [1, 1, 1, 1]} : vector<2x4x4x16xf32> to vector<1x1x4x16xf32>
    %397 = vector.shape_cast %396 : vector<1x1x4x16xf32> to vector<4x16xf32>
    %c4_311 = arith.constant 4 : index
    %c32 = arith.constant 32 : index
    %398 = vector.load %arg7[%c4_311, %c32] : memref<32x144xf32, #tpu.memory_space<vmem>>, vector<4x16xf32>
    tpu.vector_store %arg7[%c4_311, %c32], %397 {strides = array<i32>} : memref<32x144xf32, #tpu.memory_space<vmem>>, vector<4x16xf32>,
    %399 = vector.extract_strided_slice %351 {offsets = [0, 1, 0, 0], sizes = [1, 1, 4, 16], strides = [1, 1, 1, 1]} : vector<2x4x4x16xf32> to vector<1x1x4x16xf32>
    %400 = vector.shape_cast %399 : vector<1x1x4x16xf32> to vector<4x16xf32>
    %c8_312 = arith.constant 8 : index
    %c32_313 = arith.constant 32 : index
    %401 = vector.load %arg7[%c8_312, %c32_313] : memref<32x144xf32, #tpu.memory_space<vmem>>, vector<4x16xf32>
    tpu.vector_store %arg7[%c8_312, %c32_313], %400 {strides = array<i32>} : memref<32x144xf32, #tpu.memory_space<vmem>>, vector<4x16xf32>,
    %402 = vector.extract_strided_slice %351 {offsets = [0, 2, 0, 0], sizes = [1, 1, 4, 16], strides = [1, 1, 1, 1]} : vector<2x4x4x16xf32> to vector<1x1x4x16xf32>
    %403 = vector.shape_cast %402 : vector<1x1x4x16xf32> to vector<4x16xf32>
    %c12_314 = arith.constant 12 : index
    %c32_315 = arith.constant 32 : index
    %404 = vector.load %arg7[%c12_314, %c32_315] : memref<32x144xf32, #tpu.memory_space<vmem>>, vector<4x16xf32>
    tpu.vector_store %arg7[%c12_314, %c32_315], %403 {strides = array<i32>} : memref<32x144xf32, #tpu.memory_space<vmem>>, vector<4x16xf32>,
    %405 = vector.extract_strided_slice %351 {offsets = [1, 0, 0, 0], sizes = [1, 1, 4, 16], strides = [1, 1, 1, 1]} : vector<2x4x4x16xf32> to vector<1x1x4x16xf32>
    %406 = vector.shape_cast %405 : vector<1x1x4x16xf32> to vector<4x16xf32>
    %c20_316 = arith.constant 20 : index
    %c32_317 = arith.constant 32 : index
    %407 = vector.load %arg7[%c20_316, %c32_317] : memref<32x144xf32, #tpu.memory_space<vmem>>, vector<4x16xf32>
    tpu.vector_store %arg7[%c20_316, %c32_317], %406 {strides = array<i32>} : memref<32x144xf32, #tpu.memory_space<vmem>>, vector<4x16xf32>,
    %408 = vector.extract_strided_slice %351 {offsets = [1, 1, 0, 0], sizes = [1, 1, 4, 16], strides = [1, 1, 1, 1]} : vector<2x4x4x16xf32> to vector<1x1x4x16xf32>
    %409 = vector.shape_cast %408 : vector<1x1x4x16xf32> to vector<4x16xf32>
    %c24_318 = arith.constant 24 : index
    %c32_319 = arith.constant 32 : index
    %410 = vector.load %arg7[%c24_318, %c32_319] : memref<32x144xf32, #tpu.memory_space<vmem>>, vector<4x16xf32>
    tpu.vector_store %arg7[%c24_318, %c32_319], %409 {strides = array<i32>} : memref<32x144xf32, #tpu.memory_space<vmem>>, vector<4x16xf32>,
    %411 = vector.extract_strided_slice %351 {offsets = [1, 2, 0, 0], sizes = [1, 1, 4, 16], strides = [1, 1, 1, 1]} : vector<2x4x4x16xf32> to vector<1x1x4x16xf32>
    %412 = vector.shape_cast %411 : vector<1x1x4x16xf32> to vector<4x16xf32>
    %c28_320 = arith.constant 28 : index
    %c32_321 = arith.constant 32 : index
    %413 = vector.load %arg7[%c28_320, %c32_321] : memref<32x144xf32, #tpu.memory_space<vmem>>, vector<4x16xf32>
    tpu.vector_store %arg7[%c28_320, %c32_321], %412 {strides = array<i32>} : memref<32x144xf32, #tpu.memory_space<vmem>>, vector<4x16xf32>,
    %414 = vector.extract_strided_slice %175 {offsets = [0, 0, 0, 0], sizes = [1, 1, 4, 16], strides = [1, 1, 1, 1]} : vector<2x4x4x16xf32> to vector<1x1x4x16xf32>
    %415 = vector.shape_cast %414 : vector<1x1x4x16xf32> to vector<4x16xf32>
    %416 = vector.extract_strided_slice %415 {offsets = [0, 0], sizes = [3, 16], strides = [1, 1]} : vector<4x16xf32> to vector<3x16xf32>
    %c1_322 = arith.constant 1 : index
    %c48 = arith.constant 48 : index
    %417 = vector.load %arg7[%c1_322, %c48] : memref<32x144xf32, #tpu.memory_space<vmem>>, vector<3x16xf32>
    tpu.vector_store %arg7[%c1_322, %c48], %416 {strides = array<i32>} : memref<32x144xf32, #tpu.memory_space<vmem>>, vector<3x16xf32>,
    %418 = vector.extract_strided_slice %175 {offsets = [0, 1, 0, 0], sizes = [1, 1, 4, 16], strides = [1, 1, 1, 1]} : vector<2x4x4x16xf32> to vector<1x1x4x16xf32>
    %419 = vector.shape_cast %418 : vector<1x1x4x16xf32> to vector<4x16xf32>
    %420 = vector.extract_strided_slice %419 {offsets = [0, 0], sizes = [3, 16], strides = [1, 1]} : vector<4x16xf32> to vector<3x16xf32>
    %c5_323 = arith.constant 5 : index
    %c48_324 = arith.constant 48 : index
    %421 = vector.load %arg7[%c5_323, %c48_324] : memref<32x144xf32, #tpu.memory_space<vmem>>, vector<3x16xf32>
    tpu.vector_store %arg7[%c5_323, %c48_324], %420 {strides = array<i32>} : memref<32x144xf32, #tpu.memory_space<vmem>>, vector<3x16xf32>,
    %422 = vector.extract_strided_slice %175 {offsets = [0, 2, 0, 0], sizes = [1, 1, 4, 16], strides = [1, 1, 1, 1]} : vector<2x4x4x16xf32> to vector<1x1x4x16xf32>
    %423 = vector.shape_cast %422 : vector<1x1x4x16xf32> to vector<4x16xf32>
    %424 = vector.extract_strided_slice %423 {offsets = [0, 0], sizes = [3, 16], strides = [1, 1]} : vector<4x16xf32> to vector<3x16xf32>
    %c9_325 = arith.constant 9 : index
    %c48_326 = arith.constant 48 : index
    %425 = vector.load %arg7[%c9_325, %c48_326] : memref<32x144xf32, #tpu.memory_space<vmem>>, vector<3x16xf32>
    tpu.vector_store %arg7[%c9_325, %c48_326], %424 {strides = array<i32>} : memref<32x144xf32, #tpu.memory_space<vmem>>, vector<3x16xf32>,
    %426 = vector.extract_strided_slice %175 {offsets = [0, 3, 0, 0], sizes = [1, 1, 4, 16], strides = [1, 1, 1, 1]} : vector<2x4x4x16xf32> to vector<1x1x4x16xf32>
    %427 = vector.shape_cast %426 : vector<1x1x4x16xf32> to vector<4x16xf32>
    %428 = vector.extract_strided_slice %427 {offsets = [0, 0], sizes = [3, 16], strides = [1, 1]} : vector<4x16xf32> to vector<3x16xf32>
    %c13_327 = arith.constant 13 : index
    %c48_328 = arith.constant 48 : index
    %429 = vector.load %arg7[%c13_327, %c48_328] : memref<32x144xf32, #tpu.memory_space<vmem>>, vector<3x16xf32>
    tpu.vector_store %arg7[%c13_327, %c48_328], %428 {strides = array<i32>} : memref<32x144xf32, #tpu.memory_space<vmem>>, vector<3x16xf32>,
    %430 = vector.extract_strided_slice %175 {offsets = [1, 0, 0, 0], sizes = [1, 1, 4, 16], strides = [1, 1, 1, 1]} : vector<2x4x4x16xf32> to vector<1x1x4x16xf32>
    %431 = vector.shape_cast %430 : vector<1x1x4x16xf32> to vector<4x16xf32>
    %432 = vector.extract_strided_slice %431 {offsets = [0, 0], sizes = [3, 16], strides = [1, 1]} : vector<4x16xf32> to vector<3x16xf32>
    %c17 = arith.constant 17 : index
    %c48_329 = arith.constant 48 : index
    %433 = vector.load %arg7[%c17, %c48_329] : memref<32x144xf32, #tpu.memory_space<vmem>>, vector<3x16xf32>
    tpu.vector_store %arg7[%c17, %c48_329], %432 {strides = array<i32>} : memref<32x144xf32, #tpu.memory_space<vmem>>, vector<3x16xf32>,
    %434 = vector.extract_strided_slice %175 {offsets = [1, 1, 0, 0], sizes = [1, 1, 4, 16], strides = [1, 1, 1, 1]} : vector<2x4x4x16xf32> to vector<1x1x4x16xf32>
    %435 = vector.shape_cast %434 : vector<1x1x4x16xf32> to vector<4x16xf32>
    %436 = vector.extract_strided_slice %435 {offsets = [0, 0], sizes = [3, 16], strides = [1, 1]} : vector<4x16xf32> to vector<3x16xf32>
    %c21_330 = arith.constant 21 : index
    %c48_331 = arith.constant 48 : index
    %437 = vector.load %arg7[%c21_330, %c48_331] : memref<32x144xf32, #tpu.memory_space<vmem>>, vector<3x16xf32>
    tpu.vector_store %arg7[%c21_330, %c48_331], %436 {strides = array<i32>} : memref<32x144xf32, #tpu.memory_space<vmem>>, vector<3x16xf32>,
    %438 = vector.extract_strided_slice %175 {offsets = [1, 2, 0, 0], sizes = [1, 1, 4, 16], strides = [1, 1, 1, 1]} : vector<2x4x4x16xf32> to vector<1x1x4x16xf32>
    %439 = vector.shape_cast %438 : vector<1x1x4x16xf32> to vector<4x16xf32>
    %440 = vector.extract_strided_slice %439 {offsets = [0, 0], sizes = [3, 16], strides = [1, 1]} : vector<4x16xf32> to vector<3x16xf32>
    %c25_332 = arith.constant 25 : index
    %c48_333 = arith.constant 48 : index
    %441 = vector.load %arg7[%c25_332, %c48_333] : memref<32x144xf32, #tpu.memory_space<vmem>>, vector<3x16xf32>
    tpu.vector_store %arg7[%c25_332, %c48_333], %440 {strides = array<i32>} : memref<32x144xf32, #tpu.memory_space<vmem>>, vector<3x16xf32>,
    %442 = vector.extract_strided_slice %175 {offsets = [1, 3, 0, 0], sizes = [1, 1, 4, 16], strides = [1, 1, 1, 1]} : vector<2x4x4x16xf32> to vector<1x1x4x16xf32>
    %443 = vector.shape_cast %442 : vector<1x1x4x16xf32> to vector<4x16xf32>
    %444 = vector.extract_strided_slice %443 {offsets = [0, 0], sizes = [3, 16], strides = [1, 1]} : vector<4x16xf32> to vector<3x16xf32>
    %c29_334 = arith.constant 29 : index
    %c48_335 = arith.constant 48 : index
    %445 = vector.load %arg7[%c29_334, %c48_335] : memref<32x144xf32, #tpu.memory_space<vmem>>, vector<3x16xf32>
    tpu.vector_store %arg7[%c29_334, %c48_335], %444 {strides = array<i32>} : memref<32x144xf32, #tpu.memory_space<vmem>>, vector<3x16xf32>,
    %446 = vector.extract_strided_slice %87 {offsets = [0, 0, 0, 0], sizes = [1, 1, 4, 16], strides = [1, 1, 1, 1]} : vector<2x4x4x16xf32> to vector<1x1x4x16xf32>
    %447 = vector.shape_cast %446 : vector<1x1x4x16xf32> to vector<4x16xf32>
    %c0_336 = arith.constant 0 : index
    %c64 = arith.constant 64 : index
    %448 = vector.load %arg7[%c0_336, %c64] : memref<32x144xf32, #tpu.memory_space<vmem>>, vector<4x16xf32>
    tpu.vector_store %arg7[%c0_336, %c64], %447 {strides = array<i32>} : memref<32x144xf32, #tpu.memory_space<vmem>>, vector<4x16xf32>,
    %449 = vector.extract_strided_slice %87 {offsets = [0, 1, 0, 0], sizes = [1, 1, 4, 16], strides = [1, 1, 1, 1]} : vector<2x4x4x16xf32> to vector<1x1x4x16xf32>
    %450 = vector.shape_cast %449 : vector<1x1x4x16xf32> to vector<4x16xf32>
    %c4_337 = arith.constant 4 : index
    %c64_338 = arith.constant 64 : index
    %451 = vector.load %arg7[%c4_337, %c64_338] : memref<32x144xf32, #tpu.memory_space<vmem>>, vector<4x16xf32>
    tpu.vector_store %arg7[%c4_337, %c64_338], %450 {strides = array<i32>} : memref<32x144xf32, #tpu.memory_space<vmem>>, vector<4x16xf32>,
    %452 = vector.extract_strided_slice %87 {offsets = [0, 2, 0, 0], sizes = [1, 1, 4, 16], strides = [1, 1, 1, 1]} : vector<2x4x4x16xf32> to vector<1x1x4x16xf32>
    %453 = vector.shape_cast %452 : vector<1x1x4x16xf32> to vector<4x16xf32>
    %c8_339 = arith.constant 8 : index
    %c64_340 = arith.constant 64 : index
    %454 = vector.load %arg7[%c8_339, %c64_340] : memref<32x144xf32, #tpu.memory_space<vmem>>, vector<4x16xf32>
    tpu.vector_store %arg7[%c8_339, %c64_340], %453 {strides = array<i32>} : memref<32x144xf32, #tpu.memory_space<vmem>>, vector<4x16xf32>,
    %455 = vector.extract_strided_slice %87 {offsets = [0, 3, 0, 0], sizes = [1, 1, 4, 16], strides = [1, 1, 1, 1]} : vector<2x4x4x16xf32> to vector<1x1x4x16xf32>
    %456 = vector.shape_cast %455 : vector<1x1x4x16xf32> to vector<4x16xf32>
    %c12_341 = arith.constant 12 : index
    %c64_342 = arith.constant 64 : index
    %457 = vector.load %arg7[%c12_341, %c64_342] : memref<32x144xf32, #tpu.memory_space<vmem>>, vector<4x16xf32>
    tpu.vector_store %arg7[%c12_341, %c64_342], %456 {strides = array<i32>} : memref<32x144xf32, #tpu.memory_space<vmem>>, vector<4x16xf32>,
    %458 = vector.extract_strided_slice %87 {offsets = [1, 0, 0, 0], sizes = [1, 1, 4, 16], strides = [1, 1, 1, 1]} : vector<2x4x4x16xf32> to vector<1x1x4x16xf32>
    %459 = vector.shape_cast %458 : vector<1x1x4x16xf32> to vector<4x16xf32>
    %c16_343 = arith.constant 16 : index
    %c64_344 = arith.constant 64 : index
    %460 = vector.load %arg7[%c16_343, %c64_344] : memref<32x144xf32, #tpu.memory_space<vmem>>, vector<4x16xf32>
    tpu.vector_store %arg7[%c16_343, %c64_344], %459 {strides = array<i32>} : memref<32x144xf32, #tpu.memory_space<vmem>>, vector<4x16xf32>,
    %461 = vector.extract_strided_slice %87 {offsets = [1, 1, 0, 0], sizes = [1, 1, 4, 16], strides = [1, 1, 1, 1]} : vector<2x4x4x16xf32> to vector<1x1x4x16xf32>
    %462 = vector.shape_cast %461 : vector<1x1x4x16xf32> to vector<4x16xf32>
    %c20_345 = arith.constant 20 : index
    %c64_346 = arith.constant 64 : index
    %463 = vector.load %arg7[%c20_345, %c64_346] : memref<32x144xf32, #tpu.memory_space<vmem>>, vector<4x16xf32>
    tpu.vector_store %arg7[%c20_345, %c64_346], %462 {strides = array<i32>} : memref<32x144xf32, #tpu.memory_space<vmem>>, vector<4x16xf32>,
    %464 = vector.extract_strided_slice %87 {offsets = [1, 2, 0, 0], sizes = [1, 1, 4, 16], strides = [1, 1, 1, 1]} : vector<2x4x4x16xf32> to vector<1x1x4x16xf32>
    %465 = vector.shape_cast %464 : vector<1x1x4x16xf32> to vector<4x16xf32>
    %c24_347 = arith.constant 24 : index
    %c64_348 = arith.constant 64 : index
    %466 = vector.load %arg7[%c24_347, %c64_348] : memref<32x144xf32, #tpu.memory_space<vmem>>, vector<4x16xf32>
    tpu.vector_store %arg7[%c24_347, %c64_348], %465 {strides = array<i32>} : memref<32x144xf32, #tpu.memory_space<vmem>>, vector<4x16xf32>,
    %467 = vector.extract_strided_slice %87 {offsets = [1, 3, 0, 0], sizes = [1, 1, 4, 16], strides = [1, 1, 1, 1]} : vector<2x4x4x16xf32> to vector<1x1x4x16xf32>
    %468 = vector.shape_cast %467 : vector<1x1x4x16xf32> to vector<4x16xf32>
    %c28_349 = arith.constant 28 : index
    %c64_350 = arith.constant 64 : index
    %469 = vector.load %arg7[%c28_349, %c64_350] : memref<32x144xf32, #tpu.memory_space<vmem>>, vector<4x16xf32>
    tpu.vector_store %arg7[%c28_349, %c64_350], %468 {strides = array<i32>} : memref<32x144xf32, #tpu.memory_space<vmem>>, vector<4x16xf32>,
    %470 = vector.extract_strided_slice %175 {offsets = [0, 0, 0, 0], sizes = [1, 1, 4, 16], strides = [1, 1, 1, 1]} : vector<2x4x4x16xf32> to vector<1x1x4x16xf32>
    %471 = vector.shape_cast %470 : vector<1x1x4x16xf32> to vector<4x16xf32>
    %c0_351 = arith.constant 0 : index
    %c80 = arith.constant 80 : index
    %472 = vector.load %arg7[%c0_351, %c80] : memref<32x144xf32, #tpu.memory_space<vmem>>, vector<4x16xf32>
    tpu.vector_store %arg7[%c0_351, %c80], %471 {strides = array<i32>} : memref<32x144xf32, #tpu.memory_space<vmem>>, vector<4x16xf32>,
    %473 = vector.extract_strided_slice %175 {offsets = [0, 1, 0, 0], sizes = [1, 1, 4, 16], strides = [1, 1, 1, 1]} : vector<2x4x4x16xf32> to vector<1x1x4x16xf32>
    %474 = vector.shape_cast %473 : vector<1x1x4x16xf32> to vector<4x16xf32>
    %c4_352 = arith.constant 4 : index
    %c80_353 = arith.constant 80 : index
    %475 = vector.load %arg7[%c4_352, %c80_353] : memref<32x144xf32, #tpu.memory_space<vmem>>, vector<4x16xf32>
    tpu.vector_store %arg7[%c4_352, %c80_353], %474 {strides = array<i32>} : memref<32x144xf32, #tpu.memory_space<vmem>>, vector<4x16xf32>,
    %476 = vector.extract_strided_slice %175 {offsets = [0, 2, 0, 0], sizes = [1, 1, 4, 16], strides = [1, 1, 1, 1]} : vector<2x4x4x16xf32> to vector<1x1x4x16xf32>
    %477 = vector.shape_cast %476 : vector<1x1x4x16xf32> to vector<4x16xf32>
    %c8_354 = arith.constant 8 : index
    %c80_355 = arith.constant 80 : index
    %478 = vector.load %arg7[%c8_354, %c80_355] : memref<32x144xf32, #tpu.memory_space<vmem>>, vector<4x16xf32>
    tpu.vector_store %arg7[%c8_354, %c80_355], %477 {strides = array<i32>} : memref<32x144xf32, #tpu.memory_space<vmem>>, vector<4x16xf32>,
    %479 = vector.extract_strided_slice %175 {offsets = [0, 3, 0, 0], sizes = [1, 1, 4, 16], strides = [1, 1, 1, 1]} : vector<2x4x4x16xf32> to vector<1x1x4x16xf32>
    %480 = vector.shape_cast %479 : vector<1x1x4x16xf32> to vector<4x16xf32>
    %c12_356 = arith.constant 12 : index
    %c80_357 = arith.constant 80 : index
    %481 = vector.load %arg7[%c12_356, %c80_357] : memref<32x144xf32, #tpu.memory_space<vmem>>, vector<4x16xf32>
    tpu.vector_store %arg7[%c12_356, %c80_357], %480 {strides = array<i32>} : memref<32x144xf32, #tpu.memory_space<vmem>>, vector<4x16xf32>,
    %482 = vector.extract_strided_slice %175 {offsets = [1, 0, 0, 0], sizes = [1, 1, 4, 16], strides = [1, 1, 1, 1]} : vector<2x4x4x16xf32> to vector<1x1x4x16xf32>
    %483 = vector.shape_cast %482 : vector<1x1x4x16xf32> to vector<4x16xf32>
    %c16_358 = arith.constant 16 : index
    %c80_359 = arith.constant 80 : index
    %484 = vector.load %arg7[%c16_358, %c80_359] : memref<32x144xf32, #tpu.memory_space<vmem>>, vector<4x16xf32>
    tpu.vector_store %arg7[%c16_358, %c80_359], %483 {strides = array<i32>} : memref<32x144xf32, #tpu.memory_space<vmem>>, vector<4x16xf32>,
    %485 = vector.extract_strided_slice %175 {offsets = [1, 1, 0, 0], sizes = [1, 1, 4, 16], strides = [1, 1, 1, 1]} : vector<2x4x4x16xf32> to vector<1x1x4x16xf32>
    %486 = vector.shape_cast %485 : vector<1x1x4x16xf32> to vector<4x16xf32>
    %c20_360 = arith.constant 20 : index
    %c80_361 = arith.constant 80 : index
    %487 = vector.load %arg7[%c20_360, %c80_361] : memref<32x144xf32, #tpu.memory_space<vmem>>, vector<4x16xf32>
    tpu.vector_store %arg7[%c20_360, %c80_361], %486 {strides = array<i32>} : memref<32x144xf32, #tpu.memory_space<vmem>>, vector<4x16xf32>,
    %488 = vector.extract_strided_slice %175 {offsets = [1, 2, 0, 0], sizes = [1, 1, 4, 16], strides = [1, 1, 1, 1]} : vector<2x4x4x16xf32> to vector<1x1x4x16xf32>
    %489 = vector.shape_cast %488 : vector<1x1x4x16xf32> to vector<4x16xf32>
    %c24_362 = arith.constant 24 : index
    %c80_363 = arith.constant 80 : index
    %490 = vector.load %arg7[%c24_362, %c80_363] : memref<32x144xf32, #tpu.memory_space<vmem>>, vector<4x16xf32>
    tpu.vector_store %arg7[%c24_362, %c80_363], %489 {strides = array<i32>} : memref<32x144xf32, #tpu.memory_space<vmem>>, vector<4x16xf32>,
    %491 = vector.extract_strided_slice %175 {offsets = [1, 3, 0, 0], sizes = [1, 1, 4, 16], strides = [1, 1, 1, 1]} : vector<2x4x4x16xf32> to vector<1x1x4x16xf32>
    %492 = vector.shape_cast %491 : vector<1x1x4x16xf32> to vector<4x16xf32>
    %c28_364 = arith.constant 28 : index
    %c80_365 = arith.constant 80 : index
    %493 = vector.load %arg7[%c28_364, %c80_365] : memref<32x144xf32, #tpu.memory_space<vmem>>, vector<4x16xf32>
    tpu.vector_store %arg7[%c28_364, %c80_365], %492 {strides = array<i32>} : memref<32x144xf32, #tpu.memory_space<vmem>>, vector<4x16xf32>,
    %494 = vector.extract_strided_slice %351 {offsets = [0, 0, 0, 0], sizes = [1, 1, 4, 16], strides = [1, 1, 1, 1]} : vector<2x4x4x16xf32> to vector<1x1x4x16xf32>
    %495 = vector.shape_cast %494 : vector<1x1x4x16xf32> to vector<4x16xf32>
    %496 = vector.extract_strided_slice %495 {offsets = [0, 0], sizes = [3, 16], strides = [1, 1]} : vector<4x16xf32> to vector<3x16xf32>
    %c1_366 = arith.constant 1 : index
    %c96 = arith.constant 96 : index
    %497 = vector.load %arg7[%c1_366, %c96] : memref<32x144xf32, #tpu.memory_space<vmem>>, vector<3x16xf32>
    tpu.vector_store %arg7[%c1_366, %c96], %496 {strides = array<i32>} : memref<32x144xf32, #tpu.memory_space<vmem>>, vector<3x16xf32>,
    %498 = vector.extract_strided_slice %351 {offsets = [0, 1, 0, 0], sizes = [1, 1, 4, 16], strides = [1, 1, 1, 1]} : vector<2x4x4x16xf32> to vector<1x1x4x16xf32>
    %499 = vector.shape_cast %498 : vector<1x1x4x16xf32> to vector<4x16xf32>
    %500 = vector.extract_strided_slice %499 {offsets = [0, 0], sizes = [3, 16], strides = [1, 1]} : vector<4x16xf32> to vector<3x16xf32>
    %c5_367 = arith.constant 5 : index
    %c96_368 = arith.constant 96 : index
    %501 = vector.load %arg7[%c5_367, %c96_368] : memref<32x144xf32, #tpu.memory_space<vmem>>, vector<3x16xf32>
    tpu.vector_store %arg7[%c5_367, %c96_368], %500 {strides = array<i32>} : memref<32x144xf32, #tpu.memory_space<vmem>>, vector<3x16xf32>,
    %502 = vector.extract_strided_slice %351 {offsets = [0, 2, 0, 0], sizes = [1, 1, 4, 16], strides = [1, 1, 1, 1]} : vector<2x4x4x16xf32> to vector<1x1x4x16xf32>
    %503 = vector.shape_cast %502 : vector<1x1x4x16xf32> to vector<4x16xf32>
    %504 = vector.extract_strided_slice %503 {offsets = [0, 0], sizes = [3, 16], strides = [1, 1]} : vector<4x16xf32> to vector<3x16xf32>
    %c9_369 = arith.constant 9 : index
    %c96_370 = arith.constant 96 : index
    %505 = vector.load %arg7[%c9_369, %c96_370] : memref<32x144xf32, #tpu.memory_space<vmem>>, vector<3x16xf32>
    tpu.vector_store %arg7[%c9_369, %c96_370], %504 {strides = array<i32>} : memref<32x144xf32, #tpu.memory_space<vmem>>, vector<3x16xf32>,
    %506 = vector.extract_strided_slice %351 {offsets = [0, 3, 0, 0], sizes = [1, 1, 4, 16], strides = [1, 1, 1, 1]} : vector<2x4x4x16xf32> to vector<1x1x4x16xf32>
    %507 = vector.shape_cast %506 : vector<1x1x4x16xf32> to vector<4x16xf32>
    %508 = vector.extract_strided_slice %507 {offsets = [0, 0], sizes = [3, 16], strides = [1, 1]} : vector<4x16xf32> to vector<3x16xf32>
    %c13_371 = arith.constant 13 : index
    %c96_372 = arith.constant 96 : index
    %509 = vector.load %arg7[%c13_371, %c96_372] : memref<32x144xf32, #tpu.memory_space<vmem>>, vector<3x16xf32>
    tpu.vector_store %arg7[%c13_371, %c96_372], %508 {strides = array<i32>} : memref<32x144xf32, #tpu.memory_space<vmem>>, vector<3x16xf32>,
    %510 = vector.extract_strided_slice %351 {offsets = [1, 0, 0, 0], sizes = [1, 1, 4, 16], strides = [1, 1, 1, 1]} : vector<2x4x4x16xf32> to vector<1x1x4x16xf32>
    %511 = vector.shape_cast %510 : vector<1x1x4x16xf32> to vector<4x16xf32>
    %512 = vector.extract_strided_slice %511 {offsets = [0, 0], sizes = [3, 16], strides = [1, 1]} : vector<4x16xf32> to vector<3x16xf32>
    %c17_373 = arith.constant 17 : index
    %c96_374 = arith.constant 96 : index
    %513 = vector.load %arg7[%c17_373, %c96_374] : memref<32x144xf32, #tpu.memory_space<vmem>>, vector<3x16xf32>
    tpu.vector_store %arg7[%c17_373, %c96_374], %512 {strides = array<i32>} : memref<32x144xf32, #tpu.memory_space<vmem>>, vector<3x16xf32>,
    %514 = vector.extract_strided_slice %351 {offsets = [1, 1, 0, 0], sizes = [1, 1, 4, 16], strides = [1, 1, 1, 1]} : vector<2x4x4x16xf32> to vector<1x1x4x16xf32>
    %515 = vector.shape_cast %514 : vector<1x1x4x16xf32> to vector<4x16xf32>
    %516 = vector.extract_strided_slice %515 {offsets = [0, 0], sizes = [3, 16], strides = [1, 1]} : vector<4x16xf32> to vector<3x16xf32>
    %c21_375 = arith.constant 21 : index
    %c96_376 = arith.constant 96 : index
    %517 = vector.load %arg7[%c21_375, %c96_376] : memref<32x144xf32, #tpu.memory_space<vmem>>, vector<3x16xf32>
    tpu.vector_store %arg7[%c21_375, %c96_376], %516 {strides = array<i32>} : memref<32x144xf32, #tpu.memory_space<vmem>>, vector<3x16xf32>,
    %518 = vector.extract_strided_slice %351 {offsets = [1, 2, 0, 0], sizes = [1, 1, 4, 16], strides = [1, 1, 1, 1]} : vector<2x4x4x16xf32> to vector<1x1x4x16xf32>
    %519 = vector.shape_cast %518 : vector<1x1x4x16xf32> to vector<4x16xf32>
    %520 = vector.extract_strided_slice %519 {offsets = [0, 0], sizes = [3, 16], strides = [1, 1]} : vector<4x16xf32> to vector<3x16xf32>
    %c25_377 = arith.constant 25 : index
    %c96_378 = arith.constant 96 : index
    %521 = vector.load %arg7[%c25_377, %c96_378] : memref<32x144xf32, #tpu.memory_space<vmem>>, vector<3x16xf32>
    tpu.vector_store %arg7[%c25_377, %c96_378], %520 {strides = array<i32>} : memref<32x144xf32, #tpu.memory_space<vmem>>, vector<3x16xf32>,
    %522 = vector.extract_strided_slice %351 {offsets = [1, 3, 0, 0], sizes = [1, 1, 4, 16], strides = [1, 1, 1, 1]} : vector<2x4x4x16xf32> to vector<1x1x4x16xf32>
    %523 = vector.shape_cast %522 : vector<1x1x4x16xf32> to vector<4x16xf32>
    %524 = vector.extract_strided_slice %523 {offsets = [0, 0], sizes = [3, 16], strides = [1, 1]} : vector<4x16xf32> to vector<3x16xf32>
    %c29_379 = arith.constant 29 : index
    %c96_380 = arith.constant 96 : index
    %525 = vector.load %arg7[%c29_379, %c96_380] : memref<32x144xf32, #tpu.memory_space<vmem>>, vector<3x16xf32>
    tpu.vector_store %arg7[%c29_379, %c96_380], %524 {strides = array<i32>} : memref<32x144xf32, #tpu.memory_space<vmem>>, vector<3x16xf32>,
    %526 = vector.extract_strided_slice %263 {offsets = [0, 0, 0, 0], sizes = [1, 1, 4, 16], strides = [1, 1, 1, 1]} : vector<2x4x4x16xf32> to vector<1x1x4x16xf32>
    %527 = vector.shape_cast %526 : vector<1x1x4x16xf32> to vector<4x16xf32>
    %c0_381 = arith.constant 0 : index
    %c112 = arith.constant 112 : index
    %528 = vector.load %arg7[%c0_381, %c112] : memref<32x144xf32, #tpu.memory_space<vmem>>, vector<4x16xf32>
    tpu.vector_store %arg7[%c0_381, %c112], %527 {strides = array<i32>} : memref<32x144xf32, #tpu.memory_space<vmem>>, vector<4x16xf32>,
    %529 = vector.extract_strided_slice %263 {offsets = [0, 1, 0, 0], sizes = [1, 1, 4, 16], strides = [1, 1, 1, 1]} : vector<2x4x4x16xf32> to vector<1x1x4x16xf32>
    %530 = vector.shape_cast %529 : vector<1x1x4x16xf32> to vector<4x16xf32>
    %c4_382 = arith.constant 4 : index
    %c112_383 = arith.constant 112 : index
    %531 = vector.load %arg7[%c4_382, %c112_383] : memref<32x144xf32, #tpu.memory_space<vmem>>, vector<4x16xf32>
    tpu.vector_store %arg7[%c4_382, %c112_383], %530 {strides = array<i32>} : memref<32x144xf32, #tpu.memory_space<vmem>>, vector<4x16xf32>,
    %532 = vector.extract_strided_slice %263 {offsets = [0, 2, 0, 0], sizes = [1, 1, 4, 16], strides = [1, 1, 1, 1]} : vector<2x4x4x16xf32> to vector<1x1x4x16xf32>
    %533 = vector.shape_cast %532 : vector<1x1x4x16xf32> to vector<4x16xf32>
    %c8_384 = arith.constant 8 : index
    %c112_385 = arith.constant 112 : index
    %534 = vector.load %arg7[%c8_384, %c112_385] : memref<32x144xf32, #tpu.memory_space<vmem>>, vector<4x16xf32>
    tpu.vector_store %arg7[%c8_384, %c112_385], %533 {strides = array<i32>} : memref<32x144xf32, #tpu.memory_space<vmem>>, vector<4x16xf32>,
    %535 = vector.extract_strided_slice %263 {offsets = [0, 3, 0, 0], sizes = [1, 1, 4, 16], strides = [1, 1, 1, 1]} : vector<2x4x4x16xf32> to vector<1x1x4x16xf32>
    %536 = vector.shape_cast %535 : vector<1x1x4x16xf32> to vector<4x16xf32>
    %c12_386 = arith.constant 12 : index
    %c112_387 = arith.constant 112 : index
    %537 = vector.load %arg7[%c12_386, %c112_387] : memref<32x144xf32, #tpu.memory_space<vmem>>, vector<4x16xf32>
    tpu.vector_store %arg7[%c12_386, %c112_387], %536 {strides = array<i32>} : memref<32x144xf32, #tpu.memory_space<vmem>>, vector<4x16xf32>,
    %538 = vector.extract_strided_slice %263 {offsets = [1, 0, 0, 0], sizes = [1, 1, 4, 16], strides = [1, 1, 1, 1]} : vector<2x4x4x16xf32> to vector<1x1x4x16xf32>
    %539 = vector.shape_cast %538 : vector<1x1x4x16xf32> to vector<4x16xf32>
    %c16_388 = arith.constant 16 : index
    %c112_389 = arith.constant 112 : index
    %540 = vector.load %arg7[%c16_388, %c112_389] : memref<32x144xf32, #tpu.memory_space<vmem>>, vector<4x16xf32>
    tpu.vector_store %arg7[%c16_388, %c112_389], %539 {strides = array<i32>} : memref<32x144xf32, #tpu.memory_space<vmem>>, vector<4x16xf32>,
    %541 = vector.extract_strided_slice %263 {offsets = [1, 1, 0, 0], sizes = [1, 1, 4, 16], strides = [1, 1, 1, 1]} : vector<2x4x4x16xf32> to vector<1x1x4x16xf32>
    %542 = vector.shape_cast %541 : vector<1x1x4x16xf32> to vector<4x16xf32>
    %c20_390 = arith.constant 20 : index
    %c112_391 = arith.constant 112 : index
    %543 = vector.load %arg7[%c20_390, %c112_391] : memref<32x144xf32, #tpu.memory_space<vmem>>, vector<4x16xf32>
    tpu.vector_store %arg7[%c20_390, %c112_391], %542 {strides = array<i32>} : memref<32x144xf32, #tpu.memory_space<vmem>>, vector<4x16xf32>,
    %544 = vector.extract_strided_slice %263 {offsets = [1, 2, 0, 0], sizes = [1, 1, 4, 16], strides = [1, 1, 1, 1]} : vector<2x4x4x16xf32> to vector<1x1x4x16xf32>
    %545 = vector.shape_cast %544 : vector<1x1x4x16xf32> to vector<4x16xf32>
    %c24_392 = arith.constant 24 : index
    %c112_393 = arith.constant 112 : index
    %546 = vector.load %arg7[%c24_392, %c112_393] : memref<32x144xf32, #tpu.memory_space<vmem>>, vector<4x16xf32>
    tpu.vector_store %arg7[%c24_392, %c112_393], %545 {strides = array<i32>} : memref<32x144xf32, #tpu.memory_space<vmem>>, vector<4x16xf32>,
    %547 = vector.extract_strided_slice %263 {offsets = [1, 3, 0, 0], sizes = [1, 1, 4, 16], strides = [1, 1, 1, 1]} : vector<2x4x4x16xf32> to vector<1x1x4x16xf32>
    %548 = vector.shape_cast %547 : vector<1x1x4x16xf32> to vector<4x16xf32>
    %c28_394 = arith.constant 28 : index
    %c112_395 = arith.constant 112 : index
    %549 = vector.load %arg7[%c28_394, %c112_395] : memref<32x144xf32, #tpu.memory_space<vmem>>, vector<4x16xf32>
    tpu.vector_store %arg7[%c28_394, %c112_395], %548 {strides = array<i32>} : memref<32x144xf32, #tpu.memory_space<vmem>>, vector<4x16xf32>,
    %550 = vector.extract_strided_slice %351 {offsets = [0, 0, 0, 0], sizes = [1, 1, 4, 16], strides = [1, 1, 1, 1]} : vector<2x4x4x16xf32> to vector<1x1x4x16xf32>
    %551 = vector.shape_cast %550 : vector<1x1x4x16xf32> to vector<4x16xf32>
    %c0_396 = arith.constant 0 : index
    %c128 = arith.constant 128 : index
    %552 = vector.load %arg7[%c0_396, %c128] : memref<32x144xf32, #tpu.memory_space<vmem>>, vector<4x16xf32>
    tpu.vector_store %arg7[%c0_396, %c128], %551 {strides = array<i32>} : memref<32x144xf32, #tpu.memory_space<vmem>>, vector<4x16xf32>,
    %553 = vector.extract_strided_slice %351 {offsets = [0, 1, 0, 0], sizes = [1, 1, 4, 16], strides = [1, 1, 1, 1]} : vector<2x4x4x16xf32> to vector<1x1x4x16xf32>
    %554 = vector.shape_cast %553 : vector<1x1x4x16xf32> to vector<4x16xf32>
    %c4_397 = arith.constant 4 : index
    %c128_398 = arith.constant 128 : index
    %555 = vector.load %arg7[%c4_397, %c128_398] : memref<32x144xf32, #tpu.memory_space<vmem>>, vector<4x16xf32>
    tpu.vector_store %arg7[%c4_397, %c128_398], %554 {strides = array<i32>} : memref<32x144xf32, #tpu.memory_space<vmem>>, vector<4x16xf32>,
    %556 = vector.extract_strided_slice %351 {offsets = [0, 2, 0, 0], sizes = [1, 1, 4, 16], strides = [1, 1, 1, 1]} : vector<2x4x4x16xf32> to vector<1x1x4x16xf32>
    %557 = vector.shape_cast %556 : vector<1x1x4x16xf32> to vector<4x16xf32>
    %c8_399 = arith.constant 8 : index
    %c128_400 = arith.constant 128 : index
    %558 = vector.load %arg7[%c8_399, %c128_400] : memref<32x144xf32, #tpu.memory_space<vmem>>, vector<4x16xf32>
    tpu.vector_store %arg7[%c8_399, %c128_400], %557 {strides = array<i32>} : memref<32x144xf32, #tpu.memory_space<vmem>>, vector<4x16xf32>,
    %559 = vector.extract_strided_slice %351 {offsets = [0, 3, 0, 0], sizes = [1, 1, 4, 16], strides = [1, 1, 1, 1]} : vector<2x4x4x16xf32> to vector<1x1x4x16xf32>
    %560 = vector.shape_cast %559 : vector<1x1x4x16xf32> to vector<4x16xf32>
    %c12_401 = arith.constant 12 : index
    %c128_402 = arith.constant 128 : index
    %561 = vector.load %arg7[%c12_401, %c128_402] : memref<32x144xf32, #tpu.memory_space<vmem>>, vector<4x16xf32>
    tpu.vector_store %arg7[%c12_401, %c128_402], %560 {strides = array<i32>} : memref<32x144xf32, #tpu.memory_space<vmem>>, vector<4x16xf32>,
    %562 = vector.extract_strided_slice %351 {offsets = [1, 0, 0, 0], sizes = [1, 1, 4, 16], strides = [1, 1, 1, 1]} : vector<2x4x4x16xf32> to vector<1x1x4x16xf32>
    %563 = vector.shape_cast %562 : vector<1x1x4x16xf32> to vector<4x16xf32>
    %c16_403 = arith.constant 16 : index
    %c128_404 = arith.constant 128 : index
    %564 = vector.load %arg7[%c16_403, %c128_404] : memref<32x144xf32, #tpu.memory_space<vmem>>, vector<4x16xf32>
    tpu.vector_store %arg7[%c16_403, %c128_404], %563 {strides = array<i32>} : memref<32x144xf32, #tpu.memory_space<vmem>>, vector<4x16xf32>,
    %565 = vector.extract_strided_slice %351 {offsets = [1, 1, 0, 0], sizes = [1, 1, 4, 16], strides = [1, 1, 1, 1]} : vector<2x4x4x16xf32> to vector<1x1x4x16xf32>
    %566 = vector.shape_cast %565 : vector<1x1x4x16xf32> to vector<4x16xf32>
    %c20_405 = arith.constant 20 : index
    %c128_406 = arith.constant 128 : index
    %567 = vector.load %arg7[%c20_405, %c128_406] : memref<32x144xf32, #tpu.memory_space<vmem>>, vector<4x16xf32>
    tpu.vector_store %arg7[%c20_405, %c128_406], %566 {strides = array<i32>} : memref<32x144xf32, #tpu.memory_space<vmem>>, vector<4x16xf32>,
    %568 = vector.extract_strided_slice %351 {offsets = [1, 2, 0, 0], sizes = [1, 1, 4, 16], strides = [1, 1, 1, 1]} : vector<2x4x4x16xf32> to vector<1x1x4x16xf32>
    %569 = vector.shape_cast %568 : vector<1x1x4x16xf32> to vector<4x16xf32>
    %c24_407 = arith.constant 24 : index
    %c128_408 = arith.constant 128 : index
    %570 = vector.load %arg7[%c24_407, %c128_408] : memref<32x144xf32, #tpu.memory_space<vmem>>, vector<4x16xf32>
    tpu.vector_store %arg7[%c24_407, %c128_408], %569 {strides = array<i32>} : memref<32x144xf32, #tpu.memory_space<vmem>>, vector<4x16xf32>,
    %571 = vector.extract_strided_slice %351 {offsets = [1, 3, 0, 0], sizes = [1, 1, 4, 16], strides = [1, 1, 1, 1]} : vector<2x4x4x16xf32> to vector<1x1x4x16xf32>
    %572 = vector.shape_cast %571 : vector<1x1x4x16xf32> to vector<4x16xf32>
    %c28_409 = arith.constant 28 : index
    %c128_410 = arith.constant 128 : index
    %573 = vector.load %arg7[%c28_409, %c128_410] : memref<32x144xf32, #tpu.memory_space<vmem>>, vector<4x16xf32>
    tpu.vector_store %arg7[%c28_409, %c128_410], %572 {strides = array<i32>} : memref<32x144xf32, #tpu.memory_space<vmem>>, vector<4x16xf32>,
    %c0_411 = arith.constant 0 : index
    %c0_412 = arith.constant 0 : index
    %574 = vector.load %arg7[%c0_411, %c0_412] : memref<32x144xf32, #tpu.memory_space<vmem>>, vector<32x144xf32>
    %c0_413 = arith.constant 0 : index
    %c0_414 = arith.constant 0 : index
    %575 = vector.load %arg4[%c0_413, %c0_414] : memref<144x32xf32, #tpu.memory_space<vmem>>, vector<144x32xf32>
    %cst_415 = arith.constant dense<0.000000e+00> : vector<32x32xf32>
    %576 = tpu.matmul %574, %575, %cst_415 {dimension_numbers = #tpu.dot_dimension_numbers<[1], [0], [0], [1], [0, 0, 1, 1], [], []>} : vector<32x144xf32>, vector<144x32xf32>, vector<32x32xf32> -> vector<32x32xf32>
    %c0_416 = arith.constant 0 : index
    %c0_417 = arith.constant 0 : index
    %577 = vector.load %arg5[%c0_416, %c0_417] : memref<1x32xf32, #tpu.memory_space<vmem>>, vector<1x32xf32>
    %578 = vector.broadcast %577 : vector<1x32xf32> to vector<32x32xf32>
    %579 = arith.addf %576, %578 : vector<32x32xf32>
    %cst_418 = arith.constant 0.000000e+00 : f32
    %580 = vector.broadcast %cst_418 : f32 to vector<32x32xf32>
    %581 = arith.maximumf %579, %580 : vector<32x32xf32>
    %c0_419 = arith.constant 0 : index
    %c0_420 = arith.constant 0 : index
    %582 = vector.load %arg6[%c0_419, %c0_420] : memref<32x32xf32, #tpu.memory_space<vmem>>, vector<32x32xf32>
    tpu.vector_store %arg6[%c0_419, %c0_420], %581 {strides = array<i32>} : memref<32x32xf32, #tpu.memory_space<vmem>>, vector<32x32xf32>,
    return
  }
  func.func @transform_0(%arg0: i32) -> (i32, i32, i32, i32, i32) {
    %c0_i32 = arith.constant 0 : i32
    %c0_i32_0 = arith.constant 0 : i32
    %c0_i32_1 = arith.constant 0 : i32
    %c0_i32_2 = arith.constant 0 : i32
    %c0_i32_3 = arith.constant 0 : i32
    %c0_i32_4 = arith.constant 0 : i32
    return %c0_i32, %c0_i32_0, %c0_i32_1, %c0_i32_2, %c0_i32_3 : i32, i32, i32, i32, i32
  }
  func.func @transform_1(%arg0: i32) -> (i32, i32, i32) {
    %c0_i32 = arith.constant 0 : i32
    %c0_i32_0 = arith.constant 0 : i32
    %c0_i32_1 = arith.constant 0 : i32
    %c0_i32_2 = arith.constant 0 : i32
    return %c0_i32, %c0_i32_0, %c0_i32_1 : i32, i32, i32
  }
  func.func @transform_2(%arg0: i32) -> (i32, i32) {
    %c0_i32 = arith.constant 0 : i32
    %c0_i32_0 = arith.constant 0 : i32
    %c0_i32_1 = arith.constant 0 : i32
    return %c0_i32, %c0_i32_0 : i32, i32
  }
  func.func @transform_3(%arg0: i32) -> (i32, i32) {
    %c0_i32 = arith.constant 0 : i32
    %c0_i32_0 = arith.constant 0 : i32
    %c0_i32_1 = arith.constant 0 : i32
    return %c0_i32, %c0_i32_0 : i32, i32
  }
  func.func @transform_4(%arg0: i32) -> (i32, i32) {
    %c0_i32 = arith.constant 0 : i32
    %c0_i32_0 = arith.constant 0 : i32
    %c0_i32_1 = arith.constant 0 : i32
    return %c0_i32, %c0_i32_0 : i32, i32
  }
  func.func @transform_5(%arg0: i32) -> (i32, i32) {
    %c0_i32 = arith.constant 0 : i32
    %c0_i32_0 = arith.constant 0 : i32
    %c0_i32_1 = arith.constant 0 : i32
    return %c0_i32, %c0_i32_0 : i32, i32
  }
}

</mosaic_0001>

<bundles_post_ra>
// kernel: encoder_forward.1
= control target key start
LH: loop header
LB: loop body
LE: loop exit
PB: predicated region body
PF: predicated region fallthrough
CT: control target
= control target key end

     0   :  { %v4285_v2 = vmov 1   ;;  %v4287_v3 = vmov 0   ;;  %s4279_s0 = inlined_call_operand.vmem [shape: f32[4,2,5,5,4], index: 0, kind: input, shape index: {}]   ;;  %s4280_s1 = inlined_call_operand.vmem [shape: f32[9,1,16], index: 1, kind: input, shape index: {}]   ;;  %s4281_s2 = inlined_call_operand.vmem [shape: f32[1,16], index: 2, kind: input, shape index: {}]   ;;  %s4282_s3 = inlined_call_operand.vmem [shape: f32[144,32], index: 3, kind: input, shape index: {}]   ;;  %s4283_s4 = inlined_call_operand.vmem [shape: f32[1,32], index: 4, kind: input, shape index: {}]   ;;  %s4284_s5 = inlined_call_operand.hbm [shape: f32[32,32], index: 5, kind: output, shape index: {}]  }
   0x1   :  { %v2412_v0 = vld [vmem:[%s4279_s0 + $0x28] sm:$0xf]  ;;  %v2417_v1 = vld [vmem:[%s4279_s0 + $0x10] sm:$0xf]  ;;  %2263 = vset.pattern.permute.xlu0 %v4285_v2  ;;  %2261 = vset.pattern.permute.xlu2 %v4287_v3  ;;  %v2438_v6 = vld [vmem:[%s4279_s0 + $0x18] sm:$0xf] }
   0x2   :  { %v2424_v4 = vld [vmem:[%s4279_s0 + $0x8] sm:$0xf]  ;;  %2260 = vset.pattern.permute.xlu1 %v4287_v3  ;;  %52 = vperm.xlu2 %2261, %v2412_v0   ;;  %v2433_v5 = vld [vmem:[%s4279_s0 + $0x30] sm:$0xf]  ;;  %v2443_v7 = vld [vmem:[%s4279_s0 + $0x38] sm:$0xf] }
   0x3   :  { %42 = vperm.xlu1 %2260, %v2417_v1   ;;  %96 = vperm.xlu0 %2263, %v2424_v4  }
   0x4   :  { %10 = vsyncpa [#allocation4], 0  ;;  %v2451_v8 = vld [vmem:[%s4279_s0 + $0x40] sm:$0xf]  ;;  %v2456_v9 = vld [vmem:[%s4279_s0 + $0x58] sm:$0xf] }
   0x5   :  { %v2461_v10 = vld [vmem:[%s4279_s0] sm:$0xf]  ;;  %v2470_v11 = vld [vmem:[%s4279_s0 + $0x88] sm:$0xf]  ;;  %v2487_v13 = vld [vmem:[%s4279_s0 + $0xd8] sm:$0xf] }
   0x6   :  { %v2479_v12 = vld [vmem:[%s4279_s0 + $0xa8] sm:$0xf]  ;;  %v4292_v14 = vmov 2   ;;  %v2496_v15 = vld [vmem:[%s4279_s0 + $0x100] sm:$0xf]  ;;  %v4289_v51 = vmov 3  }
   0x7   :  { %v2505_v16 = vld [vmem:[%s4279_s0 + $0x130] sm:$0xf]  ;;  %v2513_v17 = vld [vmem:[%s4279_s0 + $0x18] sm:$0xf]  ;;  %v2527_v19 = vld [vmem:[%s4279_s0 + $0x48] sm:$0xf] }
   0x8   :  { %v2519_v18 = vld [vmem:[%s4279_s0 + $0x50] sm:$0xf]  ;;  %v2533_v20 = vld [vmem:[%s4279_s0 + $0x60] sm:$0xf]  ;;  %v2538_v21 = vld [vmem:[%s4279_s0 + $0x68] sm:$0xf] }
   0x9   :  { %v2547_v22 = vld [vmem:[%s4279_s0 + $0x78] sm:$0xf]  ;;  %v2552_v23 = vld [vmem:[%s4279_s0 + $0x80] sm:$0xf]  ;;  %v2560_v24 = vld [vmem:[%s4279_s0 + $0x90] sm:$0xf] }
   0xa   :  { %57 = vperm.xlu2 %2261, %v2433_v5   ;;  %v2616_v39 = vld [vmem:[%s4279_s0 + $0xa0] sm:$0xf]  ;;  %v2631_v43 = vld [vmem:[%s4279_s0 + $0xb0] sm:$0xf]  ;;  %v2636_v44 = vld [vmem:[%s4279_s0 + $0xb8] sm:$0xf] }
   0xb   :  { %47 = vperm.xlu1 %2260, %v2438_v6   ;;  %116 = vperm.xlu0 %2263, %v2443_v7   ;;  %v2651_v48 = vld [vmem:[%s4279_s0 + $0xc8] sm:$0xf]  ;;  %v2656_v49 = vld [vmem:[%s4279_s0 + $0xd0] sm:$0xf]  ;;  %v2669_v53 = vld [vmem:[%s4279_s0 + $0xe0] sm:$0xf] }
   0xc   :  { %s2368_s24 = smov 48   ;;  %s2369_s25 = smov 64   ;;  %vm1779_vm0 = vcmask 519553   ;;  %vm1674_vm1 = vcmask 130048   ;;  %vm1992_vm2 = vcmask 125952   ;;  %vm1685_vm3 = vcmask 130053  }
   0xd   :  { %s2372_s29 = smov 80   ;;  %s2373_s19 = smov 96   ;;  %vm1996_vm4 = vcmask 130052   ;;  %vm1690_vm5 = vcmask 125953   ;;  %vm1713_vm6 = vcmask 261252   ;;  %vm1748_vm7 = vcmask 392452  }
   0xe   :  { %s2374_s20 = smov 32   ;;  %s2375_s21 = smov 112   ;;  %vm1786_vm8 = vcmask 523653   ;;  %vm1835_vm9 = vcmask 654852   ;;  %vm1828_vm10 = vcmask 650752   ;;  %vm1873_vm11 = vcmask 781952  }
   0xf   :  { %vm1879_vm12 = vcmask 786052   ;;  %vm1912_vm13 = vcmask 913153   ;;  %vm1955_vm14 = vcmask 1044352   ;;  %vm1719_vm15 = vcmask 257152   ;;  %s2377_s17 = smov 128   ;;  %s2378_s18 = smov 8  }
  0x12   :  { %2262 = vset.pattern.permute.xlu2 %v4285_v2 }
  0x13   :  { %67 = vperm.xlu1 %2260, %v2451_v8   ;;  %272 = vperm.xlu0 %2263, %v2456_v9  }
  0x14   :  { %92 = vperm.xlu2 %2262, %v2461_v10  }
  0x1b   :  { %2264 = vset.pattern.permute.xlu1 %v4285_v2  ;;  %292 = vperm.xlu0 %2263, %v2470_v11  }
  0x1c   :  { %100 = vperm.xlu1 %2264, %v2417_v1   ;;  %104 = vperm.xlu2 %2262, %v2438_v6  }
  0x23   :  { %448 = vperm.xlu0 %2263, %v2479_v12  }
  0x24   :  { %108 = vperm.xlu1 %2264, %v2412_v0   ;;  %112 = vperm.xlu2 %2262, %v2433_v5  }
  0x2b   :  { %468 = vperm.xlu0 %2263, %v2487_v13  }
  0x2c   :  { %120 = vperm.xlu1 %2264, %v2451_v8   ;;  %2265 = vset.pattern.permute.xlu2 %v4292_v14 }
  0x2d   :  { %145 = vperm.xlu2 %2265, %v2461_v10  }
  0x33   :  { %1089 = vperm.xlu0 %2263, %v2496_v15  }
  0x34   :  { %2266 = vset.pattern.permute.xlu1 %v4292_v14 }
  0x35   :  { %153 = vperm.xlu1 %2266, %v2417_v1   ;;  %157 = vperm.xlu2 %2265, %v2438_v6  }
  0x3b   :  { %1109 = vperm.xlu0 %2263, %v2505_v16  }
  0x3d   :  { %161 = vperm.xlu1 %2266, %v2412_v0   ;;  %165 = vperm.xlu2 %2265, %v2433_v5  }
  0x43   :  { %1250 = vperm.xlu0 %2263, %v2513_v17  }
  0x45   :  { %173 = vperm.xlu1 %2266, %v2451_v8   ;;  %2267 = vset.pattern.permute.xlu2 %v4287_v3 }
  0x46   :  { %208 = vperm.xlu2 %2267, %v2519_v18  }
  0x4b   :  { %1270 = vperm.xlu0 %2263, %v2527_v19  }
  0x4d   :  { %2268 = vset.pattern.permute.xlu1 %v4287_v3 }
  0x4e   :  { %218 = vperm.xlu1 %2268, %v2533_v20   ;;  %223 = vperm.xlu2 %2267, %v2538_v21  }
  0x53   :  { %2299 = vset.pattern.permute.xlu0 %v4292_v14 }
  0x54   :  { %149 = vperm.xlu0 %2299, %v2424_v4  }
  0x56   :  { %228 = vperm.xlu1 %2268, %v2547_v22   ;;  %233 = vperm.xlu2 %2267, %v2552_v23  }
  0x5c   :  { %169 = vperm.xlu0 %2299, %v2443_v7   ;;  %v2563_v25 = vpop.permute.xlu2 %52 }
  0x5d   :  { %4343 = vst [vmem:[#allocation6_spill] sm:$0xff] %v2563_v25  ;;  %v2166_v25 = vld [vmem:[%s4279_s0 + $0x81] sm:$0xf] }
  0x5e   :  { %243 = vperm.xlu1 %2268, %v2560_v24   ;;  %2269 = vset.pattern.permute.xlu2 %v4285_v2 }
  0x5f   :  { %268 = vperm.xlu2 %2269, %v2519_v18  }
  0x64   :  { %325 = vperm.xlu0 %2299, %v2456_v9   ;;  %v2569_v26 = vpop.permute.xlu2 %57 }
  0x66   :  { %2270 = vset.pattern.permute.xlu1 %v4285_v2 }
  0x67   :  { %276 = vperm.xlu1 %2270, %v2533_v20   ;;  %280 = vperm.xlu2 %2269, %v2538_v21  }
  0x6c   :  { %345 = vperm.xlu0 %2299, %v2470_v11  }
  0x6e   :  { %v2575_v27 = vpop.permute.xlu2 %92 }
  0x6f   :  { %4344 = vst [vmem:[#allocation7_spill] sm:$0xff] %v2575_v27  ;;  %284 = vperm.xlu1 %2270, %v2547_v22   ;;  %288 = vperm.xlu2 %2269, %v2552_v23  }
  0x74   :  { %501 = vperm.xlu0 %2299, %v2479_v12  }
  0x75   :  { %v2580_v28 = vpop.permute.xlu1 %42  ;;  %v2582_v29 = vpop.permute.xlu0 %96 }
  0x76   :  { %4345 = vst [vmem:[#allocation8_spill] sm:$0xff] %v2580_v28  ;;  %v2584_v30 = vpop.permute.xlu2 %104  ;;  %v636_v28 = vld [vmem:[%s4279_s0 + $0x31] sm:$0xf] }
  0x77   :  { %4346 = vst [vmem:[#allocation9_spill] sm:$0xff] %v2584_v30  ;;  %296 = vperm.xlu1 %2270, %v2560_v24   ;;  %2271 = vset.pattern.permute.xlu2 %v4292_v14 }
  0x78   :  { %321 = vperm.xlu2 %2271, %v2519_v18  }
  0x7c   :  { %521 = vperm.xlu0 %2299, %v2487_v13  }
  0x7d   :  { %v2590_v31 = vpop.permute.xlu1 %47  ;;  %v2592_v32 = vpop.permute.xlu0 %116 }
  0x7e   :  { %4347 = vst [vmem:[#allocation10_spill] sm:$0xff] %v2590_v31  ;;  %v2594_v33 = vpop.permute.xlu2 %112 }
  0x7f   :  { %2272 = vset.pattern.permute.xlu1 %v4292_v14 }
  0x80   :  { %329 = vperm.xlu1 %2272, %v2533_v20   ;;  %333 = vperm.xlu2 %2271, %v2538_v21  }
  0x84   :  { %1137 = vperm.xlu0 %2299, %v2496_v15  }
  0x85   :  { %v2600_v34 = vpop.permute.xlu1 %67  ;;  %v2602_v35 = vpop.permute.xlu0 %272 }
  0x86   :  { %4348 = vst [vmem:[#allocation11_spill] sm:$0xff] %v2600_v34  ;;  %v4381_v34 = vmov 0  }
  0x87   :  { %v2604_v36 = vpop.permute.xlu2 %145 }
  0x88   :  { %4349 = vst [vmem:[#allocation12_spill] sm:$0xff] %v2604_v36  ;;  %337 = vperm.xlu1 %2272, %v2547_v22   ;;  %341 = vperm.xlu2 %2271, %v2552_v23  }
  0x8c   :  { %1157 = vperm.xlu0 %2299, %v2505_v16  }
  0x8d   :  { %v2609_v37 = vpop.permute.xlu0 %292 }
  0x8e   :  { %v2611_v38 = vpop.permute.xlu1 %100 }
  0x8f   :  { %4350 = vst [vmem:[#allocation13_spill] sm:$0xff] %v2611_v38  ;;  %v2618_v40 = vpop.permute.xlu2 %157  ;;  %v635_v38 = vld [vmem:[%s4279_s0 + $0x29] sm:$0xf] }
  0x90   :  { %4351 = vst [vmem:[#allocation14_spill] sm:$0xff] %v2618_v40  ;;  %349 = vperm.xlu1 %2272, %v2560_v24   ;;  %2273 = vset.pattern.permute.xlu2 %v4287_v3  ;;  %v634_v40 = vld [vmem:[%s4279_s0 + $0x19] sm:$0xf] }
  0x91   :  { %384 = vperm.xlu2 %2273, %v2616_v39  }
  0x94   :  { %1298 = vperm.xlu0 %2299, %v2513_v17  }
  0x95   :  { %v2624_v41 = vpop.permute.xlu0 %448 }
  0x96   :  { %4352 = vst [vmem:[#allocation15_spill] sm:$0xff] %v2624_v41  ;;  %v2626_v42 = vpop.permute.xlu1 %108 }
  0x97   :  { %4353 = vst [vmem:[#allocation16_spill] sm:$0xff] %v2626_v42  ;;  %v2638_v45 = vpop.permute.xlu2 %165  ;;  %v2168_v42 = vld [vmem:[%s4279_s0 + $0x91] sm:$0xf] }
  0x98   :  { %2274 = vset.pattern.permute.xlu1 %v4287_v3 }
  0x99   :  { %394 = vperm.xlu1 %2274, %v2631_v43   ;;  %399 = vperm.xlu2 %2273, %v2636_v44  }
  0x9c   :  { %1318 = vperm.xlu0 %2299, %v2527_v19  }
  0x9d   :  { %v2644_v46 = vpop.permute.xlu0 %468 }
  0x9e   :  { %4354 = vst [vmem:[#allocation17_spill] sm:$0xff] %v2644_v46  ;;  %v2646_v47 = vpop.permute.xlu1 %120 }
  0x9f   :  { %4355 = vst [vmem:[#allocation18_spill] sm:$0xff] %v2646_v47  ;;  %v4373_v47 = vmov 3  }
  0xa0   :  { %v2658_v50 = vpop.permute.xlu2 %208 }
  0xa1   :  { %4356 = vst [vmem:[#allocation19_spill] sm:$0xff] %v2658_v50  ;;  %404 = vperm.xlu1 %2274, %v2651_v48   ;;  %409 = vperm.xlu2 %2273, %v2656_v49  }
  0xa4   :  { %2302 = vset.pattern.permute.xlu0 %v4289_v51 }
  0xa5   :  { %588 = vperm.xlu0 %2302, %v2424_v4   ;;  %v2664_v52 = vpop.permute.xlu0 %1089 }
  0xa6   :  { %4357 = vst [vmem:[#allocation20_spill] sm:$0xff] %v2664_v52 }
  0xa7   :  { %v2671_v54 = vpop.permute.xlu1 %153 }
  0xa8   :  { %4358 = vst [vmem:[#allocation21_spill] sm:$0xff] %v2671_v54  ;;  %v2673_v55 = vpop.permute.xlu2 %223 }
  0xa9   :  { %4359 = vst [vmem:[#allocation22_spill] sm:$0xff] %v2673_v55  ;;  %419 = vperm.xlu1 %2274, %v2669_v53   ;;  %2275 = vset.pattern.permute.xlu2 %v4285_v2 }
  0xaa   :  { %444 = vperm.xlu2 %2275, %v2616_v39  }
  0xad   :  { %608 = vperm.xlu0 %2302, %v2443_v7   ;;  %v2679_v56 = vpop.permute.xlu0 %1109 }
  0xae   :  { %4360 = vst [vmem:[#allocation23_spill] sm:$0xff] %v2679_v56 }
  0xaf   :  { %v2681_v57 = vpop.permute.xlu1 %161 }
  0xb0   :  { %4361 = vst [vmem:[#allocation24_spill] sm:$0xff] %v2681_v57  ;;  %v2683_v58 = vpop.permute.xlu2 %233 }
  0xb1   :  { %2276 = vset.pattern.permute.xlu1 %v4285_v2 }
  0xb2   :  { %452 = vperm.xlu1 %2276, %v2631_v43   ;;  %456 = vperm.xlu2 %2275, %v2636_v44  }
  0xb5   :  { %716 = vperm.xlu0 %2302, %v2456_v9   ;;  %v2689_v59 = vpop.permute.xlu0 %1250 }
  0xb6   :  { %4362 = vst [vmem:[#allocation25_spill] sm:$0xff] %v2689_v59 }
  0xb7   :  { %v2691_v60 = vpop.permute.xlu1 %173 }
  0xb8   :  { %4363 = vst [vmem:[#allocation26_spill] sm:$0xff] %v2691_v60  ;;  %v2754_v60 = vld [vmem:[%s4279_s0 + $0x20] sm:$0xf] }
  0xb9   :  { %v2693_v61 = vpop.permute.xlu2 %268 }
  0xba   :  { %4364 = vst [vmem:[#allocation27_spill] sm:$0xff] %v2693_v61  ;;  %460 = vperm.xlu1 %2276, %v2651_v48   ;;  %464 = vperm.xlu2 %2275, %v2656_v49  }
  0xbd   :  { %736 = vperm.xlu0 %2302, %v2470_v11   ;;  %v2698_v62 = vpop.permute.xlu0 %1270 }
  0xbe   :  { %4365 = vst [vmem:[#allocation28_spill] sm:$0xff] %v2698_v62 }
  0xc0   :  { %v2700_v63 = vpop.permute.xlu1 %218 }
  0xc1   :  { %4366 = vst [vmem:[#allocation29_spill] sm:$0xff] %v2700_v63  ;;  %v2702_v2 = vpop.permute.xlu2 %280 }
  0xc2   :  { %4367 = vst [vmem:[#allocation30_spill] sm:$0xff] %v2702_v2  ;;  %472 = vperm.xlu1 %2276, %v2669_v53   ;;  %2277 = vset.pattern.permute.xlu2 %v4292_v14 }
  0xc3   :  { %497 = vperm.xlu2 %2277, %v2616_v39  }
  0xc5   :  { %844 = vperm.xlu0 %2302, %v2479_v12  }
  0xc6   :  { %v2708_v3 = vpop.permute.xlu0 %149 }
  0xc8   :  { %v2710_v51 = vpop.permute.xlu1 %228 }
  0xc9   :  { %4368 = vst [vmem:[#allocation31_spill] sm:$0xff] %v2710_v51  ;;  %v2712_v61 = vpop.permute.xlu2 %288  ;;  %v2165_v51 = vld [vmem:[%s4279_s0 + $0x79] sm:$0xf] }
  0xca   :  { %2278 = vset.pattern.permute.xlu1 %v4292_v14 }
  0xcb   :  { %505 = vperm.xlu1 %2278, %v2631_v43   ;;  %509 = vperm.xlu2 %2277, %v2636_v44  }
  0xcd   :  { %864 = vperm.xlu0 %2302, %v2487_v13  }
  0xce   :  { %v2718_v50 = vpop.permute.xlu0 %169 }
  0xd0   :  { %v2720_v62 = vpop.permute.xlu1 %243 }
  0xd1   :  { %4369 = vst [vmem:[#allocation32_spill] sm:$0xff] %v2720_v62 }
  0xd2   :  { %v2722_v36 = vpop.permute.xlu2 %321 }
  0xd3   :  { %4370 = vst [vmem:[#allocation33_spill] sm:$0xff] %v2722_v36  ;;  %513 = vperm.xlu1 %2278, %v2651_v48   ;;  %517 = vperm.xlu2 %2277, %v2656_v49  }
  0xd5   :  { %1426 = vperm.xlu0 %2302, %v2496_v15  }
  0xd6   :  { %v2727_v27 = vpop.permute.xlu0 %325 }
  0xd9   :  { %v2729_v14 = vpop.permute.xlu1 %276 }
  0xda   :  { %4371 = vst [vmem:[#allocation34_spill] sm:$0xff] %v2729_v14  ;;  %v2731_v63 = vpop.permute.xlu2 %333 }
  0xdb   :  { %4372 = vst [vmem:[#allocation35_spill] sm:$0xff] %v2731_v63  ;;  %525 = vperm.xlu1 %2278, %v2669_v53   ;;  %2279 = vset.pattern.permute.xlu2 %v4373_v47 }
  0xdc   :  { %584 = vperm.xlu2 %2279, %v2461_v10  }
  0xdd   :  { %1446 = vperm.xlu0 %2302, %v2505_v16  }
  0xde   :  { %v2737_v36 = vpop.permute.xlu0 %345 }
  0xe1   :  { %v2739_v62 = vpop.permute.xlu1 %284 }
  0xe2   :  { %4374 = vst [vmem:[#allocation36_spill] sm:$0xff] %v2739_v62  ;;  %v2741_v2 = vpop.permute.xlu2 %341 }
  0xe3   :  { %2280 = vset.pattern.permute.xlu1 %v4373_v47 }
  0xe4   :  { %592 = vperm.xlu1 %2280, %v2417_v1   ;;  %596 = vperm.xlu2 %2279, %v2438_v6  }
  0xe5   :  { %1554 = vperm.xlu0 %2302, %v2513_v17  }
  0xe6   :  { %v2747_v14 = vpop.permute.xlu0 %501 }
  0xe7   :  { %4375 = vst [vmem:[#allocation37_spill] sm:$0xff] %v2747_v14 }
  0xe9   :  { %v2749_v63 = vpop.permute.xlu1 %296 }
  0xea   :  { %4376 = vst [vmem:[#allocation38_spill] sm:$0xff] %v2749_v63  ;;  %v631_v63 = vld [vmem:[%s4279_s0 + $0x1] sm:$0xf] }
  0xeb   :  { %v2756_v55 = vpop.permute.xlu2 %384 }
  0xec   :  { %4377 = vst [vmem:[#allocation39_spill] sm:$0xff] %v2756_v55  ;;  %600 = vperm.xlu1 %2280, %v2412_v0   ;;  %604 = vperm.xlu2 %2279, %v2433_v5  }
  0xed   :  { %1558 = vperm.xlu0 %2302, %v2754_v60  }
  0xee   :  { %v2761_v1 = vpop.permute.xlu0 %521 }
  0xef   :  { %4378 = vst [vmem:[#allocation40_spill] sm:$0xff] %v2761_v1 }
  0xf2   :  { %v2763_v6 = vpop.permute.xlu1 %329 }
  0xf3   :  { %4379 = vst [vmem:[#allocation41_spill] sm:$0xff] %v2763_v6  ;;  %v2768_v54 = vpop.permute.xlu2 %399  ;;  %v633_v6 = vld [vmem:[%s4279_s0 + $0x11] sm:$0xf] }
  0xf4   :  { %4380 = vst [vmem:[#allocation42_spill] sm:$0xff] %v2768_v54  ;;  %612 = vperm.xlu1 %2280, %v2451_v8   ;;  %2281 = vset.pattern.permute.xlu2 %v4381_v34 }
  0xf5   :  { %2313 = vset.pattern.permute.xlu0 %v4381_v34  ;;  %641 = vperm.xlu2 %2281, %v631_v63  }
  0xf6   :  { %32 = vperm.xlu0 %2313, %v2461_v10   ;;  %v2774_v0 = vpop.permute.xlu0 %1137 }
  0xf7   :  { %4382 = vst [vmem:[#allocation43_spill] sm:$0xff] %v2774_v0  ;;  %v2195_v0 = vld [vmem:[%s4279_s0 + $0x101] sm:$0xf] }
  0xfa   :  { %v2776_v5 = vpop.permute.xlu1 %337 }
  0xfb   :  { %v2784_v8 = vpop.permute.xlu2 %409 }
  0xfc   :  { %2282 = vset.pattern.permute.xlu1 %v4381_v34 }
  0xfd   :  { %651 = vperm.xlu1 %2282, %v633_v6   ;;  %656 = vperm.xlu2 %2281, %v634_v40  }
  0xfe   :  { %37 = vperm.xlu0 %2313, %v2424_v4   ;;  %v2788_v10 = vpop.permute.xlu0 %1157  ;;  %v638_v4 = vld [vmem:[%s4279_s0 + $0x41] sm:$0xf] }
 0x102   :  { %v2790_v63 = vpop.permute.xlu1 %349 }
 0x103   :  { %4383 = vst [vmem:[#allocation44_spill] sm:$0xff] %v2790_v63 }
 0x104   :  { %v2798_v31 = vpop.permute.xlu2 %444 }
 0x105   :  { %4384 = vst [vmem:[#allocation45_spill] sm:$0xff] %v2798_v31  ;;  %661 = vperm.xlu1 %2282, %v635_v38   ;;  %666 = vperm.xlu2 %2281, %v636_v28  }
 0x106   :  { %62 = vperm.xlu0 %2313, %v2443_v7   ;;  %v2801_v40 = vpop.permute.xlu0 %1298 }
 0x107   :  { %4385 = vst [vmem:[#allocation46_spill] sm:$0xff] %v2801_v40 }
 0x10b   :  { %v2806_v6 = vpop.permute.xlu1 %394 }
 0x10c   :  { %4386 = vst [vmem:[#allocation47_spill] sm:$0xff] %v2806_v6  ;;  %v2808_v63 = vpop.permute.xlu2 %456 }
 0x10d   :  { %4387 = vst [vmem:[#allocation48_spill] sm:$0xff] %v2808_v63  ;;  %676 = vperm.xlu1 %2282, %v638_v4   ;;  %2283 = vset.pattern.permute.xlu2 %v4373_v47 }
 0x10e   :  { %213 = vperm.xlu0 %2313, %v2456_v9   ;;  %712 = vperm.xlu2 %2283, %v2519_v18   ;;  %v2813_v28 = vpop.permute.xlu0 %1318 }
 0x10f   :  { %4388 = vst [vmem:[#allocation49_spill] sm:$0xff] %v2813_v28 }
 0x113   :  { %v2815_v7 = vpop.permute.xlu1 %404 }
 0x114   :  { %4389 = vst [vmem:[#allocation50_spill] sm:$0xff] %v2815_v7  ;;  %v2817_v38 = vpop.permute.xlu2 %464 }
 0x115   :  { %2284 = vset.pattern.permute.xlu1 %v4373_v47 }
 0x116   :  { %720 = vperm.xlu1 %2284, %v2533_v20   ;;  %238 = vperm.xlu0 %2313, %v2470_v11   ;;  %v2161_v11 = vld [vmem:[%s4279_s0 + $0x51] sm:$0xf] }
 0x117   :  { %724 = vperm.xlu2 %2283, %v2538_v21   ;;  %v2823_v4 = vpop.permute.xlu0 %588 }
 0x11b   :  { %v2825_v30 = vpop.permute.xlu1 %419 }
 0x11c   :  { %4390 = vst [vmem:[#allocation51_spill] sm:$0xff] %v2825_v30 }
 0x11d   :  { %v2827_v9 = vpop.permute.xlu2 %497 }
 0x11e   :  { %4391 = vst [vmem:[#allocation52_spill] sm:$0xff] %v2827_v9  ;;  %728 = vperm.xlu1 %2284, %v2547_v22   ;;  %389 = vperm.xlu0 %2313, %v2479_v12   ;;  %v632_v12 = vld [vmem:[%s4279_s0 + $0x9] sm:$0xf] }
 0x11f   :  { %732 = vperm.xlu2 %2283, %v2552_v23   ;;  %v2832_v18 = vpop.permute.xlu0 %608  ;;  %v2163_v23 = vld [vmem:[%s4279_s0 + $0x61] sm:$0xf] }
 0x124   :  { %v2834_v28 = vpop.permute.xlu1 %452 }
 0x125   :  { %4392 = vst [vmem:[#allocation53_spill] sm:$0xff] %v2834_v28  ;;  %v2836_v20 = vpop.permute.xlu2 %509 }
 0x126   :  { %4393 = vst [vmem:[#allocation54_spill] sm:$0xff] %v2836_v20  ;;  %740 = vperm.xlu1 %2284, %v2560_v24   ;;  %414 = vperm.xlu0 %2313, %v2487_v13   ;;  %v2164_v13 = vld [vmem:[%s4279_s0 + $0x69] sm:$0xf] }
 0x127   :  { %2285 = vset.pattern.permute.xlu2 %v4381_v34  ;;  %v2844_v21 = vpop.permute.xlu0 %716 }
 0x128   :  { %769 = vperm.xlu2 %2285, %v2161_v11   ;;  %v637_v11 = vld [vmem:[%s4279_s0 + $0x39] sm:$0xf] }
 0x12c   :  { %v2849_v22 = vpop.permute.xlu1 %460 }
 0x12d   :  { %4394 = vst [vmem:[#allocation55_spill] sm:$0xff] %v2849_v22  ;;  %v2854_v59 = vpop.permute.xlu2 %517 }
 0x12e   :  { %2286 = vset.pattern.permute.xlu1 %v4381_v34  ;;  %646 = vperm.xlu0 %2313, %v632_v12  }
 0x12f   :  { %779 = vperm.xlu1 %2286, %v2163_v23   ;;  %v2860_v24 = vpop.permute.xlu0 %736 }
 0x130   :  { %784 = vperm.xlu2 %2285, %v2164_v13   ;;  %v2162_v13 = vld [vmem:[%s4279_s0 + $0x59] sm:$0xf] }
 0x134   :  { %v2865_v62 = vpop.permute.xlu1 %472 }
 0x135   :  { %4395 = vst [vmem:[#allocation56_spill] sm:$0xff] %v2865_v62 }
 0x136   :  { %671 = vperm.xlu0 %2313, %v637_v11   ;;  %v2873_v12 = vpop.permute.xlu2 %584 }
 0x137   :  { %4396 = vst [vmem:[#allocation57_spill] sm:$0xff] %v2873_v12  ;;  %789 = vperm.xlu1 %2286, %v2165_v51   ;;  %v2875_v23 = vpop.permute.xlu0 %844 }
 0x138   :  { %794 = vperm.xlu2 %2285, %v2166_v25   ;;  %v2167_v25 = vld [vmem:[%s4279_s0 + $0x89] sm:$0xf] }
 0x13d   :  { %v2883_v20 = vpop.permute.xlu1 %505 }
 0x13e   :  { %4397 = vst [vmem:[#allocation58_spill] sm:$0xff] %v2883_v20  ;;  %774 = vperm.xlu0 %2313, %v2162_v13   ;;  %v2885_v7 = vpop.permute.xlu2 %596 }
 0x13f   :  { %4398 = vst [vmem:[#allocation59_spill] sm:$0xff] %v2885_v7  ;;  %804 = vperm.xlu1 %2286, %v2168_v42   ;;  %v2887_v11 = vpop.permute.xlu0 %864 }
 0x140   :  { %2287 = vset.pattern.permute.xlu2 %v4373_v47 }
 0x141   :  { %840 = vperm.xlu2 %2287, %v2616_v39   ;;  %v2170_v39 = vld [vmem:[%s4279_s0 + $0xa9] sm:$0xf] }
 0x145   :  { %v2894_v51 = vpop.permute.xlu1 %513 }
 0x146   :  { %799 = vperm.xlu0 %2313, %v2167_v25   ;;  %v2896_v12 = vpop.permute.xlu2 %604 }
 0x147   :  { %4399 = vst [vmem:[#allocation60_spill] sm:$0xff] %v2896_v12  ;;  %2288 = vset.pattern.permute.xlu1 %v4373_v47  ;;  %v2899_v13 = vpop.permute.xlu0 %1426 }
 0x148   :  { %4400 = vst [vmem:[#allocation61_spill] sm:$0xff] %v2899_v13  ;;  %848 = vperm.xlu1 %2288, %v2631_v43   ;;  %v2175_v43 = vld [vmem:[%s4279_s0 + $0xd9] sm:$0xf] }
 0x149   :  { %852 = vperm.xlu2 %2287, %v2636_v44  }
 0x14d   :  { %v2906_v42 = vpop.permute.xlu1 %525 }
 0x14e   :  { %4401 = vst [vmem:[#allocation62_spill] sm:$0xff] %v2906_v42  ;;  %902 = vperm.xlu0 %2313, %v2170_v39   ;;  %v2169_v39 = vld [vmem:[%s4279_s0 + $0xa1] sm:$0xf] }
 0x14f   :  { %v2908_v7 = vpop.permute.xlu2 %641  ;;  %v2910_v25 = vpop.permute.xlu0 %1446 }
 0x150   :  { %4402 = vst [vmem:[#allocation63_spill] sm:$0xff] %v2908_v7  ;;  %856 = vperm.xlu1 %2288, %v2651_v48   ;;  %v2931_v48 = vld [vmem:[%s4279_s0 + $0xf8] sm:$0xf] }
 0x151   :  { %4403 = vst [vmem:[#allocation64_spill] sm:$0xff] %v2910_v25  ;;  %860 = vperm.xlu2 %2287, %v2656_v49  }
 0x152   :  { %4407 = vst [vmem:[#allocation68_spill] sm:$0xff] %v2931_v48 }
 0x156   :  { %v2917_v44 = vpop.permute.xlu1 %592  ;;  %927 = vperm.xlu0 %2313, %v2175_v43   ;;  %v2171_v43 = vld [vmem:[%s4279_s0 + $0xb1] sm:$0xf] }
 0x157   :  { %4404 = vst [vmem:[#allocation65_spill] sm:$0xff] %v2917_v44  ;;  %v2919_v12 = vpop.permute.xlu2 %656  ;;  %v2921_v47 = vpop.permute.xlu0 %1554 }
 0x158   :  { %4405 = vst [vmem:[#allocation66_spill] sm:$0xff] %v2919_v12  ;;  %868 = vperm.xlu1 %2288, %v2669_v53   ;;  %v2172_v53 = vld [vmem:[%s4279_s0 + $0xb9] sm:$0xf] }
 0x159   :  { %4406 = vst [vmem:[#allocation67_spill] sm:$0xff] %v2921_v47  ;;  %2289 = vset.pattern.permute.xlu2 %v4381_v34  ;;  %v2974_v47 = vld [vmem:[%s4279_s0 + $0xf0] sm:$0xf] }
 0x15a   :  { %897 = vperm.xlu2 %2289, %v2169_v39   ;;  %v2950_v39 = vld [vmem:[%s4279_s0 + $0x118] sm:$0xf] }
 0x15b   :  { %4410 = vst [vmem:[#allocation71_spill] sm:$0xff] %v2950_v39 }
 0x15e   :  { %v2933_v49 = vpop.permute.xlu1 %600  ;;  %1031 = vperm.xlu0 %2313, %v2931_v48  }
 0x15f   :  { %v2939_v7 = vpop.permute.xlu2 %666  ;;  %v2941_v12 = vpop.permute.xlu0 %1558 }
 0x160   :  { %4408 = vst [vmem:[#allocation69_spill] sm:$0xff] %v2939_v7  ;;  %2290 = vset.pattern.permute.xlu1 %v4381_v34  ;;  %v2174_v7 = vld [vmem:[%s4279_s0 + $0xd1] sm:$0xf] }
 0x161   :  { %4409 = vst [vmem:[#allocation70_spill] sm:$0xff] %v2941_v12  ;;  %907 = vperm.xlu1 %2290, %v2171_v43   ;;  %v2173_v12 = vld [vmem:[%s4279_s0 + $0xc9] sm:$0xf] }
 0x162   :  { %912 = vperm.xlu2 %2289, %v2172_v53   ;;  %v2176_v53 = vld [vmem:[%s4279_s0 + $0xe1] sm:$0xf] }
 0x166   :  { %v2952_v44 = vpop.permute.xlu1 %612  ;;  %1046 = vperm.xlu0 %2313, %v2950_v39  }
 0x167   :  { %4411 = vst [vmem:[#allocation72_spill] sm:$0xff] %v2952_v44 }
 0x168   :  { %v2961_v54 = vpop.permute.xlu0 %32  ;;  %v2963_v43 = vpop.permute.xlu2 %712 }
 0x169   :  { %4412 = vst [vmem:[#allocation73_spill] sm:$0xff] %v2961_v54  ;;  %917 = vperm.xlu1 %2290, %v2173_v12   ;;  %v2990_v12 = vld [vmem:[%s4279_s0 + $0x108] sm:$0xf] }
 0x16a   :  { %4413 = vst [vmem:[#allocation74_spill] sm:$0xff] %v2963_v43  ;;  %922 = vperm.xlu2 %2289, %v2174_v7  }
 0x16e   :  { %1061 = vperm.xlu0 %2313, %v2505_v16   ;;  %v2983_v16 = vld [vmem:[%s4280_s1] ss:$0 sm:$0xff] }
 0x16f   :  { %v2969_v44 = vpop.permute.xlu1 %651 }
 0x170   :  { %4414 = vst [vmem:[#allocation75_spill] sm:$0xff] %v2969_v44  ;;  %v38_v22 = vpop.permute.xlu0 %37  ;;  %v3007_v44 = vld [vmem:[%s4280_s1 + $0x2] ss:$0 sm:$0xff] }
 0x171   :  { %v2976_v63 = vpop.permute.xlu2 %724  ;;  %932 = vperm.xlu1 %2290, %v2176_v53   ;;  %v2995_v53 = vld [vmem:[%s4280_s1 + $0x1] ss:$0 sm:$0xff]  ;;  %v180_v40 = vmul.f32 %v3007_v44, %v2708_v3 }
 0x172   :  { %4415 = vst [vmem:[#allocation76_spill] sm:$0xff] %v2976_v63  ;;  %1026 = vperm.xlu2 %2289, %v2974_v47   ;;  %v127_v63 = vmul.f32 %v2995_v53, %v2582_v29  ;;  %v3020_v29 = vld [vmem:[%s4280_s1 + $0x3] ss:$0 sm:$0xff] }
 0x176   :  { %1197 = vperm.xlu0 %2313, %v2513_v17   ;;  %v74_v17 = vmul.f32 %v2983_v16, %v38_v22 }
 0x177   :  { %v2985_v7 = vpop.permute.xlu1 %661 }
 0x178   :  { %v63_v43 = vpop.permute.xlu0 %62  ;;  %v135_v9 = vadd.f32 %v127_v63, %v74_v17 }
 0x179   :  { %v2998_v54 = vpop.permute.xlu2 %732  ;;  %1036 = vperm.xlu1 %2290, %v2496_v15   ;;  %v3015_v15 = vld [vmem:[%s4279_s0 + $0x120] sm:$0xf] }
 0x17a   :  { %4416 = vst [vmem:[#allocation77_spill] sm:$0xff] %v2998_v54  ;;  %1041 = vperm.xlu2 %2289, %v2990_v12   ;;  %v3027_v54 = vld [vmem:[%s4279_s0 + $0x128] sm:$0xf]  ;;  %v188_v17 = vadd.f32 %v180_v40, %v135_v9  ;;  %v185_v40 = vmul.f32 %v3007_v44, %v2718_v50 }
 0x17b   :  { %4417 = vst [vmem:[#allocation78_spill] sm:$0xff] %v3015_v15 }
 0x17c   :  { %4419 = vst [vmem:[#allocation80_spill] sm:$0xff] %v3027_v54 }
 0x17e   :  { %1222 = vperm.xlu0 %2313, %v2527_v19   ;;  %v79_v19 = vmul.f32 %v2983_v16, %v63_v43 }
 0x17f   :  { %v3022_v22 = vpop.permute.xlu1 %676 }
 0x180   :  { %4418 = vst [vmem:[#allocation79_spill] sm:$0xff] %v3022_v22  ;;  %v214_v63 = vpop.permute.xlu0 %213  ;;  %v132_v22 = vmul.f32 %v2995_v53, %v2592_v32 }
 0x181   :  { %v250_v13 = vmul.f32 %v3020_v29, %v214_v63  ;;  %1051 = vperm.xlu1 %2290, %v3015_v15   ;;  %v3047_v63 = vld [vmem:[%s4280_s1 + $0x4] ss:$0 sm:$0xff] }
 0x182   :  { %1056 = vperm.xlu2 %2289, %v3027_v54   ;;  %v3033_v31 = vpop.permute.xlu2 %769  ;;  %v140_v52 = vadd.f32 %v132_v22, %v79_v19 }
 0x183   :  { %4420 = vst [vmem:[#allocation81_spill] sm:$0xff] %v3033_v31  ;;  %v258_v55 = vadd.f32 %v250_v13, %v188_v17  ;;  %v4422_v13 = vmov 1   ;;  %v3064_v17 = vld [vmem:[%s4280_s1 + $0x5] ss:$0 sm:$0xff] }
 0x184   :  { %v193_v31 = vadd.f32 %v185_v40, %v140_v52  ;;  %v2200_v52 = vld [vmem:[%s4279_s0 + $0x131] sm:$0xf] }
 0x186   :  { %1485 = vperm.xlu0 %2313, %v2195_v0   ;;  %v303_v0 = vmul.f32 %v3047_v63, %v2602_v35 }
 0x188   :  { %v3042_v9 = vpop.permute.xlu1 %720  ;;  %v239_v43 = vpop.permute.xlu0 %238  ;;  %v311_v40 = vadd.f32 %v303_v0, %v258_v55  ;;  %v308_v55 = vmul.f32 %v3047_v63, %v2609_v37 }
 0x189   :  { %4421 = vst [vmem:[#allocation82_spill] sm:$0xff] %v3042_v9  ;;  %v255_v32 = vmul.f32 %v3020_v29, %v239_v43  ;;  %2291 = vset.pattern.permute.xlu1 %v4422_v13  ;;  %v356_v43 = vmul.f32 %v3064_v17, %v2727_v27 }
 0x18a   :  { %2292 = vset.pattern.permute.xlu2 %v4422_v13  ;;  %v3052_v22 = vpop.permute.xlu2 %784  ;;  %1081 = vperm.xlu1 %2291, %v2974_v47  }
 0x18b   :  { %4423 = vst [vmem:[#allocation83_spill] sm:$0xff] %v3052_v22  ;;  %v263_v19 = vadd.f32 %v255_v32, %v193_v31  ;;  %1085 = vperm.xlu2 %2292, %v2931_v48   ;;  %v3071_v31 = vld [vmem:[%s4280_s1 + $0x6] ss:$0 sm:$0xff]  ;;  %v364_v22 = vadd.f32 %v356_v43, %v311_v40  ;;  %v361_v40 = vmul.f32 %v3064_v17, %v2737_v36 }
 0x18d   :  { %v316_v20 = vadd.f32 %v308_v55, %v263_v19  ;;  %v2204_v19 = vld [vmem:[%s4279_s0 + $0x21] sm:$0xf]  ;;  %v568_v55 = vmul.f32 %v2983_v16, %v2708_v3 }
 0x18e   :  { %1510 = vperm.xlu0 %2313, %v2200_v52   ;;  %v2205_v52 = vld [vmem:[%s4279_s0 + $0x31] sm:$0xf] }
 0x18f   :  { %v369_v25 = vadd.f32 %v361_v40, %v316_v20  ;;  %v616_v20 = vmul.f32 %v2995_v53, %v2823_v4  ;;  %v573_v4 = vmul.f32 %v2983_v16, %v2718_v50 }
 0x190   :  { %v3073_v35 = vpop.permute.xlu1 %728  ;;  %v3075_v32 = vpop.permute.xlu0 %389 }
 0x191   :  { %v426_v9 = vmul.f32 %v3071_v31, %v3075_v32  ;;  %v624_v40 = vadd.f32 %v616_v20, %v568_v55 }
 0x192   :  { %v3079_v56 = vpop.permute.xlu2 %794  ;;  %1093 = vperm.xlu1 %2291, %v2990_v12  }
 0x193   :  { %4424 = vst [vmem:[#allocation84_spill] sm:$0xff] %v3079_v56  ;;  %v3084_v0 = vadd.f32 %v426_v9, %v364_v22  ;;  %1097 = vperm.xlu2 %2292, %v2950_v39  }
 0x195   :  { %4425 = vst [vmem:[#allocation85_spill] sm:$0xff] %v3084_v0  ;;  %v4430_v0 = vmov 2  }
 0x196   :  { %1623 = vperm.xlu0 %2313, %v2205_v52  }
 0x198   :  { %v3092_v43 = vpop.permute.xlu1 %740  ;;  %v3094_v56 = vpop.permute.xlu0 %414 }
 0x199   :  { %4426 = vst [vmem:[#allocation86_spill] sm:$0xff] %v3092_v43  ;;  %v431_v37 = vmul.f32 %v3071_v31, %v3094_v56  ;;  %v744_v43 = vmul.f32 %v3047_v63, %v2844_v21 }
 0x19a   :  { %1101 = vperm.xlu1 %2291, %v3015_v15  }
 0x19b   :  { %v3099_v9 = vadd.f32 %v431_v37, %v369_v25  ;;  %1105 = vperm.xlu2 %2292, %v3027_v54   ;;  %v3102_v22 = vpop.permute.xlu2 %840 }
 0x19c   :  { %4428 = vst [vmem:[#allocation88_spill] sm:$0xff] %v3102_v22 }
 0x19d   :  { %4427 = vst [vmem:[#allocation87_spill] sm:$0xff] %v3099_v9  ;;  %v696_v9 = vmul.f32 %v3020_v29, %v2727_v27 }
 0x19e   :  { %1618 = vperm.xlu0 %2313, %v2204_v19   ;;  %v621_v19 = vmul.f32 %v2995_v53, %v2832_v18 }
 0x1a0   :  { %v647_v52 = vpop.permute.xlu0 %646 }
 0x1a1   :  { %v680_v25 = vmul.f32 %v3007_v44, %v647_v52  ;;  %v3112_v37 = vpop.permute.xlu1 %779  ;;  %v629_v52 = vadd.f32 %v621_v19, %v573_v4  ;;  %v824_v4 = vmul.f32 %v3071_v31, %v2747_v14 }
 0x1a2   :  { %4429 = vst [vmem:[#allocation89_spill] sm:$0xff] %v3112_v37  ;;  %2293 = vset.pattern.permute.xlu1 %v4430_v0  ;;  %v749_v37 = vmul.f32 %v3047_v63, %v2860_v24 }
 0x1a3   :  { %v688_v22 = vadd.f32 %v680_v25, %v624_v40  ;;  %2294 = vset.pattern.permute.xlu2 %v4430_v0  ;;  %v3120_v3 = vpop.permute.xlu2 %852  ;;  %1129 = vperm.xlu1 %2293, %v2974_v47   ;;  %v701_v25 = vmul.f32 %v3020_v29, %v2737_v36 }
 0x1a4   :  { %4431 = vst [vmem:[#allocation90_spill] sm:$0xff] %v3120_v3  ;;  %1133 = vperm.xlu2 %2294, %v2931_v48  }
 0x1a5   :  { %v704_v55 = vadd.f32 %v696_v9, %v688_v22  ;;  %v3142_v9 = vld [vmem:[%s4280_s1 + $0x7] ss:$0 sm:$0xff] }
 0x1a6   :  { %v872_v24 = vmul.f32 %v3142_v9, %v2875_v23 }
 0x1a7   :  { %v752_v27 = vadd.f32 %v744_v43, %v704_v55 }
 0x1a8   :  { %v672_v20 = vpop.permute.xlu0 %671 }
 0x1a9   :  { %v685_v21 = vmul.f32 %v3007_v44, %v672_v20  ;;  %v3129_v40 = vpop.permute.xlu1 %789 }
 0x1ab   :  { %v693_v3 = vadd.f32 %v685_v21, %v629_v52  ;;  %v3135_v48 = vpop.permute.xlu2 %860  ;;  %1141 = vperm.xlu1 %2293, %v2990_v12   ;;  %v3159_v21 = vld [vmem:[%s4279_s0 + $0x8] sm:$0xf] }
 0x1ac   :  { %4432 = vst [vmem:[#allocation91_spill] sm:$0xff] %v3135_v48  ;;  %1145 = vperm.xlu2 %2294, %v2950_v39   ;;  %v1000_v39 = vmul.f32 %v3007_v44, %v2747_v14 }
 0x1ad   :  { %v709_v50 = vadd.f32 %v701_v25, %v693_v3 }
 0x1af   :  { %v757_v18 = vadd.f32 %v749_v37, %v709_v50  ;;  %v877_v50 = vmul.f32 %v3142_v9, %v2887_v11 }
 0x1b0   :  { %v775_v43 = vpop.permute.xlu0 %774 }
 0x1b1   :  { %v808_v36 = vmul.f32 %v3064_v17, %v775_v43  ;;  %v3145_v22 = vpop.permute.xlu1 %804  ;;  %v829_v43 = vmul.f32 %v3071_v31, %v2761_v1 }
 0x1b2   :  { %4433 = vst [vmem:[#allocation92_spill] sm:$0xff] %v3145_v22 }
 0x1b3   :  { %v816_v19 = vadd.f32 %v808_v36, %v752_v27  ;;  %1149 = vperm.xlu1 %2293, %v3015_v15   ;;  %v3166_v27 = vld [vmem:[%s4279_s0 + $0x10] sm:$0xf]  ;;  %v131_v15 = vmul.f32 %v2995_v53, %v2594_v33 }
 0x1b4   :  { %1153 = vperm.xlu2 %2294, %v3027_v54   ;;  %v3153_v37 = vpop.permute.xlu2 %897 }
 0x1b5   :  { %4434 = vst [vmem:[#allocation93_spill] sm:$0xff] %v3153_v37  ;;  %v832_v3 = vadd.f32 %v824_v4, %v816_v19  ;;  %v1354_v4 = vmul.f32 %v2983_v16, %v2747_v14  ;;  %v1370_v19 = vmul.f32 %v2995_v53, %v2875_v23  ;;  %v3194_v23 = vld [vmem:[%s4279_s0 + $0x30] sm:$0xf] }
 0x1b7   :  { %v880_v55 = vadd.f32 %v872_v24, %v832_v3  ;;  %v1378_v22 = vadd.f32 %v1370_v19, %v1354_v4  ;;  %v1375_v4 = vmul.f32 %v2995_v53, %v2887_v11  ;;  %v619_v19 = vmul.f32 %v2995_v53, %v2933_v49 }
 0x1b8   :  { %v800_v20 = vpop.permute.xlu0 %799  ;;  %v571_v11 = vmul.f32 %v2983_v16, %v2681_v57  ;;  %v683_v49 = vmul.f32 %v3007_v44, %v2985_v7 }
 0x1b9   :  { %v813_v52 = vmul.f32 %v3064_v17, %v800_v20 }
 0x1ba   :  { %v3161_v25 = vpop.permute.xlu1 %848 }
 0x1bb   :  { %v821_v36 = vadd.f32 %v813_v52, %v757_v18  ;;  %2295 = vset.pattern.permute.xlu1 %v4381_v34  ;;  %v3185_v18 = vld [vmem:[%s4280_s1 + $0x8] ss:$0 sm:$0xff] }
 0x1bc   :  { %2296 = vset.pattern.permute.xlu2 %v4381_v34  ;;  %v3174_v24 = vpop.permute.xlu2 %912  ;;  %1187 = vperm.xlu1 %2295, %v3159_v21  }
 0x1bd   :  { %4435 = vst [vmem:[#allocation94_spill] sm:$0xff] %v3174_v24  ;;  %v837_v3 = vadd.f32 %v829_v43, %v821_v36  ;;  %1192 = vperm.xlu2 %2296, %v3166_v27  }
 0x1bf   :  { %v885_v20 = vadd.f32 %v877_v50, %v837_v3  ;;  %v1359_v50 = vmul.f32 %v2983_v16, %v2761_v1 }
 0x1c0   :  { %v903_v52 = vpop.permute.xlu0 %902 }
 0x1c1   :  { %v936_v37 = vmul.f32 %v3185_v18, %v903_v52  ;;  %v1386_v48 = vmul.f32 %v3007_v44, %v903_v52  ;;  %v3217_v52 = vld [vmem:[%s4279_s0 + $0x38] sm:$0xf] }
 0x1c2   :  { %v3189_v34 = vpop.permute.xlu1 %856 }
 0x1c3   :  { %v3196_v43 = vadd.f32 %v936_v37, %v880_v55  ;;  %v3198_v36 = vadd.f32 %v1386_v48, %v1378_v22  ;;  %v1383_v37 = vadd.f32 %v1375_v4, %v1359_v50  ;;  %v968_v48 = vmul.f32 %v2983_v16, %v3075_v32  ;;  %v3228_v32 = vld [vmem:[%s4279_s0 + $0x40] sm:$0xf] }
 0x1c4   :  { %v3200_v24 = vpop.permute.xlu2 %922  ;;  %1202 = vperm.xlu1 %2295, %v2754_v60   ;;  %v984_v50 = vmul.f32 %v2995_v53, %v2624_v41 }
 0x1c5   :  { %4436 = vst [vmem:[#allocation95_spill] sm:$0xff] %v3196_v43  ;;  %1207 = vperm.xlu2 %2296, %v3194_v23  }
 0x1c6   :  { %4437 = vst [vmem:[#allocation96_spill] sm:$0xff] %v3200_v24  ;;  %v627_v24 = vadd.f32 %v619_v19, %v571_v11  ;;  %v992_v7 = vadd.f32 %v984_v50, %v968_v48  ;;  %v747_v19 = vmul.f32 %v3047_v63, %v3073_v35  ;;  %v184_v48 = vmul.f32 %v3007_v44, %v2638_v45 }
 0x1c7   :  { %v811_v11 = vmul.f32 %v3064_v17, %v3129_v40  ;;  %v254_v50 = vmul.f32 %v3020_v29, %v2683_v58  ;;  %v973_v40 = vmul.f32 %v2983_v16, %v3094_v56  ;;  %v875_v56 = vmul.f32 %v3142_v9, %v3189_v34 }
 0x1c8   :  { %v928_v3 = vpop.permute.xlu0 %927  ;;  %v691_v57 = vadd.f32 %v683_v49, %v627_v24  ;;  %v1008_v24 = vadd.f32 %v1000_v39, %v992_v7 }
 0x1c9   :  { %v941_v22 = vmul.f32 %v3185_v18, %v928_v3  ;;  %v1391_v55 = vmul.f32 %v3007_v44, %v928_v3 }
 0x1ca   :  { %v3223_v43 = vpop.permute.xlu1 %868 }
 0x1cb   :  { %4438 = vst [vmem:[#allocation97_spill] sm:$0xff] %v3223_v43  ;;  %v3232_v4 = vadd.f32 %v941_v22, %v885_v20  ;;  %v3234_v3 = vadd.f32 %v1391_v55, %v1383_v37  ;;  %v699_v20 = vmul.f32 %v3020_v29, %v2776_v5  ;;  %v78_v22 = vmul.f32 %v2983_v16, %v2569_v26 }
 0x1cc   :  { %v3236_v54 = vpop.permute.xlu2 %1026  ;;  %1212 = vperm.xlu1 %2295, %v3217_v52  }
 0x1cd   :  { %4439 = vst [vmem:[#allocation98_spill] sm:$0xff] %v3232_v4  ;;  %1217 = vperm.xlu2 %2296, %v3228_v32   ;;  %v707_v33 = vadd.f32 %v699_v20, %v691_v57  ;;  %v139_v49 = vadd.f32 %v131_v15, %v78_v22  ;;  %v307_v57 = vmul.f32 %v3047_v63, %v2712_v61 }
 0x1ce   :  { %v989_v15 = vmul.f32 %v2995_v53, %v2644_v46  ;;  %v360_v20 = vmul.f32 %v3064_v17, %v2741_v2  ;;  %v827_v61 = vmul.f32 %v3071_v31, %v2894_v51 }
 0x1cf   :  { %v755_v41 = vadd.f32 %v747_v19, %v707_v33  ;;  %v192_v39 = vadd.f32 %v184_v48, %v139_v49  ;;  %v1005_v33 = vmul.f32 %v3007_v44, %v2761_v1 }
 0x1d0   :  { %v1032_v37 = vpop.permute.xlu0 %1031 }
 0x1d1   :  { %v1065_v55 = vmul.f32 %v3020_v29, %v1032_v37  ;;  %v819_v58 = vadd.f32 %v811_v11, %v755_v41  ;;  %v262_v7 = vadd.f32 %v254_v50, %v192_v39  ;;  %v430_v41 = vmul.f32 %v3071_v31, %v2784_v8 }
 0x1d2   :  { %v997_v37 = vadd.f32 %v989_v15, %v973_v40  ;;  %v3298_v15 = vld [vmem:[%s4281_s2] ss:$0 sm:$0xff] }
 0x1d3   :  { %v3257_v14 = vadd.f32 %v1065_v55, %v1008_v24  ;;  %v3259_v35 = vpop.permute.xlu1 %907  ;;  %v835_v22 = vadd.f32 %v827_v61, %v819_v58  ;;  %v483_v24 = vmul.f32 %v3142_v9, %v2817_v38 }
 0x1d4   :  { %4440 = vst [vmem:[#allocation99_spill] sm:$0xff] %v3259_v35  ;;  %v3261_v26 = vpop.permute.xlu2 %1041  ;;  %2297 = vset.pattern.permute.xlu1 %v4422_v13  ;;  %v1013_v40 = vadd.f32 %v1005_v33, %v997_v37  ;;  %v990_v37 = vmul.f32 %v2995_v53, %v2865_v62 }
 0x1d5   :  { %2298 = vset.pattern.permute.xlu2 %v4422_v13  ;;  %1242 = vperm.xlu1 %2297, %v3159_v21   ;;  %v315_v13 = vadd.f32 %v307_v57, %v262_v7  ;;  %v883_v11 = vadd.f32 %v875_v56, %v835_v22  ;;  %v536_v57 = vmul.f32 %v3185_v18, %v2854_v59 }
 0x1d6   :  { %1246 = vperm.xlu2 %2298, %v3166_v27   ;;  %v1376_v56 = vmul.f32 %v2995_v53, %v3223_v43  ;;  %v4457_v43 = vld [vmem:[#allocation50_spill] sm:$0xff] }
 0x1d7   :  { %v368_v48 = vadd.f32 %v360_v20, %v315_v13 }
 0x1d8   :  { %v3279_v19 = vpop.permute.xlu0 %1046 }
 0x1d9   :  { %v438_v39 = vadd.f32 %v430_v41, %v368_v48  ;;  %v1360_v48 = vmul.f32 %v2983_v16, %v2906_v42 }
 0x1db   :  { %v3285_v55 = vpop.permute.xlu1 %917  ;;  %v491_v20 = vadd.f32 %v483_v24, %v438_v39  ;;  %v974_v24 = vmul.f32 %v2983_v16, %v2825_v30 }
 0x1dc   :  { %v939_v49 = vmul.f32 %v3185_v18, %v3285_v55  ;;  %v1057_v50 = vpop.permute.xlu2 %1056 }
 0x1dd   :  { %v1070_v58 = vmul.f32 %v3020_v29, %v1057_v50  ;;  %1254 = vperm.xlu1 %2297, %v2754_v60   ;;  %v544_v22 = vadd.f32 %v536_v57, %v491_v20  ;;  %v1384_v50 = vadd.f32 %v1376_v56, %v1360_v48  ;;  %v985_v56 = vmul.f32 %v2995_v53, %v2834_v28 }
 0x1de   :  { %v947_v7 = vadd.f32 %v939_v49, %v883_v11  ;;  %1258 = vperm.xlu2 %2298, %v3194_v23   ;;  %v1006_v11 = vmul.f32 %v3007_v44, %v2906_v42  ;;  %v1373_v42 = vmul.f32 %v2995_v53, %v3189_v34  ;;  %v1389_v34 = vmul.f32 %v3007_v44, %v3285_v55 }
 0x1df   :  { %v3301_v61 = vadd.f32 %v1070_v58, %v1013_v40  ;;  %v1408_v40 = vmul.f32 %v3020_v29, %v2788_v10  ;;  %v998_v58 = vadd.f32 %v990_v37, %v974_v24  ;;  %v556_v62 = vadd.f32 %v3298_v15, %v544_v22  ;;  %v4442_v24 = vld [vmem:[#allocation64_spill] sm:$0xff] }
 0x1e0   :  { %v3306_v13 = vadd.f32 %v3298_v15, %v947_v7  ;;  %v1062_v41 = vpop.permute.xlu0 %1061  ;;  %v969_v37 = vmul.f32 %v2983_v16, %v2806_v6 }
 0x1e1   :  { %v1071_v7 = vmul.f32 %v3020_v29, %v1062_v41  ;;  %v1014_v41 = vadd.f32 %v1006_v11, %v998_v58  ;;  %v564_v46 = vmax.f32 %v556_v62, 0.0  ;;  %v1371_v11 = vmul.f32 %v2995_v53, %v3161_v25 }
 0x1e2   :  { %v4330_v33 = vmax.f32 %v3306_v13, 0.0  ;;  %v993_v4 = vadd.f32 %v985_v56, %v969_v37 }
 0x1e3   :  { %v3317_v49 = vpop.permute.xlu1 %932 }
 0x1e4   :  { %4441 = vst [vmem:[#allocation100_spill] sm:$0xff] %v3317_v49  ;;  %v1392_v39 = vmul.f32 %v3007_v44, %v3317_v49  ;;  %v1801_v57 = vrot.slane %v4330_v33, 7  ;;  %v1456_v33 = vmul.f32 %v3047_v63, %v4442_v24 }
 0x1e5   :  { %v1086_v20 = vpop.permute.xlu2 %1085  ;;  %1262 = vperm.xlu1 %2297, %v3217_v52  }
 0x1e6   :  { %v1400_v48 = vadd.f32 %v1392_v39, %v1384_v50  ;;  %v1113_v1 = vmul.f32 %v3047_v63, %v1086_v20  ;;  %1266 = vperm.xlu2 %2298, %v3228_v32   ;;  %1802 = vrot.lane.b32.xlu0 %v1801_v57, %s2368_s24  ;;  %v4443_v50 = vld [vmem:[#allocation58_spill] sm:$0xff]  ;;  %v1079_v20 = vadd.f32 %v1071_v7, %v1014_v41  ;;  %v4444_v57 = vld [vmem:[#allocation23_spill] sm:$0xff] }
 0x1e7   :  { %v1001_v39 = vmul.f32 %v3007_v44, %v4443_v50  ;;  %v1119_v6 = vmul.f32 %v3047_v63, %v4444_v57  ;;  %v1387_v7 = vmul.f32 %v3007_v44, %v3259_v35 }
 0x1e8   :  { %v1416_v30 = vadd.f32 %v1408_v40, %v1400_v48  ;;  %v3338_v22 = vadd.f32 %v1113_v1, %v3257_v14  ;;  %v1198_v28 = vpop.permute.xlu0 %1197  ;;  %v1355_v1 = vmul.f32 %v2983_v16, %v4443_v50 }
 0x1e9   :  { %v1009_v40 = vadd.f32 %v1001_v39, %v993_v4  ;;  %v1127_v62 = vadd.f32 %v1119_v6, %v1079_v20  ;;  %v1167_v4 = vmul.f32 %v3064_v17, %v2788_v10  ;;  %v4446_v6 = vld [vmem:[#allocation43_spill] sm:$0xff]  ;;  %v1227_v24 = vmul.f32 %v3071_v31, %v1198_v28  ;;  %v4449_v28 = vld [vmem:[#allocation45_spill] sm:$0xff] }
 0x1ea   :  { %v3342_v49 = vadd.f32 %v1456_v33, %v1416_v30  ;;  %v1854_v30 = vrot.slane %v564_v46, 4  ;;  %v4445_v33 = vld [vmem:[#allocation20_spill] sm:$0xff]  ;;  %v1379_v41 = vadd.f32 %v1371_v11, %v1355_v1  ;;  %v1162_v46 = vmul.f32 %v3064_v17, %v4446_v6 }
 0x1eb   :  { %v1037_v58 = vpop.permute.xlu1 %1036  ;;  %v1114_v48 = vmul.f32 %v3047_v63, %v4445_v33  ;;  %v1403_v10 = vmul.f32 %v3020_v29, %v4446_v6  ;;  %v4451_v6 = vld [vmem:[#allocation52_spill] sm:$0xff] }
 0x1ec   :  { %v1066_v14 = vmul.f32 %v3020_v29, %v1037_v58  ;;  %v1395_v57 = vadd.f32 %v1387_v7, %v1379_v41 }
 0x1ed   :  { %v3353_v56 = vpop.permute.xlu2 %1097  ;;  %2300 = vset.pattern.permute.xlu1 %v4430_v0 }
 0x1ee   :  { %v1074_v37 = vadd.f32 %v1066_v14, %v1009_v40  ;;  %2301 = vset.pattern.permute.xlu2 %v4430_v0  ;;  %1290 = vperm.xlu1 %2300, %v3159_v21   ;;  %v1175_v0 = vadd.f32 %v1167_v4, %v1127_v62  ;;  %v1411_v62 = vadd.f32 %v1403_v10, %v1395_v57  ;;  %v4450_v4 = vld [vmem:[#allocation61_spill] sm:$0xff] }
 0x1ef   :  { %1294 = vperm.xlu2 %2301, %v3166_v27   ;;  %1855 = vrot.lane.b32.xlu0 %v1854_v30, %s2369_s25  ;;  %v4448_v30 = vld [vmem:[#allocation39_spill] sm:$0xff]  ;;  %v1451_v41 = vmul.f32 %v3047_v63, %v4450_v4  ;;  %v1064_v57 = vmul.f32 %v3020_v29, %v3236_v54  ;;  %v4453_v4 = vld [vmem:[#allocation48_spill] sm:$0xff] }
 0x1f0   :  { %v1122_v39 = vadd.f32 %v1114_v48, %v1074_v37  ;;  %v1223_v20 = vpop.permute.xlu0 %1222  ;;  %v967_v33 = vmul.f32 %v2983_v16, %v4448_v30  ;;  %v983_v48 = vmul.f32 %v2995_v53, %v4449_v28  ;;  %v986_v28 = vmul.f32 %v2995_v53, %v4453_v4  ;;  %v4454_v30 = vld [vmem:[#allocation55_spill] sm:$0xff] }
 0x1f1   :  { %v1232_v58 = vmul.f32 %v3071_v31, %v1223_v20 }
 0x1f2   :  { %v1170_v40 = vadd.f32 %v1162_v46, %v1122_v39  ;;  %v999_v46 = vmul.f32 %v3007_v44, %v4451_v6  ;;  %v991_v20 = vadd.f32 %v983_v48, %v967_v33 }
 0x1f3   :  { %v3370_v11 = vadd.f32 %v1232_v58, %v1175_v0  ;;  %v3372_v14 = vpop.permute.xlu1 %1051  ;;  %v1459_v0 = vadd.f32 %v1451_v41, %v1411_v62  ;;  %v4456_v41 = vld [vmem:[#allocation42_spill] sm:$0xff] }
 0x1f4   :  { %v3374_v1 = vadd.f32 %v1227_v24, %v1170_v40  ;;  %v1007_v10 = vadd.f32 %v999_v46, %v991_v20  ;;  %v971_v46 = vmul.f32 %v2983_v16, %v4457_v43  ;;  %v4458_v20 = vld [vmem:[#allocation54_spill] sm:$0xff] }
 0x1f5   :  { %4447 = vst [vmem:[#allocation64_spill] sm:$0xff] %v3370_v11  ;;  %v1106_v7 = vpop.permute.xlu2 %1105  ;;  %v4455_v11 = vld [vmem:[#allocation67_spill] sm:$0xff] }
 0x1f6   :  { %v1118_v37 = vmul.f32 %v3047_v63, %v1106_v7  ;;  %1302 = vperm.xlu1 %2300, %v2754_v60   ;;  %v4452_v60 = vld [vmem:[#allocation46_spill] sm:$0xff]  ;;  %v1579_v33 = vmul.f32 %v3142_v9, %v4455_v11  ;;  %v1072_v48 = vadd.f32 %v1064_v57, %v1007_v10 }
 0x1f7   :  { %1306 = vperm.xlu2 %2301, %v3194_v23   ;;  %v1531_v40 = vmul.f32 %v3071_v31, %v4452_v60 }
 0x1f8   :  { %v3388_v24 = vadd.f32 %v1118_v37, %v3301_v61  ;;  %v1486_v39 = vpop.permute.xlu0 %1485  ;;  %v987_v61 = vmul.f32 %v2995_v53, %v4454_v30 }
 0x1f9   :  { %v1515_v58 = vmul.f32 %v3064_v17, %v1486_v39  ;;  %v970_v39 = vmul.f32 %v2983_v16, %v4456_v41  ;;  %v1068_v41 = vmul.f32 %v3020_v29, %v3279_v19  ;;  %v1116_v19 = vmul.f32 %v3047_v63, %v3353_v56 }
 0x1fa   :  { %v1004_v56 = vmul.f32 %v3007_v44, %v2854_v59 }
 0x1fb   :  { %v1523_v7 = vadd.f32 %v1515_v58, %v1459_v0  ;;  %v1002_v0 = vmul.f32 %v3007_v44, %v4458_v20  ;;  %v1003_v58 = vmul.f32 %v3007_v44, %v2894_v51 }
 0x1fc   :  { %v1082_v37 = vpop.permute.xlu1 %1081 }
 0x1fd   :  { %v1539_v54 = vadd.f32 %v1531_v40, %v1523_v7  ;;  %v1112_v62 = vmul.f32 %v3047_v63, %v1082_v37  ;;  %v994_v7 = vadd.f32 %v986_v28, %v970_v39  ;;  %v995_v37 = vadd.f32 %v987_v61, %v971_v46 }
 0x1fe   :  { %v1134_v4 = vpop.permute.xlu2 %1133  ;;  %1310 = vperm.xlu1 %2300, %v3217_v52   ;;  %v1357_v28 = vmul.f32 %v2983_v16, %v2894_v51 }
 0x1ff   :  { %v1120_v11 = vadd.f32 %v1112_v62, %v1072_v48  ;;  %v1161_v57 = vmul.f32 %v3064_v17, %v1134_v4  ;;  %v1402_v40 = vmul.f32 %v3020_v29, %v1134_v4  ;;  %1314 = vperm.xlu2 %2301, %v3228_v32   ;;  %v3414_v10 = vadd.f32 %v1579_v33, %v1539_v54 }
 0x200   :  { %v1511_v35 = vpop.permute.xlu0 %1510  ;;  %v1067_v48 = vmul.f32 %v3020_v29, %v3261_v26  ;;  %v1011_v61 = vadd.f32 %v1003_v58, %v995_v37  ;;  %v1010_v54 = vadd.f32 %v1002_v0, %v994_v7  ;;  %v972_v58 = vmul.f32 %v2983_v16, %v2784_v8 }
 0x201   :  { %v1169_v62 = vadd.f32 %v1161_v57, %v3338_v22  ;;  %v3424_v4 = vadd.f32 %v1402_v40, %v3198_v36  ;;  %v1520_v33 = vmul.f32 %v3064_v17, %v1511_v35  ;;  %v1381_v22 = vadd.f32 %v1373_v42, %v1357_v28 }
 0x202   :  { %v1076_v39 = vadd.f32 %v1068_v41, %v1011_v61  ;;  %v988_v35 = vmul.f32 %v2995_v53, %v2817_v38  ;;  %v1075_v46 = vadd.f32 %v1067_v48, %v1010_v54  ;;  %v4461_v38 = vld [vmem:[#allocation68_spill] sm:$0xff]  ;;  %v1069_v37 = vmul.f32 %v3020_v29, %v3372_v14 }
 0x203   :  { %v3434_v26 = vadd.f32 %v1520_v33, %v3342_v49  ;;  %v1397_v55 = vadd.f32 %v1389_v34, %v1381_v22  ;;  %v4460_v49 = vmov 3  }
 0x204   :  { %v1094_v36 = vpop.permute.xlu1 %1093  ;;  %v1124_v40 = vadd.f32 %v1116_v19, %v1076_v39  ;;  %v996_v8 = vadd.f32 %v988_v35, %v972_v58 }
 0x205   :  { %4459 = vst [vmem:[#allocation58_spill] sm:$0xff] %v3434_v26  ;;  %v1115_v57 = vmul.f32 %v3047_v63, %v1094_v36  ;;  %v4462_v36 = vld [vmem:[#allocation71_spill] sm:$0xff]  ;;  %v4483_v26 = vld [vmem:[#allocation36_spill] sm:$0xff] }
 0x206   :  { %v1146_v0 = vpop.permute.xlu2 %1145  ;;  %2303 = vset.pattern.permute.xlu1 %v4460_v49  ;;  %v1012_v28 = vadd.f32 %v1004_v56, %v996_v8 }
 0x207   :  { %v1123_v42 = vadd.f32 %v1115_v57, %v1075_v46  ;;  %v1164_v41 = vmul.f32 %v3064_v17, %v1146_v0  ;;  %v1405_v7 = vmul.f32 %v3020_v29, %v1146_v0  ;;  %2304 = vset.pattern.permute.xlu2 %v4460_v49  ;;  %1418 = vperm.xlu1 %2303, %v2974_v47  }
 0x208   :  { %1422 = vperm.xlu2 %2304, %v4461_v38   ;;  %v1077_v34 = vadd.f32 %v1069_v37, %v1012_v28  ;;  %v2193_v28 = vld [vmem:[%s4279_s0 + $0xf1] sm:$0xf] }
 0x209   :  { %v3451_v48 = vadd.f32 %v1164_v41, %v1124_v40  ;;  %v3453_v33 = vadd.f32 %v1405_v7, %v1397_v55  ;;  %v4463_v55 = vld [vmem:[#allocation78_spill] sm:$0xff]  ;;  %v4465_v41 = vld [vmem:[#allocation80_spill] sm:$0xff] }
 0x20a   :  { %v4464_v40 = vld [vmem:[#allocation90_spill] sm:$0xff] }
 0x20b   :  { %v1372_v56 = vmul.f32 %v2995_v53, %v4464_v40 }
 0x20c   :  { %v1102_v61 = vpop.permute.xlu1 %1101 }
 0x20d   :  { %v1117_v19 = vmul.f32 %v3047_v63, %v1102_v61 }
 0x20e   :  { %v1154_v54 = vpop.permute.xlu2 %1153 }
 0x20f   :  { %v1125_v22 = vadd.f32 %v1117_v19, %v1077_v34  ;;  %v1166_v39 = vmul.f32 %v3064_v17, %v1154_v54  ;;  %v1407_v47 = vmul.f32 %v3020_v29, %v1154_v54  ;;  %1430 = vperm.xlu1 %2303, %v2990_v12   ;;  %v2194_v19 = vld [vmem:[%s4279_s0 + $0xf9] sm:$0xf] }
 0x210   :  { %1434 = vperm.xlu2 %2304, %v4462_v36  }
 0x211   :  { %v1174_v14 = vadd.f32 %v1166_v39, %v3388_v24  ;;  %v3462_v35 = vadd.f32 %v1407_v47, %v3234_v3  ;;  %v1356_v3 = vmul.f32 %v2983_v16, %v4458_v20  ;;  %v4466_v24 = vld [vmem:[#allocation94_spill] sm:$0xff]  ;;  %v4467_v39 = vmov 0  }
 0x212   :  { %v1388_v7 = vmul.f32 %v3007_v44, %v4466_v24 }
 0x213   :  { %v1380_v8 = vadd.f32 %v1372_v56, %v1356_v3  ;;  %v2196_v3 = vld [vmem:[%s4279_s0 + $0x109] sm:$0xf] }
 0x215   :  { %v3464_v46 = vpop.permute.xlu1 %1129  ;;  %v1396_v61 = vadd.f32 %v1388_v7, %v1380_v8 }
 0x216   :  { %v1160_v57 = vmul.f32 %v3064_v17, %v3464_v46 }
 0x217   :  { %v1193_v58 = vpop.permute.xlu2 %1192  ;;  %1438 = vperm.xlu1 %2303, %v4463_v55   ;;  %v4469_v55 = vld [vmem:[#allocation96_spill] sm:$0xff] }
 0x218   :  { %v1168_v0 = vadd.f32 %v1160_v57, %v1120_v11  ;;  %v1226_v12 = vmul.f32 %v3071_v31, %v1193_v58  ;;  %1442 = vperm.xlu2 %2304, %v4465_v41   ;;  %v1358_v58 = vmul.f32 %v2983_v16, %v2854_v59  ;;  %v1390_v56 = vmul.f32 %v3007_v44, %v4469_v55 }
 0x21a   :  { %v1234_v38 = vadd.f32 %v1226_v12, %v1169_v62  ;;  %v4468_v62 = vld [vmem:[#allocation91_spill] sm:$0xff] }
 0x21b   :  { %v1374_v47 = vmul.f32 %v2995_v53, %v4468_v62 }
 0x21d   :  { %v1142_v37 = vpop.permute.xlu1 %1141  ;;  %v1382_v12 = vadd.f32 %v1374_v47, %v1358_v58  ;;  %v2198_v47 = vld [vmem:[%s4279_s0 + $0x121] sm:$0xf] }
 0x21e   :  { %v1163_v11 = vmul.f32 %v3064_v17, %v1142_v37  ;;  %v1404_v34 = vmul.f32 %v3020_v29, %v1142_v37  ;;  %v2197_v37 = vld [vmem:[%s4279_s0 + $0x119] sm:$0xf] }
 0x21f   :  { %v3485_v54 = vpop.permute.xlu2 %1207  ;;  %2305 = vset.pattern.permute.xlu1 %v4467_v39  ;;  %v1398_v7 = vadd.f32 %v1390_v56, %v1382_v12  ;;  %v2199_v56 = vld [vmem:[%s4279_s0 + $0x129] sm:$0xf] }
 0x220   :  { %v1171_v36 = vadd.f32 %v1163_v11, %v1123_v42  ;;  %v3490_v57 = vadd.f32 %v1404_v34, %v1396_v61  ;;  %2306 = vset.pattern.permute.xlu2 %v4467_v39  ;;  %1475 = vperm.xlu1 %2305, %v2193_v28  }
 0x221   :  { %1480 = vperm.xlu2 %2306, %v2194_v19  }
 0x225   :  { %v1150_v41 = vpop.permute.xlu1 %1149 }
 0x226   :  { %v1165_v42 = vmul.f32 %v3064_v17, %v1150_v41  ;;  %v1406_v8 = vmul.f32 %v3020_v29, %v1150_v41 }
 0x227   :  { %v1218_v28 = vpop.permute.xlu2 %1217 }
 0x228   :  { %v1173_v61 = vadd.f32 %v1165_v42, %v1125_v22  ;;  %v3505_v11 = vadd.f32 %v1406_v8, %v1398_v7  ;;  %v1231_v34 = vmul.f32 %v3071_v31, %v1218_v28  ;;  %1490 = vperm.xlu1 %2305, %v2196_v3   ;;  %v2370_v28 = vmov 0.0  }
 0x229   :  { %1495 = vperm.xlu2 %2306, %v2197_v37   ;;  %1678 = vst [vmem:[#allocation2 + $0x20] sm:$0xff] %v2370_v28 }
 0x22a   :  { %v1239_v19 = vadd.f32 %v1231_v34, %v1174_v14  ;;  %1673 = vst [vmem:[#allocation2] sm:$0xff] %v2370_v28 }
 0x22b   :  { %1676 = vst [vmem:[#allocation2 + $0x10] sm:$0xff] %v2370_v28 }
 0x22c   :  { %1680 = vst [vmem:[#allocation2 + $0x30] sm:$0xff] %v2370_v28 }
 0x22d   :  { %1679 = vst.msk [vmem:[#allocation2 + $0x28] sm:$0xff] %vm1674_vm1, %v2370_v28 }
 0x22e   :  { %v1188_v58 = vpop.permute.xlu1 %1187  ;;  %1675 = vst.msk [vmem:[#allocation2 + $0x8] sm:$0xff] %vm1674_vm1, %v2370_v28 }
 0x22f   :  { %v1225_v12 = vmul.f32 %v3071_v31, %v1188_v58  ;;  %v3532_v58 = vpop.permute.xlu0 %1623  ;;  %1677 = vst.msk [vmem:[#allocation2 + $0x18] sm:$0xff] %vm1674_vm1, %v2370_v28 }
 0x230   :  { %v1247_v41 = vpop.permute.xlu2 %1246  ;;  %1500 = vperm.xlu1 %2305, %v2198_v47   ;;  %1681 = vst.msk [vmem:[#allocation2 + $0x38] sm:$0xff] %vm1674_vm1, %v2370_v28  ;;  %v3656_v28 = vld [vmem:[%s4280_s1 + $0x1] ss:$0 sm:$0xff] }
 0x231   :  { %v1233_v22 = vadd.f32 %v1225_v12, %v1168_v0  ;;  %v1274_v7 = vmul.f32 %v3142_v9, %v1247_v41  ;;  %1505 = vperm.xlu2 %2306, %v2199_v56  }
 0x233   :  { %v1282_v3 = vadd.f32 %v1274_v7, %v1234_v38 }
 0x236   :  { %v1203_v42 = vpop.permute.xlu1 %1202 }
 0x237   :  { %v1228_v14 = vmul.f32 %v3071_v31, %v1203_v42 }
 0x238   :  { %v1259_v8 = vpop.permute.xlu2 %1258  ;;  %2307 = vset.pattern.permute.xlu1 %v4460_v49 }
 0x239   :  { %v1236_v37 = vadd.f32 %v1228_v14, %v1171_v36  ;;  %2308 = vset.pattern.permute.xlu2 %v4460_v49  ;;  %1546 = vperm.xlu1 %2307, %v3159_v21   ;;  %v2206_v36 = vld [vmem:[%s4279_s0 + $0x39] sm:$0xf] }
 0x23a   :  { %1562 = vperm.xlu2 %2308, %v3194_v23  }
 0x23e   :  { %v1213_v0 = vpop.permute.xlu1 %1212 }
 0x23f   :  { %v1230_v38 = vmul.f32 %v3071_v31, %v1213_v0  ;;  %v2203_v0 = vld [vmem:[%s4279_s0 + $0x19] sm:$0xf] }
 0x240   :  { %v1267_v34 = vpop.permute.xlu2 %1266 }
 0x241   :  { %v1238_v21 = vadd.f32 %v1230_v38, %v1173_v61  ;;  %v1279_v23 = vmul.f32 %v3142_v9, %v1267_v34  ;;  %1566 = vperm.xlu1 %2307, %v3217_v52   ;;  %v3549_v38 = vpop.permute.xlu0 %1618  ;;  %v4471_v34 = vld [vmem:[#allocation69_spill] sm:$0xff] }
 0x242   :  { %2309 = vset.pattern.permute.xlu2 %v4467_v39 }
 0x243   :  { %v1287_v47 = vadd.f32 %v1279_v23, %v1239_v19  ;;  %1628 = vperm.xlu2 %2309, %v2206_v36   ;;  %v4470_v19 = vld [vmem:[#allocation60_spill] sm:$0xff] }
 0x244   :  { %v620_v42 = vmul.f32 %v2995_v53, %v4470_v19 }
 0x247   :  { %v1243_v56 = vpop.permute.xlu1 %1242 }
 0x248   :  { %v1273_v12 = vmul.f32 %v3142_v9, %v1243_v56 }
 0x249   :  { %v3535_v41 = vpop.permute.xlu2 %1294  ;;  %1570 = vperm.xlu1 %2307, %v3228_v32  }
 0x24a   :  { %v1281_v7 = vadd.f32 %v1273_v12, %v1233_v22  ;;  %v1322_v61 = vmul.f32 %v3185_v18, %v3535_v41  ;;  %v572_v22 = vmul.f32 %v2983_v16, %v2638_v45  ;;  %v1229_v45 = vmul.f32 %v3071_v31, %v3485_v54  ;;  %v4472_v12 = vld [vmem:[#allocation77_spill] sm:$0xff] }
 0x24b   :  { %2310 = vset.pattern.permute.xlu2 %v4460_v49 }
 0x24c   :  { %v3541_v52 = vadd.f32 %v1322_v61, %v1282_v3  ;;  %1550 = vperm.xlu2 %2310, %v3166_v27   ;;  %v684_v3 = vmul.f32 %v3007_v44, %v4471_v34  ;;  %v2207_v27 = vld [vmem:[%s4279_s0 + $0x41] sm:$0xf]  ;;  %v628_v23 = vadd.f32 %v620_v42, %v572_v22  ;;  %v700_v44 = vmul.f32 %v3020_v29, %v2741_v2  ;;  %v2202_v34 = vld [vmem:[%s4279_s0 + $0x11] sm:$0xf] }
 0x24d   :  { %v1277_v61 = vmul.f32 %v3142_v9, %v1259_v8  ;;  %v1237_v22 = vadd.f32 %v1229_v45, %v3451_v48  ;;  %v828_v45 = vmul.f32 %v3071_v31, %v2854_v59 }
 0x24e   :  { %v692_v56 = vadd.f32 %v684_v3, %v628_v23  ;;  %v2327_v3 = vld [vmem:[%s4279_s0 + $0x48] sm:$0xf] }
 0x24f   :  { %v1255_v14 = vpop.permute.xlu1 %1254 }
 0x250   :  { %v1276_v32 = vmul.f32 %v3142_v9, %v1255_v14  ;;  %v708_v14 = vadd.f32 %v700_v44, %v692_v56 }
 0x251   :  { %v3556_v36 = vpop.permute.xlu2 %1306  ;;  %2311 = vset.pattern.permute.xlu1 %v4467_v39 }
 0x252   :  { %v1284_v53 = vadd.f32 %v1276_v32, %v1236_v37  ;;  %1613 = vperm.xlu1 %2311, %v2203_v0   ;;  %v748_v37 = vmul.f32 %v3047_v63, %v4472_v12  ;;  %v4473_v0 = vld [vmem:[#allocation84_spill] sm:$0xff]  ;;  %v1325_v2 = vmul.f32 %v3185_v18, %v3556_v36  ;;  %v2208_v12 = vld [vmem:[%s4279_s0 + $0x49] sm:$0xf] }
 0x253   :  { %v812_v32 = vmul.f32 %v3064_v17, %v4473_v0 }
 0x254   :  { %2312 = vset.pattern.permute.xlu2 %v4467_v39  ;;  %v756_v48 = vadd.f32 %v748_v37, %v708_v14  ;;  %v940_v37 = vmul.f32 %v3185_v18, %v4469_v55 }
 0x255   :  { %1633 = vperm.xlu2 %2312, %v2207_v27   ;;  %v1285_v27 = vadd.f32 %v1277_v61, %v1237_v22 }
 0x257   :  { %v1263_v16 = vpop.permute.xlu1 %1262  ;;  %v1333_v56 = vadd.f32 %v1325_v2, %v1285_v27 }
 0x258   :  { %v1278_v19 = vmul.f32 %v3142_v9, %v1263_v16  ;;  %v1803_v42 = vpop.permute.xlu0 %1802 }
 0x259   :  { %1805 = vst.msk [vmem:[#allocation2 + $0x20] sm:$0xe] %vm1779_vm0, %v1803_v42  ;;  %v3574_v54 = vpop.permute.xlu2 %1314  ;;  %v3606_v61 = vadd.f32 %v3298_v15, %v1333_v56 }
 0x25a   :  { %v3579_v29 = vadd.f32 %v1278_v19, %v1238_v21  ;;  %v1327_v8 = vmul.f32 %v3185_v18, %v3574_v54  ;;  %2314 = vset.pattern.permute.xlu1 %v4460_v49  ;;  %v820_v21 = vadd.f32 %v812_v32, %v756_v48  ;;  %v876_v49 = vmul.f32 %v3142_v9, %v4468_v62  ;;  %v2201_v62 = vld [vmem:[%s4279_s0 + $0x9] sm:$0xf]  ;;  %s2371_s0 = smov 16  }
 0x25b   :  { %1574 = vperm.xlu1 %2314, %v2327_v3   ;;  %v4340_v32 = vmax.f32 %v3606_v61, 0.0 }
 0x25c   :  { %v3590_v23 = vadd.f32 %v1327_v8, %v1287_v47  ;;  %v836_v47 = vadd.f32 %v828_v45, %v820_v21 }
 0x25d   :  { %1608 = vperm.xlu2 %2312, %v2202_v34  }
 0x25e   :  { %v884_v14 = vadd.f32 %v876_v49, %v836_v47  ;;  %v1530_v49 = vmul.f32 %v3071_v31, %v3535_v41 }
 0x260   :  { %v3596_v44 = vpop.permute.xlu1 %1290  ;;  %v948_v55 = vadd.f32 %v940_v37, %v884_v14  ;;  %v3672_v14 = vld [vmem:[%s4280_s1 + $0x2] ss:$0 sm:$0xff] }
 0x261   :  { %v1321_v16 = vmul.f32 %v3185_v18, %v3596_v44 }
 0x262   :  { %v1423_v59 = vpop.permute.xlu2 %1422 }
 0x263   :  { %v3611_v19 = vadd.f32 %v1321_v16, %v1281_v7  ;;  %v1450_v42 = vmul.f32 %v3047_v63, %v1423_v59  ;;  %2315 = vset.pattern.permute.xlu1 %v4467_v39  ;;  %v3622_v7 = vadd.f32 %v3298_v15, %v948_v55  ;;  %v1728_v39 = vrot.slane %v4340_v32, 4  ;;  %v4477_v59 = vld [vmem:[#allocation88_spill] sm:$0xff]  ;;  %v4480_v32 = vld [vmem:[#allocation6_spill] sm:$0xff] }
 0x264   :  { %1638 = vperm.xlu1 %2315, %v2208_v12  }
 0x265   :  { %4474 = vst [vmem:[#allocation23_spill] sm:$0xff] %v3611_v19  ;;  %v1458_v0 = vadd.f32 %v1450_v42, %v3424_v4  ;;  %1603 = vperm.xlu2 %2312, %v2201_v62   ;;  %v4341_v4 = vmax.f32 %v3622_v7, 0.0  ;;  %v1369_v62 = vmul.f32 %v3656_v28, %v4477_v59  ;;  %v4482_v19 = vld [vmem:[#allocation31_spill] sm:$0xff] }
 0x267   :  { %v1807_v27 = vrot.slane %v4341_v4, 3  ;;  %v4481_v4 = vld [vmem:[#allocation24_spill] sm:$0xff] }
 0x268   :  { %v3617_v22 = vpop.permute.xlu1 %1302 }
 0x269   :  { %v1324_v2 = vmul.f32 %v3185_v18, %v3617_v22 }
 0x26a   :  { %v1435_v8 = vpop.permute.xlu2 %1434 }
 0x26b   :  { %v3626_v34 = vadd.f32 %v1324_v2, %v1284_v53  ;;  %v3679_v2 = vld [vmem:[%s4280_s1 + $0x4] ss:$0 sm:$0xff] }
 0x26c   :  { %1729 = vrot.lane.b32.xlu1 %v1728_v39, %s2371_s0  ;;  %v1453_v39 = vmul.f32 %v3679_v2, %v1435_v8 }
 0x26d   :  { %4475 = vst [vmem:[#allocation20_spill] sm:$0xff] %v3626_v34 }
 0x270   :  { %v3630_v3 = vpop.permute.xlu1 %1310 }
 0x272   :  { %v1443_v48 = vpop.permute.xlu2 %1442 }
 0x273   :  { %v1455_v21 = vmul.f32 %v3047_v63, %v1443_v48 }
 0x274   :  { %1808 = vrot.lane.b32.xlu1 %v1807_v27, %s2368_s24  ;;  %v4479_v27 = vld [vmem:[#allocation16_spill] sm:$0xff] }
 0x275   :  { %v1463_v56 = vadd.f32 %v1455_v21, %v3462_v35  ;;  %v4476_v35 = vmax.f32 %v3306_v13, 0.0  ;;  %v3665_v13 = vld [vmem:[%s4280_s1] ss:$0 sm:$0xff]  ;;  %v130_v21 = vmul.f32 %v3656_v28, %v4479_v27  ;;  %v1461_v27 = vadd.f32 %v1453_v39, %v3453_v33 }
 0x276   :  { %v1353_v41 = vmul.f32 %v3665_v13, %v4451_v6  ;;  %v77_v8 = vmul.f32 %v3665_v13, %v4480_v32 }
 0x278   :  { %v138_v6 = vadd.f32 %v130_v21, %v77_v8 }
 0x279   :  { %v1419_v53 = vpop.permute.xlu1 %1418 }
 0x27a   :  { %v1449_v59 = vmul.f32 %v3679_v2, %v1419_v53 }
 0x27b   :  { %v1481_v45 = vpop.permute.xlu2 %1480 }
 0x27c   :  { %v1514_v63 = vmul.f32 %v3064_v17, %v1481_v45  ;;  %1890 = vrot.lane.b32.xlu1 %v4476_v35, %s2372_s29  ;;  %v3688_v35 = vld [vmem:[%s4280_s1 + $0x3] ss:$0 sm:$0xff] }
 0x27e   :  { %v1522_v16 = vadd.f32 %v1514_v63, %v1458_v0  ;;  %v4478_v0 = vld [vmem:[#allocation93_spill] sm:$0xff]  ;;  %v1377_v63 = vadd.f32 %v1369_v62, %v1353_v41 }
 0x27f   :  { %v1385_v55 = vmul.f32 %v3672_v14, %v4478_v0  ;;  %v183_v0 = vmul.f32 %v3672_v14, %v4481_v4  ;;  %v306_v4 = vmul.f32 %v3679_v2, %v4483_v26 }
 0x280   :  { %v3651_v12 = vadd.f32 %v1530_v49, %v1522_v16  ;;  %v1401_v49 = vmul.f32 %v3688_v35, %v3464_v46  ;;  %v253_v46 = vmul.f32 %v3688_v35, %v4482_v19  ;;  %v3717_v19 = vld [vmem:[%s4280_s1 + $0x5] ss:$0 sm:$0xff] }
 0x281   :  { %v1431_v47 = vpop.permute.xlu1 %1430  ;;  %v1393_v41 = vadd.f32 %v1385_v55, %v1377_v63  ;;  %v191_v34 = vadd.f32 %v183_v0, %v138_v6  ;;  %v359_v26 = vmul.f32 %v3717_v19, %v2776_v5 }
 0x282   :  { %v1452_v5 = vmul.f32 %v3679_v2, %v1431_v47 }
 0x283   :  { %v1496_v37 = vpop.permute.xlu2 %1495 }
 0x284   :  { %v1517_v16 = vmul.f32 %v3064_v17, %v1496_v37  ;;  %v1409_v37 = vadd.f32 %v1401_v49, %v1393_v41  ;;  %v482_v49 = vmul.f32 %v3142_v9, %v4454_v30  ;;  %v1460_v41 = vadd.f32 %v1452_v5, %v3490_v57 }
 0x286   :  { %v1525_v32 = vadd.f32 %v1517_v16, %v1461_v27 }
 0x289   :  { %v3660_v42 = vpop.permute.xlu1 %1438 }
 0x28b   :  { %v1506_v48 = vpop.permute.xlu2 %1505 }
 0x28c   :  { %v1519_v45 = vmul.f32 %v3064_v17, %v1506_v48  ;;  %v1535_v48 = vmul.f32 %v3071_v31, %v3574_v54  ;;  %v3710_v31 = vld [vmem:[%s4280_s1 + $0x6] ss:$0 sm:$0xff]  ;;  %v1457_v54 = vadd.f32 %v1449_v59, %v1409_v37 }
 0x28d   :  { %v1533_v33 = vmul.f32 %v3710_v31, %v3556_v36  ;;  %v1529_v0 = vmul.f32 %v3710_v31, %v3596_v44  ;;  %v429_v21 = vmul.f32 %v3710_v31, %v4457_v43  ;;  %v535_v43 = vmul.f32 %v3185_v18, %v2894_v51 }
 0x28e   :  { %v1527_v62 = vadd.f32 %v1519_v45, %v1463_v56  ;;  %v261_v56 = vadd.f32 %v253_v46, %v191_v34  ;;  %v1326_v45 = vmul.f32 %v3185_v18, %v3630_v3  ;;  %v1532_v46 = vmul.f32 %v3710_v31, %v3617_v22 }
 0x28f   :  { %v1541_v39 = vadd.f32 %v1533_v33, %v1525_v32 }
 0x290   :  { %v3703_v17 = vadd.f32 %v1535_v48, %v1527_v62  ;;  %v314_v59 = vadd.f32 %v306_v4, %v261_v56  ;;  %v1334_v48 = vadd.f32 %v1326_v45, %v3579_v29  ;;  %v4484_v4 = vld [vmem:[#allocation70_spill] sm:$0xff]  ;;  %v1454_v45 = vmul.f32 %v3679_v2, %v3660_v42  ;;  %v4486_v42 = vld [vmem:[#allocation9_spill] sm:$0xff] }
 0x291   :  { %v1580_v51 = vmul.f32 %v3142_v9, %v4484_v4  ;;  %v4490_v4 = vld [vmem:[#allocation13_spill] sm:$0xff] }
 0x292   :  { %v1476_v24 = vpop.permute.xlu1 %1475  ;;  %v367_v44 = vadd.f32 %v359_v26, %v314_v59  ;;  %v1342_v29 = vadd.f32 %v3298_v15, %v1334_v48  ;;  %v1644_v26 = vmul.f32 %v3185_v18, %v3549_v38  ;;  %v4487_v48 = vld [vmem:[#allocation10_spill] sm:$0xff] }
 0x293   :  { %v1513_v6 = vmul.f32 %v3717_v19, %v1476_v24  ;;  %v1645_v24 = vmul.f32 %v3185_v18, %v3532_v58 }
 0x294   :  { %v1563_v53 = vpop.permute.xlu2 %1562  ;;  %v437_v8 = vadd.f32 %v429_v21, %v367_v44  ;;  %v4485_v44 = vld [vmem:[#allocation25_spill] sm:$0xff] }
 0x295   :  { %v1521_v55 = vadd.f32 %v1513_v6, %v1457_v54  ;;  %v1581_v36 = vmul.f32 %v3142_v9, %v1563_v53  ;;  %v1350_v53 = vmax.f32 %v1342_v29, 0.0  ;;  %v4491_v29 = vld [vmem:[#allocation14_spill] sm:$0xff] }
 0x296   :  { %v490_v27 = vadd.f32 %v482_v49, %v437_v8  ;;  %v1462_v8 = vadd.f32 %v1454_v45, %v3505_v11  ;;  %v3790_v11 = vld [vmem:[%s4280_s1 + $0x8] ss:$0 sm:$0xff]  ;;  %v4495_v45 = vld [vmem:[#allocation21_spill] sm:$0xff] }
 0x297   :  { %v1589_v34 = vadd.f32 %v1581_v36, %v1541_v39  ;;  %v3732_v63 = vadd.f32 %v1529_v0, %v1521_v55  ;;  %v1977_v38 = vrot.slane %v1350_v53, 4 }
 0x298   :  { %v543_v33 = vadd.f32 %v535_v43, %v490_v27  ;;  %v129_v43 = vmul.f32 %v3656_v28, %v4486_v42 }
 0x299   :  { %v1653_v16 = vadd.f32 %v1645_v24, %v1589_v34  ;;  %v3769_v34 = vld [vmem:[%s4280_s1 + $0x7] ss:$0 sm:$0xff] }
 0x29a   :  { %v1491_v62 = vpop.permute.xlu1 %1490  ;;  %v555_v55 = vadd.f32 %v3298_v15, %v543_v33  ;;  %v1275_v49 = vmul.f32 %v3769_v34, %v4485_v44  ;;  %v182_v33 = vmul.f32 %v3672_v14, %v4491_v29  ;;  %v4496_v44 = vld [vmem:[#allocation75_spill] sm:$0xff] }
 0x29b   :  { %v1661_v58 = vadd.f32 %v3298_v15, %v1653_v16  ;;  %v1516_v47 = vmul.f32 %v3717_v19, %v1491_v62  ;;  %v2035_v16 = vld [vmem:[%s4282_s3 + $0x88] sm:$0xff]  ;;  %v76_v62 = vmul.f32 %v3665_v13, %v4487_v48 }
 0x29c   :  { %v563_v59 = vmax.f32 %v555_v55, 0.0  ;;  %2095 = vmatpush.msra.mxu1 %v2035_v16 }
 0x29d   :  { %v1669_v30 = vmax.f32 %v1661_v58, 0.0  ;;  %v1524_v37 = vadd.f32 %v1516_v47, %v1460_v41  ;;  %v1629_v32 = vpop.permute.xlu2 %1628  ;;  %v1283_v41 = vadd.f32 %v1275_v49, %v3374_v1  ;;  %v4488_v47 = vmax.f32 %v3622_v7, 0.0  ;;  %v4489_v1 = vld [vmem:[#allocation8_spill] sm:$0xff] }
 0x29e   :  { %v75_v7 = vmul.f32 %v3665_v13, %v4489_v1  ;;  %v681_v49 = vmul.f32 %v3672_v14, %v4496_v44 }
 0x29f   :  { %2002 = vst.msk [vmem:[#allocation2 + $0x28] sm:$0xf] %vm1992_vm2, %v1669_v30  ;;  %v1540_v57 = vadd.f32 %v1532_v46, %v1524_v37  ;;  %v1931_v54 = vrot.slane %v1669_v30, 7  ;;  %v1760_v6 = vrot.slane %v1669_v30, 4  ;;  %v1697_v56 = vrot.slane %v1669_v30, 3  ;;  %v2034_v46 = vld [vmem:[%s4282_s3 + $0x80] sm:$0xff] }
 0x2a0   :  { %v1894_v27 = vrot.slane %v4488_v47, 4  ;;  %2096 = vmatpush.msra.mxu1 %v2034_v46  ;;  %v1323_v37 = vmul.f32 %v3790_v11, %v4452_v60 }
 0x2a1   :  { %v1588_v22 = vadd.f32 %v1580_v51, %v1540_v57  ;;  %1932 = vrot.lane.b32.xlu0 %v1931_v54, %s2373_s19  ;;  %1761 = vrot.lane.b32.xlu2 %v1760_v6, %s2374_s20  ;;  %1699 = vst.msk [vmem:[#allocation2 + $0x20] sm:$0xe0] %vm1685_vm3, %v1697_v56  ;;  %v128_v51 = vmul.f32 %v3656_v28, %v4490_v4  ;;  %v4492_v6 = vld [vmem:[#allocation59_spill] sm:$0xff]  ;;  %v4493_v56 = vld [vmem:[#allocation65_spill] sm:$0xff]  ;;  %v4500_v4 = vld [vmem:[#allocation30_spill] sm:$0xff] }
 0x2a2   :  { %v1501_v9 = vpop.permute.xlu1 %1500  ;;  %v1534_v57 = vmul.f32 %v3710_v31, %v3630_v3  ;;  %v137_v54 = vadd.f32 %v129_v43, %v76_v62  ;;  %v618_v60 = vmul.f32 %v3656_v28, %v4492_v6  ;;  %v570_v3 = vmul.f32 %v3665_v13, %v4491_v29  ;;  %v4498_v43 = vld [vmem:[#allocation22_spill] sm:$0xff]  ;;  %v4501_v29 = vld [vmem:[#allocation35_spill] sm:$0xff] }
 0x2a3   :  { %v1652_v0 = vadd.f32 %v1644_v26, %v1588_v22  ;;  %v1518_v5 = vmul.f32 %v3717_v19, %v1501_v9  ;;  %v617_v26 = vmul.f32 %v3656_v28, %v4493_v56  ;;  %v1331_v9 = vadd.f32 %v1323_v37, %v1283_v41  ;;  %v4499_v62 = vld [vmem:[#allocation26_spill] sm:$0xff] }
 0x2a4   :  { %v3821_v16 = vadd.f32 %v128_v51, %v75_v7  ;;  %v3829_v48 = vmul.f32 %v3688_v35, %v4498_v43  ;;  %v574_v41 = vmul.f32 %v3665_v13, %v4499_v62  ;;  %v3840_v51 = vmul.f32 %v3679_v2, %v4500_v4  ;;  %v4507_v43 = vld [vmem:[#allocation89_spill] sm:$0xff] }
 0x2a5   :  { %v3755_v39 = vadd.f32 %v3298_v15, %v1652_v0  ;;  %v1526_v30 = vadd.f32 %v1518_v5, %v1462_v8  ;;  %v569_v5 = vmul.f32 %v3665_v13, %v4495_v45  ;;  %v3834_v46 = vadd.f32 %v3298_v15, %v1331_v9 }
 0x2a6   :  { %v1551_v36 = vpop.permute.xlu2 %1550  ;;  %v4503_v56 = vmax.f32 %v3606_v61, 0.0 }
 0x2a7   :  { %v1668_v18 = vmax.f32 %v3755_v39, 0.0  ;;  %v1578_v0 = vmul.f32 %v3769_v34, %v1551_v36  ;;  %v1542_v55 = vadd.f32 %v1534_v57, %v1526_v30  ;;  %v4497_v36 = vld [vmem:[#allocation66_spill] sm:$0xff]  ;;  %v625_v47 = vadd.f32 %v617_v26, %v569_v5  ;;  %v4502_v57 = vld [vmem:[#allocation72_spill] sm:$0xff] }
 0x2a8   :  { %v682_v8 = vmul.f32 %v3672_v14, %v4497_v36  ;;  %v626_v30 = vadd.f32 %v618_v60, %v570_v3  ;;  %v4504_v60 = vld [vmem:[#allocation41_spill] sm:$0xff]  ;;  %v1347_v5 = vmax.f32 %v3834_v46, 0.0  ;;  %v4550_v46 = vld [vmem:[#allocation52_spill] sm:$0xff] }
 0x2a9   :  { %v1999_v21 = vrot.slane %v1668_v18, 4  ;;  %1978 = vrot.lane.b32.xlu0 %v1977_v38, %s2375_s21  ;;  %1849 = vrot.lane.b32.xlu2 %v563_v59, %s2369_s25  ;;  %v4494_v59 = vld [vmem:[#allocation11_spill] sm:$0xff]  ;;  %v1586_v37 = vadd.f32 %v1578_v0, %v3651_v12  ;;  %v689_v6 = vadd.f32 %v681_v49, %v625_v47  ;;  %v697_v12 = vmul.f32 %v3688_v35, %v4504_v60 }
 0x2aa   :  { %v690_v26 = vadd.f32 %v682_v8, %v626_v30  ;;  %v809_v47 = vmul.f32 %v3717_v19, %v4507_v43 }
 0x2ab   :  { %v1547_v24 = vpop.permute.xlu1 %1546  ;;  %2001 = vst.msk [vmem:[#allocation2 + $0x18] sm:$0xf0] %vm1996_vm4, %v1999_v21  ;;  %v3813_v21 = vmul.f32 %v3665_v13, %v4494_v59 }
 0x2ac   :  { %v1577_v59 = vmul.f32 %v3769_v34, %v1547_v24 }
 0x2ae   :  { %v1585_v4 = vadd.f32 %v1577_v59, %v3732_v63 }
 0x2af   :  { %v1634_v58 = vpop.permute.xlu2 %1633 }
 0x2b0   :  { %v1647_v61 = vmul.f32 %v3790_v11, %v1634_v58 }
 0x2b1   :  { %1734 = vrot.lane.b32.xlu0 %v1350_v53, %s2371_s0  ;;  %1895 = vrot.lane.b32.xlu2 %v1894_v27, %s2372_s29  ;;  %v1646_v53 = vmul.f32 %v3790_v11, %v1629_v32  ;;  %v3823_v32 = vadd.f32 %v182_v33, %v137_v54  ;;  %v698_v33 = vmul.f32 %v3688_v35, %v4501_v29 }
 0x2b2   :  { %v622_v54 = vmul.f32 %v3656_v28, %v4502_v57 }
 0x2b3   :  { %v1567_v22 = vpop.permute.xlu1 %1566 }
 0x2b4   :  { %v1582_v38 = vmul.f32 %v3769_v34, %v1567_v22  ;;  %v630_v8 = vadd.f32 %v622_v54, %v574_v41 }
 0x2b6   :  { %v1590_v42 = vadd.f32 %v1582_v38, %v1542_v55  ;;  %v4506_v55 = vld [vmem:[#allocation82_spill] sm:$0xff] }
 0x2b7   :  { %v1609_v27 = vpop.permute.xlu2 %1608  ;;  %v745_v38 = vmul.f32 %v3679_v2, %v4506_v55 }
 0x2b8   :  { %v1654_v1 = vadd.f32 %v1646_v53, %v1590_v42  ;;  %v1642_v7 = vmul.f32 %v3790_v11, %v1609_v27  ;;  %v4505_v53 = vld [vmem:[#allocation79_spill] sm:$0xff]  ;;  %v705_v42 = vadd.f32 %v697_v12, %v689_v6  ;;  %v4509_v12 = vld [vmem:[#allocation86_spill] sm:$0xff] }
 0x2b9   :  { %1973 = vrot.lane.b32.xlu2 %v4503_v56, %s2375_s21  ;;  %v686_v0 = vmul.f32 %v3672_v14, %v4505_v53  ;;  %v825_v53 = vmul.f32 %v3710_v31, %v4443_v50 }
 0x2ba   :  { %v1662_v22 = vadd.f32 %v3298_v15, %v1654_v1  ;;  %v1650_v9 = vadd.f32 %v1642_v7, %v1586_v37  ;;  %v753_v1 = vadd.f32 %v745_v38, %v705_v42  ;;  %v4511_v42 = vld [vmem:[#allocation83_spill] sm:$0xff] }
 0x2bb   :  { %v1571_v3 = vpop.permute.xlu1 %1570  ;;  %v694_v37 = vadd.f32 %v686_v0, %v630_v8  ;;  %v3890_v0 = vld [vmem:[%s4281_s2] ss:$0 sm:$0xff]  ;;  %v873_v8 = vmul.f32 %v3769_v34, %v3161_v25  ;;  %v810_v43 = vmul.f32 %v3717_v19, %v4511_v42 }
 0x2bc   :  { %v3859_v44 = vmax.f32 %v1662_v22, 0.0  ;;  %v1658_v49 = vadd.f32 %v3298_v15, %v1650_v9  ;;  %v1583_v36 = vmul.f32 %v3769_v34, %v1571_v3  ;;  %v1722_v15 = vrot.slane %v1347_v5, 4 }
 0x2bd   :  { %v750_v22 = vmul.f32 %v3679_v2, %v4509_v12  ;;  %v817_v9 = vadd.f32 %v809_v47, %v753_v1  ;;  %v3894_v55 = vadd.f32 %v3890_v0, %v3541_v52  ;;  %v706_v3 = vadd.f32 %v698_v33, %v690_v26  ;;  %v4512_v52 = vld [vmem:[#allocation92_spill] sm:$0xff]  ;;  %v4513_v1 = vld [vmem:[#allocation99_spill] sm:$0xff]  ;;  %v4514_v12 = vld [vmem:[#allocation18_spill] sm:$0xff] }
 0x2be   :  { %v2003_v27 = vrot.slane %v3859_v44, 4  ;;  %v3866_v24 = vmax.f32 %v1658_v49, 0.0  ;;  %v1591_v30 = vadd.f32 %v1583_v36, %v3703_v17  ;;  %v1936_v58 = vrot.slane %v3859_v44, 3  ;;  %v4508_v17 = vld [vmem:[#allocation44_spill] sm:$0xff] }
 0x2bf   :  { %v1604_v7 = vpop.permute.xlu2 %1603  ;;  %v1701_v41 = vrot.slane %v3859_v44, 7  ;;  %v702_v56 = vmul.f32 %v3688_v35, %v4508_v17  ;;  %v814_v47 = vmul.f32 %v3717_v19, %v4512_v52  ;;  %v4518_v52 = vld [vmem:[#allocation48_spill] sm:$0xff] }
 0x2c0   :  { %2005 = vst.msk [vmem:[#allocation2 + $0x28] sm:$0xf0] %vm1996_vm4, %v2003_v27  ;;  %v1994_v57 = vrot.slane %v3866_v24, 4  ;;  %v1655_v54 = vadd.f32 %v1647_v61, %v1591_v30  ;;  %v1641_v6 = vmul.f32 %v3790_v11, %v1604_v7  ;;  %1937 = vrot.lane.b32.xlu1 %v1936_v58, %s2373_s19  ;;  %v1688_v63 = vrot.slane %v3866_v24, 7  ;;  %v4510_v61 = vld [vmem:[#allocation76_spill] sm:$0xff] }
 0x2c1   :  { %1723 = vrot.lane.b32.xlu2 %v1722_v15, %s2371_s0  ;;  %1703 = vst.msk [vmem:[#allocation2 + $0x30] sm:$0xe] %vm1690_vm5, %v1701_v41  ;;  %v746_v49 = vmul.f32 %v3679_v2, %v4510_v61  ;;  %v710_v36 = vadd.f32 %v702_v56, %v694_v37  ;;  %v833_v58 = vadd.f32 %v825_v53, %v817_v9  ;;  %v1346_v7 = vmax.f32 %v3894_v55, 0.0 }
 0x2c2   :  { %1997 = vst.msk [vmem:[#allocation2 + $0x8] sm:$0xf0] %vm1996_vm4, %v1994_v57  ;;  %v1663_v38 = vadd.f32 %v3890_v0, %v1655_v54  ;;  %v1649_v59 = vadd.f32 %v1641_v6, %v1585_v4  ;;  %v937_v37 = vmul.f32 %v3790_v11, %v4513_v1  ;;  %v3916_v15 = vadd.f32 %v3890_v0, %v3590_v23 }
 0x2c3   :  { %1691 = vst.msk [vmem:[#allocation2 + $0x10] sm:$0xe] %vm1690_vm5, %v1688_v63  ;;  %v758_v26 = vadd.f32 %v750_v22, %v710_v36  ;;  %v260_v57 = vadd.f32 %v3829_v48, %v3823_v32  ;;  %v358_v54 = vmul.f32 %v3717_v19, %v4501_v29  ;;  %v881_v6 = vadd.f32 %v873_v8, %v833_v58  ;;  %v4517_v36 = vld [vmem:[#allocation97_spill] sm:$0xff] }
 0x2c4   :  { %v3907_v27 = vmax.f32 %v1663_v38, 0.0  ;;  %v1657_v30 = vadd.f32 %v3890_v0, %v1649_v59  ;;  %v1614_v33 = vpop.permute.xlu1 %1613  ;;  %v133_v23 = vmul.f32 %v3656_v28, %v4514_v12  ;;  %v754_v22 = vadd.f32 %v746_v49, %v706_v3  ;;  %v4516_v59 = vld [vmem:[#allocation62_spill] sm:$0xff] }
 0x2c5   :  { %v1643_v25 = vmul.f32 %v3790_v11, %v1614_v33  ;;  %v822_v9 = vadd.f32 %v814_v47, %v758_v26  ;;  %v313_v48 = vadd.f32 %v3840_v51, %v260_v57  ;;  %v945_v29 = vadd.f32 %v937_v37, %v881_v6  ;;  %v4521_v12 = vld [vmem:[#allocation98_spill] sm:$0xff] }
 0x2c6   :  { %2006 = vst.msk [vmem:[#allocation2 + $0x38] sm:$0xf] %vm1992_vm2, %v3907_v27  ;;  %v3920_v41 = vmax.f32 %v1657_v30, 0.0  ;;  %v1705_v4 = vrot.slane %v3907_v27, 3  ;;  %v818_v38 = vadd.f32 %v810_v43, %v754_v22  ;;  %v830_v3 = vmul.f32 %v3710_v31, %v4516_v59 }
 0x2c7   :  { %v1651_v56 = vadd.f32 %v1643_v25, %v3414_v10  ;;  %v4515_v10 = vld [vmem:[#allocation42_spill] sm:$0xff]  ;;  %v1351_v61 = vmax.f32 %v3916_v15, 0.0  ;;  %v181_v51 = vmul.f32 %v3672_v14, %v4495_v45  ;;  %v366_v49 = vadd.f32 %v358_v54, %v313_v48  ;;  %v4519_v45 = vld [vmem:[#allocation100_spill] sm:$0xff] }
 0x2c8   :  { %1993 = vst.msk [vmem:[#allocation2 + $0x8] sm:$0xf] %vm1992_vm2, %v3920_v41  ;;  %1716 = vrot.lane.b32.xlu1 %v1346_v7, %s2371_s0  ;;  %v1683_v32 = vrot.slane %v3920_v41, 3  ;;  %v428_v53 = vmul.f32 %v3710_v31, %v4515_v10  ;;  %v878_v8 = vmul.f32 %v3769_v34, %v4517_v36  ;;  %v481_v47 = vmul.f32 %v3769_v34, %v4518_v52  ;;  %v4520_v54 = vld [vmem:[#allocation94_spill] sm:$0xff] }
 0x2c9   :  { %v1659_v63 = vadd.f32 %v3890_v0, %v1651_v56  ;;  %1750 = vrot.lane.b32.xlu2 %v3866_v24, %s2374_s20  ;;  %1707 = vst.msk [vmem:[#allocation2 + $0x30] sm:$0xe0] %vm1685_vm3, %v1705_v4  ;;  %v826_v43 = vmul.f32 %v3710_v31, %v4458_v20  ;;  %v874_v30 = vmul.f32 %v3769_v34, %v4464_v40  ;;  %v1739_v6 = vrot.slane %v1351_v61, 4  ;;  %v4524_v52 = vld [vmem:[#allocation34_spill] sm:$0xff] }
 0x2ca   :  { %1686 = vst.msk [vmem:[#allocation2] sm:$0xe0] %vm1685_vm3, %v1683_v32  ;;  %v838_v33 = vadd.f32 %v830_v3, %v822_v9  ;;  %v3960_v26 = vadd.f32 %v3890_v0, %v945_v29  ;;  %v942_v58 = vmul.f32 %v3790_v11, %v4519_v45  ;;  %v436_v4 = vadd.f32 %v428_v53, %v366_v49  ;;  %v2022_v15 = vld [vmem:[%s4282_s3 + $0x20] sm:$0xff] }
 0x2cb   :  { %v3951_v42 = vmax.f32 %v1659_v63, 0.0  ;;  %v834_v57 = vadd.f32 %v826_v43, %v818_v38  ;;  %v938_v40 = vmul.f32 %v3790_v11, %v4520_v54  ;;  %v534_v56 = vmul.f32 %v3790_v11, %v4458_v20  ;;  %v4522_v63 = vld [vmem:[#allocation29_spill] sm:$0xff] }
 0x2cc   :  { %v3976_v22 = vadd.f32 %v3890_v0, %v4521_v12  ;;  %v886_v9 = vadd.f32 %v878_v8, %v838_v33  ;;  %v1769_v48 = vrot.slane %v3907_v27, 4  ;;  %v186_v29 = vmul.f32 %v3672_v14, %v4499_v62  ;;  %v4523_v8 = vld [vmem:[#allocation32_spill] sm:$0xff]  ;;  %v4525_v33 = vld [vmem:[#allocation49_spill] sm:$0xff] }
 0x2cd   :  { %1998 = vst.msk [vmem:[#allocation2 + $0x18] sm:$0xf] %vm1992_vm2, %v3951_v42  ;;  %v1575_v1 = vpop.permute.xlu1 %1574  ;;  %v1755_v37 = vrot.slane %v3951_v42, 4  ;;  %v1693_v25 = vrot.slane %v3951_v42, 3  ;;  %v251_v10 = vmul.f32 %v3688_v35, %v4522_v63  ;;  %v882_v53 = vadd.f32 %v874_v30, %v834_v57 }
 0x2ce   :  { %v141_v20 = vadd.f32 %v133_v23, %v3813_v21  ;;  %v489_v38 = vadd.f32 %v481_v47, %v436_v4  ;;  %v961_v3 = vmax.f32 %v3960_v26, 0.0  ;;  %v950_v49 = vadd.f32 %v942_v58, %v886_v9  ;;  %v4526_v58 = vld [vmem:[#allocation17_spill] sm:$0xff]  ;;  %v4527_v4 = vld [vmem:[#allocation38_spill] sm:$0xff]  ;;  %v4529_v9 = vld [vmem:[#allocation47_spill] sm:$0xff] }
 0x2cf   :  { %1756 = vrot.lane.b32.xlu0 %v1755_v37, %s2374_s20  ;;  %v2011_v32 = vld [vmem:[#allocation2 + $0x8] sm:$0xff]  ;;  %1695 = vst.msk [vmem:[#allocation2 + $0x10] sm:$0xe0] %vm1685_vm3, %v1693_v25  ;;  %v189_v36 = vadd.f32 %v181_v51, %v3821_v16  ;;  %v256_v62 = vmul.f32 %v3688_v35, %v4523_v8  ;;  %v304_v43 = vmul.f32 %v3679_v2, %v4524_v52  ;;  %v965_v21 = vmax.f32 %v3976_v22, 0.0  ;;  %v4537_v26 = vld [vmem:[#allocation12_spill] sm:$0xff] }
 0x2d0   :  { %2209 = vmatmul.msk.f32.vlgmr.msra.gmra.mxu1 %vm1674_vm1, %v2011_v32  ;;  %1740 = vrot.lane.b32.xlu1 %v1739_v6, %s2371_s0  ;;  %v946_v30 = vadd.f32 %v938_v40, %v882_v53  ;;  %v1536_v45 = vmul.f32 %v3710_v31, %v4525_v33  ;;  %v1584_v23 = vmul.f32 %v3769_v34, %v1575_v1  ;;  %v4528_v40 = vld [vmem:[#allocation58_spill] sm:$0xff]  ;;  %v1789_v1 = vrot.slane %v961_v3, 7  ;;  %v4531_v52 = vld [vmem:[#allocation87_spill] sm:$0xff] }
 0x2d1   :  { %1770 = vrot.lane.b32.xlu2 %v1769_v48, %s2374_s20  ;;  %v542_v47 = vadd.f32 %v534_v56, %v489_v38  ;;  %v484_v37 = vmul.f32 %v3769_v34, %v4526_v58  ;;  %v194_v25 = vadd.f32 %v186_v29, %v141_v20  ;;  %v259_v16 = vadd.f32 %v251_v10, %v189_v36  ;;  %v4530_v36 = vld [vmem:[#allocation53_spill] sm:$0xff] }
 0x2d2   :  { %v357_v51 = vmul.f32 %v3717_v19, %v4504_v60  ;;  %v309_v57 = vmul.f32 %v3679_v2, %v4527_v4  ;;  %v4006_v54 = vadd.f32 %v3890_v0, %v950_v49  ;;  %v1544_v6 = vadd.f32 %v1536_v45, %v4528_v40 }
 0x2d3   :  { %v264_v56 = vadd.f32 %v256_v62, %v194_v25  ;;  %v312_v12 = vadd.f32 %v304_v43, %v259_v16  ;;  %v427_v32 = vmul.f32 %v3710_v31, %v4529_v9  ;;  %v954_v48 = vadd.f32 %v3890_v0, %v946_v30  ;;  %v4533_v16 = vld [vmem:[#allocation40_spill] sm:$0xff] }
 0x2d4   :  { %v1592_v60 = vadd.f32 %v1584_v23, %v1544_v6  ;;  %v2013_v10 = vld [vmem:[#allocation2 + $0x18] sm:$0xff]  ;;  %v1813_v53 = vrot.slane %v965_v21, 7  ;;  %v554_v20 = vadd.f32 %v3890_v0, %v542_v47  ;;  %v362_v49 = vmul.f32 %v3717_v19, %v4508_v17  ;;  %v4532_v47 = vld [vmem:[#allocation51_spill] sm:$0xff] }
 0x2d5   :  { %v365_v38 = vadd.f32 %v357_v51, %v312_v12  ;;  %v480_v8 = vmul.f32 %v3769_v34, %v4530_v36  ;;  %v317_v62 = vadd.f32 %v309_v57, %v264_v56  ;;  %v492_v43 = vadd.f32 %v484_v37, %v4531_v52  ;;  %v4535_v52 = vld [vmem:[#allocation73_spill] sm:$0xff] }
 0x2d6   :  { %v1639_v29 = vpop.permute.xlu1 %1638  ;;  %v966_v30 = vmax.f32 %v4006_v54, 0.0  ;;  %v432_v17 = vmul.f32 %v3710_v31, %v4532_v47  ;;  %v533_v58 = vmul.f32 %v3790_v11, %v4443_v50  ;;  %v962_v25 = vmax.f32 %v954_v48, 0.0  ;;  %v4534_v54 = vld [vmem:[#allocation56_spill] sm:$0xff]  ;;  %v4536_v47 = vld [vmem:[#allocation7_spill] sm:$0xff] }
 0x2d7   :  { %v1648_v63 = vmul.f32 %v3790_v11, %v1639_v29  ;;  %1790 = vrot.lane.b32.xlu0 %v1789_v1, %s2368_s24  ;;  %v435_v23 = vadd.f32 %v427_v32, %v365_v38  ;;  %v537_v51 = vmul.f32 %v3790_v11, %v4533_v16  ;;  %v562_v37 = vmax.f32 %v554_v20, 0.0 }
 0x2d8   :  { %2210 = vmatmul.msk.f32.gmra.mxu1 %vm1674_vm1, %v2013_v10  ;;  %1765 = vrot.lane.b32.xlu1 %v3859_v44, %s2374_s20  ;;  %v370_v4 = vadd.f32 %v362_v49, %v317_v62  ;;  %v485_v40 = vmul.f32 %v3769_v34, %v4534_v54  ;;  %v1819_v56 = vrot.slane %v966_v30, 3  ;;  %v538_v50 = vmul.f32 %v3790_v11, %v4516_v59 }
 0x2d9   :  { %v1656_v45 = vadd.f32 %v1648_v63, %v1592_v60  ;;  %1814 = vrot.lane.b32.xlu2 %v1813_v53, %s2368_s24  ;;  %v488_v57 = vadd.f32 %v480_v8, %v435_v23  ;;  %v545_v6 = vadd.f32 %v537_v51, %v492_v43  ;;  %v1795_v32 = vrot.slane %v962_v25, 3  ;;  %v2015_v60 = vld [vmem:[#allocation2 + $0x28] sm:$0xff]  ;;  %v4538_v51 = vld [vmem:[#allocation57_spill] sm:$0xff] }
 0x2da   :  { %v440_v12 = vadd.f32 %v432_v17, %v370_v4  ;;  %v1843_v63 = vrot.slane %v562_v37, 4  ;;  %v73_v43 = vmul.f32 %v3665_v13, %v4535_v52  ;;  %v126_v17 = vmul.f32 %v3656_v28, %v4536_v47  ;;  %v4539_v4 = vld [vmem:[#allocation28_spill] sm:$0xff]  ;;  %v4548_v52 = vld [vmem:[#allocation23_spill] sm:$0xff] }
 0x2db   :  { %v4036_v44 = vadd.f32 %v3890_v0, %v1656_v45  ;;  %v541_v48 = vadd.f32 %v533_v58, %v488_v57  ;;  %v557_v59 = vadd.f32 %v3890_v0, %v545_v6  ;;  %v1885_v45 = vrot.slane %v962_v25, 4 }
 0x2dc   :  { %v493_v10 = vadd.f32 %v485_v40, %v440_v12  ;;  %v1903_v58 = vrot.slane %v966_v30, 4  ;;  %v134_v16 = vadd.f32 %v126_v17, %v73_v43  ;;  %v615_v37 = vmul.f32 %v3656_v28, %v4538_v51  ;;  %v4540_v40 = vld [vmem:[#allocation63_spill] sm:$0xff]  ;;  %v4551_v51 = vld [vmem:[#allocation88_spill] sm:$0xff] }
 0x2dd   :  { %v1672_v1 = vmax.f32 %v4036_v44, 0.0  ;;  %v553_v53 = vadd.f32 %v3890_v0, %v541_v48  ;;  %v565_v38 = vmax.f32 %v557_v59, 0.0  ;;  %v1280_v25 = vmul.f32 %v3769_v34, %v4539_v4 }
 0x2de   :  { %v1730_v9 = vpop.permute.xlu1 %1729  ;;  %v546_v20 = vadd.f32 %v538_v50, %v493_v10  ;;  %v1920_v54 = vrot.slane %v3951_v42, 7  ;;  %v567_v30 = vmul.f32 %v3665_v13, %v4537_v26  ;;  %v679_v6 = vmul.f32 %v3672_v14, %v4540_v40  ;;  %v4542_v50 = vld [vmem:[#allocation64_spill] sm:$0xff]  ;;  %v4544_v10 = vld [vmem:[#allocation33_spill] sm:$0xff] }
 0x2df   :  { %v2007_v29 = vrot.slane %v1672_v1, 4  ;;  %1732 = vst.msk [vmem:[#allocation2 + $0x20] sm:$0xf0] %vm1713_vm6, %v1730_v9  ;;  %1820 = vrot.lane.b32.xlu0 %v1819_v56, %s2368_s24  ;;  %v561_v49 = vmax.f32 %v553_v53, 0.0  ;;  %v4541_v56 = vld [vmem:[#allocation19_spill] sm:$0xff]  ;;  %v1288_v9 = vadd.f32 %v1280_v25, %v4542_v50  ;;  %v1941_v28 = vrot.slane %v3907_v27, 7 }
 0x2e0   :  { %2211 = vmatmul.msk.f32.gmra.mxu1 %vm1674_vm1, %v2015_v60  ;;  %1796 = vrot.lane.b32.xlu1 %v1795_v32, %s2368_s24  ;;  %v558_v36 = vadd.f32 %v3890_v0, %v546_v20  ;;  %v249_v12 = vmul.f32 %v3688_v35, %v4541_v56  ;;  %v623_v32 = vadd.f32 %v615_v37, %v567_v30  ;;  %v2032_v53 = vld [vmem:[%s4282_s3 + $0x70] sm:$0xff]  ;;  %v2030_v25 = vld [vmem:[%s4282_s3 + $0x60] sm:$0xff]  ;;  %v4552_v40 = vld [vmem:[#allocation93_spill] sm:$0xff]  ;;  %vm1961_vm2 = vcmask 1048452  }
 0x2e1   :  { %2009 = vst.msk [vmem:[#allocation2 + $0x38] sm:$0xf0] %vm1996_vm4, %v2007_v29  ;;  %1844 = vrot.lane.b32.xlu2 %v1843_v63, %s2369_s25  ;;  %v1328_v13 = vmul.f32 %v3790_v11, %v4525_v33  ;;  %v4543_v29 = vld [vmem:[#allocation27_spill] sm:$0xff]  ;;  %v695_v22 = vmul.f32 %v3688_v35, %v4544_v10  ;;  %v2033_v33 = vld [vmem:[%s4282_s3 + $0x78] sm:$0xff]  ;;  %v1947_v35 = vrot.slane %v1672_v1, 3  ;;  %v4111_v43 = vadd.f32 %v3890_v0, %v4548_v52 }
 0x2e2   :  { %v566_v62 = vmax.f32 %v558_v36, 0.0  ;;  %v302_v60 = vmul.f32 %v3679_v2, %v4543_v29  ;;  %2214 = vmatpush.msra.mxu3 %v2033_v33  ;;  %2213 = vmatpush.msra.mxu2 %v2033_v33  ;;  %v355_v44 = vmul.f32 %v3717_v19, %v4544_v10  ;;  %v871_v37 = vmul.f32 %v3769_v34, %v4551_v51  ;;  %v4553_v50 = vld [vmem:[#allocation45_spill] sm:$0xff]  ;;  %v2026_v10 = vld [vmem:[%s4282_s3 + $0x40] sm:$0xff] }
 0x2e3   :  { %v1336_v63 = vadd.f32 %v1328_v13, %v1288_v9  ;;  %2052 = vmatpush.msra.mxu0 %v2033_v33  ;;  %v478_v9 = vmul.f32 %v3769_v34, %v4553_v50  ;;  %v1744_v33 = vrot.slane %v3920_v41, 4  ;;  %vm1753_vm3 = vcmask 388352  }
 0x2e4   :  { %v1865_v23 = vrot.slane %v566_v62, 4  ;;  %2216 = vmatpush.msra.mxu3 %v2032_v53  ;;  %2215 = vmatpush.msra.mxu2 %v2032_v53 }
 0x2e5   :  { %v1344_v1 = vadd.f32 %v3890_v0, %v1336_v63  ;;  %2053 = vmatpush.msra.mxu0 %v2032_v53 }
 0x2e6   :  { %v1809_v48 = vpop.permute.xlu1 %1808 }
 0x2e7   :  { %1860 = vrot.lane.b32.xlu0 %v565_v38, %s2369_s25  ;;  %v1856_v38 = vpop.permute.xlu0 %1855 }
 0x2e8   :  { %1838 = vrot.lane.b32.xlu1 %v561_v49, %s2369_s25  ;;  %v2017_v8 = vld [vmem:[#allocation2 + $0x38] sm:$0xff]  ;;  %v4546_v49 = vld [vmem:[#allocation20_spill] sm:$0xff] }
 0x2e9   :  { %1881 = vrot.lane.b32.xlu2 %v961_v3, %s2372_s29  ;;  %2212 = vmatmul.msk.f32.gmra.mxu1 %vm1674_vm1, %v2017_v8  ;;  %v179_v3 = vmul.f32 %v3672_v14, %v4537_v26  ;;  %v687_v14 = vadd.f32 %v679_v6, %v623_v32  ;;  %v1340_v36 = vadd.f32 %v3890_v0, %v4546_v49  ;;  %v4547_v8 = vld [vmem:[#allocation81_spill] sm:$0xff]  ;;  %vm1918_vm1 = vcmask 917253  }
 0x2ea   :  { %v807_v62 = vmul.f32 %v3717_v19, %v4547_v8  ;;  %v2031_v19 = vld [vmem:[%s4282_s3 + $0x68] sm:$0xff]  ;;  %v935_v6 = vmul.f32 %v3790_v11, %v4552_v40 }
 0x2eb   :  { %v187_v57 = vadd.f32 %v179_v3, %v134_v16  ;;  %v1348_v17 = vmax.f32 %v1340_v36, 0.0  ;;  %2218 = vmatpush.msra.mxu3 %v2031_v19  ;;  %2217 = vmatpush.msra.mxu2 %v2031_v19  ;;  %v1352_v3 = vmax.f32 %v1344_v1, 0.0  ;;  %v2023_v8 = vld [vmem:[%s4282_s3 + $0x28] sm:$0xff] }
 0x2ec   :  { %2054 = vmatpush.msra.mxu0 %v2031_v19  ;;  %v2019_v19 = vld [vmem:[%s4282_s3 + $0x8] sm:$0xff] }
 0x2ed   :  { %v257_v42 = vadd.f32 %v249_v12, %v187_v57  ;;  %v2029_v57 = vld [vmem:[%s4282_s3 + $0x58] sm:$0xff]  ;;  %v1968_v30 = vrot.slane %v1348_v17, 4  ;;  %2220 = vmatpush.msra.mxu3 %v2030_v25  ;;  %2219 = vmatpush.msra.mxu2 %v2030_v25  ;;  %v2028_v12 = vld [vmem:[%s4282_s3 + $0x50] sm:$0xff]  ;;  %v1987_v13 = vrot.slane %v1352_v3, 4 }
 0x2ee   :  { %v1891_v4 = vpop.permute.xlu1 %1890  ;;  %2055 = vmatpush.msra.mxu0 %v2030_v25  ;;  %v2020_v17 = vld [vmem:[%s4282_s3 + $0x10] sm:$0xff] }
 0x2ef   :  { %1886 = vrot.lane.b32.xlu0 %v1885_v45, %s2372_s29  ;;  %v310_v20 = vadd.f32 %v302_v60, %v257_v42  ;;  %v1926_v45 = vrot.slane %v1668_v18, 3  ;;  %v1345_v18 = vmax.f32 %v4111_v43, 0.0  ;;  %2222 = vmatpush.msra.mxu3 %v2029_v57  ;;  %v531_v60 = vmul.f32 %v3790_v11, %v4550_v46 }
 0x2f0   :  { %1866 = vrot.lane.b32.xlu1 %v1865_v23, %s2369_s25  ;;  %2221 = vmatpush.msra.mxu2 %v2029_v57 }
 0x2f1   :  { %1904 = vrot.lane.b32.xlu2 %v1903_v58, %s2372_s29  ;;  %v363_v47 = vadd.f32 %v355_v44, %v310_v20  ;;  %v4549_v58 = vld [vmem:[#allocation39_spill] sm:$0xff]  ;;  %v1709_v56 = vrot.slane %v1345_v18, 4  ;;  %2224 = vmatpush.msra.mxu3 %v2028_v12  ;;  %v4556_v20 = vld [vmem:[#allocation85_spill] sm:$0xff] }
 0x2f2   :  { %v425_v16 = vmul.f32 %v3710_v31, %v4549_v58  ;;  %2223 = vmatpush.msra.mxu2 %v2028_v12  ;;  %2056 = vmatpush.msra.mxu0 %v2029_v57 }
 0x2f4   :  { %2057 = vmatpush.msra.mxu0 %v2028_v12 }
 0x2f7   :  { %1921 = vrot.lane.b32.xlu0 %v1920_v54, %s2373_s19  ;;  %v433_v54 = vadd.f32 %v425_v16, %v363_v47  ;;  %v2018_v16 = vld [vmem:[%s4282_s3] sm:$0xff] }
 0x2f8   :  { %1899 = vrot.lane.b32.xlu1 %v965_v21, %s2372_s29  ;;  %v4545_v21 = vld [vmem:[#allocation74_spill] sm:$0xff] }
 0x2f9   :  { %1942 = vrot.lane.b32.xlu2 %v1941_v28, %s2373_s19  ;;  %v743_v59 = vmul.f32 %v3679_v2, %v4545_v21  ;;  %v703_v2 = vadd.f32 %v695_v22, %v687_v14  ;;  %v4554_v28 = vld [vmem:[#allocation95_spill] sm:$0xff] }
 0x2fa   :  { %v4153_v32 = vadd.f32 %v3890_v0, %v4554_v28  ;;  %v2027_v14 = vld [vmem:[%s4282_s3 + $0x48] sm:$0xff] }
 0x2fb   :  { %v1762_v27 = vpop.permute.xlu2 %1761  ;;  %v751_v23 = vadd.f32 %v743_v59, %v703_v2  ;;  %2226 = vmatpush.msra.mxu3 %v2027_v14  ;;  %v4555_v22 = vld [vmem:[#allocation15_spill] sm:$0xff]  ;;  %v2025_v59 = vld [vmem:[%s4282_s3 + $0x38] sm:$0xff]  ;;  %2225 = vmatpush.msra.mxu2 %v2027_v14 }
 0x2fc   :  { %1764 = vst.msk [vmem:[#allocation2 + $0x20] sm:$0xf0] %vm1748_vm7, %v1762_v27  ;;  %v960_v63 = vmax.f32 %v4153_v32, 0.0  ;;  %v479_v21 = vmul.f32 %v3769_v34, %v4555_v22  ;;  %v2024_v34 = vld [vmem:[%s4282_s3 + $0x30] sm:$0xff]  ;;  %2058 = vmatpush.msra.mxu0 %v2027_v14 }
 0x2fd   :  { %1811 = vst.msk [vmem:[#allocation2 + $0x20] sm:$0xe0] %vm1786_vm8, %v1809_v48  ;;  %v815_v39 = vadd.f32 %v807_v62, %v751_v23  ;;  %v486_v48 = vadd.f32 %v478_v9, %v433_v54  ;;  %2228 = vmatpush.msra.mxu3 %v2026_v10  ;;  %2227 = vmatpush.msra.mxu2 %v2026_v10 }
 0x2fe   :  { %1858 = vst.msk [vmem:[#allocation2 + $0x20] sm:$0xf0] %vm1835_vm9, %v1856_v38  ;;  %v487_v38 = vadd.f32 %v479_v21, %v4556_v20  ;;  %v1782_v36 = vrot.slane %v960_v63, 3  ;;  %2059 = vmatpush.msra.mxu0 %v2026_v10 }
 0x2ff   :  { %1948 = vrot.lane.b32.xlu0 %v1947_v35, %s2373_s19  ;;  %v539_v53 = vadd.f32 %v531_v60, %v486_v48  ;;  %2230 = vmatpush.msra.mxu3 %v2025_v59  ;;  %v4557_v35 = vld [vmem:[#allocation37_spill] sm:$0xff] }
 0x300   :  { %1927 = vrot.lane.b32.xlu1 %v1926_v45, %s2373_s19  ;;  %v532_v2 = vmul.f32 %v3790_v11, %v4557_v35  ;;  %2229 = vmatpush.msra.mxu2 %v2025_v59 }
 0x301   :  { %1963 = vrot.lane.b32.xlu2 %v1347_v5, %s2375_s21  ;;  %v823_v5 = vmul.f32 %v3710_v31, %v4550_v46  ;;  %v551_v62 = vadd.f32 %v3890_v0, %v539_v53  ;;  %2232 = vmatpush.msra.mxu3 %v2024_v34  ;;  %v1914_v46 = vrot.slane %v3866_v24, 3 }
 0x302   :  { %v540_v52 = vadd.f32 %v532_v2, %v487_v38  ;;  %2231 = vmatpush.msra.mxu2 %v2024_v34  ;;  %2060 = vmatpush.msra.mxu0 %v2025_v59 }
 0x303   :  { %v1850_v26 = vpop.permute.xlu2 %1849  ;;  %v831_v31 = vadd.f32 %v823_v5, %v815_v39  ;;  %2234 = vmatpush.msra.mxu3 %v2023_v8  ;;  %v559_v1 = vmax.f32 %v551_v62, 0.0 }
 0x304   :  { %1852 = vst.msk [vmem:[#allocation2 + $0x20] sm:$0xf] %vm1828_vm10, %v1850_v26  ;;  %2233 = vmatpush.msra.mxu2 %v2023_v8  ;;  %v552_v47 = vadd.f32 %v3890_v0, %v540_v52  ;;  %2061 = vmatpush.msra.mxu0 %v2024_v34  ;;  %v1875_v26 = vrot.slane %v960_v63, 4 }
 0x305   :  { %1893 = vst.msk [vmem:[#allocation2 + $0x20] sm:$0xf] %vm1873_vm11, %v1891_v4  ;;  %v879_v42 = vadd.f32 %v871_v37, %v831_v31  ;;  %2236 = vmatpush.msra.mxu3 %v2022_v15  ;;  %v1908_v37 = vrot.slane %v3920_v41, 7  ;;  %v1957_v4 = vrot.slane %v1346_v7, 4 }
 0x306   :  { %2235 = vmatpush.msra.mxu2 %v2022_v15  ;;  %2062 = vmatpush.msra.mxu0 %v2023_v8 }
 0x307   :  { %1969 = vrot.lane.b32.xlu0 %v1968_v30, %s2375_s21  ;;  %v943_v29 = vadd.f32 %v935_v6, %v879_v42 }
 0x308   :  { %1710 = vrot.lane.b32.xlu1 %v1709_v56, %s2371_s0  ;;  %2063 = vmatpush.msra.mxu0 %v2022_v15 }
 0x309   :  { %1988 = vrot.lane.b32.xlu2 %v1987_v13, %s2375_s21  ;;  %v951_v49 = vadd.f32 %v3890_v0, %v943_v29  ;;  %v560_v0 = vmax.f32 %v552_v47, 0.0 }
 0x30b   :  { %v1896_v27 = vpop.permute.xlu2 %1895  ;;  %v959_v45 = vmax.f32 %v951_v49, 0.0  ;;  %v1831_v3 = vrot.slane %v560_v0, 4 }
 0x30c   :  { %1898 = vst.msk [vmem:[#allocation2 + $0x20] sm:$0xf0] %vm1879_vm12, %v1896_v27 }
 0x30d   :  { %v1775_v23 = vrot.slane %v959_v45, 7 }
 0x30f   :  { %1745 = vrot.lane.b32.xlu0 %v1744_v33, %s2374_s20 }
 0x310   :  { %1982 = vrot.lane.b32.xlu1 %v1351_v61, %s2375_s21  ;;  %v2021_v61 = vld [vmem:[%s4282_s3 + $0x18] sm:$0xff] }
 0x311   :  { %1783 = vrot.lane.b32.xlu2 %v1782_v36, %s2368_s24  ;;  %2238 = vmatpush.msra.mxu3 %v2021_v61 }
 0x312   :  { %2237 = vmatpush.msra.mxu2 %v2021_v61  ;;  %2064 = vmatpush.msra.mxu0 %v2021_v61 }
 0x313   :  { %v1933_v11 = vpop.permute.xlu0 %1932  ;;  %v1974_v44 = vpop.permute.xlu2 %1973  ;;  %2240 = vmatpush.msra.mxu3 %v2020_v17 }
 0x314   :  { %1935 = vst.msk [vmem:[#allocation2 + $0x20] sm:$0xe] %vm1912_vm13, %v1933_v11  ;;  %2239 = vmatpush.msra.mxu2 %v2020_v17  ;;  %2065 = vmatpush.msra.mxu0 %v2020_v17  ;;  %v2326_v11 = vld [vmem:[%s4283_s4] ss:$0 sm:$0xff]  ;;  %s2376_s4 = smov [#allocation3]  }
 0x315   :  { %1976 = vst.msk [vmem:[#allocation2 + $0x20] sm:$0xf] %vm1955_vm14, %v1974_v44  ;;  %2242 = vmatpush.msra.mxu3 %v2019_v19 }
 0x316   :  { %2241 = vmatpush.msra.mxu2 %v2019_v19  ;;  %2066 = vmatpush.msra.mxu0 %v2019_v19 }
 0x317   :  { %1825 = vrot.lane.b32.xlu0 %v559_v1, %s2369_s25  ;;  %2244 = vmatpush.msra.mxu3 %v2018_v16 }
 0x318   :  { %1776 = vrot.lane.b32.xlu1 %v1775_v23, %s2368_s24  ;;  %2243 = vmatpush.msra.mxu2 %v2018_v16 }
 0x319   :  { %1870 = vrot.lane.b32.xlu2 %v959_v45, %s2372_s29  ;;  %2067 = vmatpush.msra.mxu0 %v2018_v16 }
 0x31b   :  { %v1979_v39 = vpop.permute.xlu0 %1978  ;;  %v1724_v58 = vpop.permute.xlu2 %1723 }
 0x31c   :  { %1726 = vst.msk [vmem:[#allocation2 + $0x10] sm:$0xf0] %vm1713_vm6, %v1724_v58 }
 0x31f   :  { %1876 = vrot.lane.b32.xlu0 %v1875_v26, %s2372_s29 }
 0x320   :  { %1832 = vrot.lane.b32.xlu1 %v1831_v3, %s2369_s25  ;;  %s2123_s25 = sshll.u32 %s2376_s4, 4  ;;  %s2124_s25 = int_to_ptr.vmem [resolvable:$true] %s2123_s25 }
 0x321   :  { %1915 = vrot.lane.b32.xlu2 %v1914_v46, %s2373_s19 }
 0x323   :  { %v1735_v5 = vpop.permute.xlu0 %1734  ;;  %v1751_v51 = vpop.permute.xlu2 %1750 }
 0x324   :  { %1737 = vst.msk [vmem:[#allocation2 + $0x30] sm:$0xf] %vm1719_vm15, %v1735_v5 }
 0x327   :  { %1952 = vrot.lane.b32.xlu0 %v1345_v18, %s2375_s21 }
 0x328   :  { %1909 = vrot.lane.b32.xlu1 %v1908_v37, %s2373_s19 }
 0x32b   :  { %v1771_v24 = vpop.permute.xlu2 %1770 }
 0x330   :  { %1958 = vrot.lane.b32.xlu1 %v1957_v4, %s2375_s21  ;;  %s2125_s21 = sshll.u32 %s4284_s5, 4  ;;  %s2126_s21 = int_to_ptr.hbm [resolvable:$true] %s2125_s21 }
 0x332   :  { %v1938_v25 = vpop.permute.xlu1 %1937 }
 0x333   :  { %1940 = vst.msk [vmem:[#allocation2 + $0x20] sm:$0xe0] %vm1918_vm1, %v1938_v25  ;;  %v1815_v41 = vpop.permute.xlu2 %1814 }
 0x334   :  { %1981 = vst.msk [vmem:[#allocation2 + $0x20] sm:$0xf0] %vm1961_vm2, %v1979_v39 }
 0x33a   :  { %v1717_v57 = vpop.permute.xlu1 %1716 }
 0x33b   :  { %1720 = vst.msk [vmem:[#allocation2 + $0x10] sm:$0xf] %vm1719_vm15, %v1717_v57  ;;  %v2014_v43 = vld [vmem:[#allocation2 + $0x20] sm:$0xff]  ;;  %v1845_v55 = vpop.permute.xlu2 %1844 }
 0x33c   :  { %2074 = vmatmul.f32.vlgmr.msra.gmra.mxu3 %v2014_v43  ;;  %1754 = vst.msk [vmem:[#allocation2 + $0x10] sm:$0xf] %vm1753_vm3, %v1751_v51 }
 0x341   :  { %v1757_v7 = vpop.permute.xlu0 %1756 }
 0x342   :  { %1759 = vst.msk [vmem:[#allocation2 + $0x10] sm:$0xf0] %vm1748_vm7, %v1757_v7  ;;  %v1741_v18 = vpop.permute.xlu1 %1740 }
 0x343   :  { %1743 = vst.msk [vmem:[#allocation2 + $0x30] sm:$0xf0] %vm1713_vm6, %v1741_v18  ;;  %v1882_v30 = vpop.permute.xlu2 %1881 }
 0x344   :  { %1773 = vst.msk [vmem:[#allocation2 + $0x30] sm:$0xf0] %vm1748_vm7, %v1771_v24 }
 0x349   :  { %v1791_v54 = vpop.permute.xlu0 %1790 }
 0x34a   :  { %1793 = vst.msk [vmem:[#allocation2 + $0x10] sm:$0xe] %vm1779_vm0, %v1791_v54  ;;  %v1766_v31 = vpop.permute.xlu1 %1765 }
 0x34b   :  { %1768 = vst.msk [vmem:[#allocation2 + $0x30] sm:$0xf] %vm1753_vm3, %v1766_v31  ;;  %v1905_v56 = vpop.permute.xlu2 %1904 }
 0x34c   :  { %1817 = vst.msk [vmem:[#allocation2 + $0x30] sm:$0xe] %vm1779_vm0, %v1815_v41 }
 0x34d   :  { %v2098_v52 = vpop.f32.mrf.mxu1 }
 0x351   :  { %v1821_v40 = vpop.permute.xlu0 %1820 }
 0x352   :  { %1823 = vst.msk [vmem:[#allocation2 + $0x30] sm:$0xe0] %vm1786_vm8, %v1821_v40  ;;  %v1797_v6 = vpop.permute.xlu1 %1796 }
 0x353   :  { %1799 = vst.msk [vmem:[#allocation2 + $0x10] sm:$0xe0] %vm1786_vm8, %v1797_v6  ;;  %v1943_v9 = vpop.permute.xlu2 %1942 }
 0x354   :  { %1847 = vst.msk [vmem:[#allocation2 + $0x10] sm:$0xf0] %vm1835_vm9, %v1845_v55 }
 0x355   :  { %v2101_v45 = vpop.f32.mrf.mxu1 }
 0x359   :  { %v1861_v12 = vpop.permute.xlu0 %1860 }
 0x35a   :  { %1863 = vst.msk [vmem:[#allocation2 + $0x30] sm:$0xf] %vm1828_vm10, %v1861_v12  ;;  %v1839_v50 = vpop.permute.xlu1 %1838 }
 0x35b   :  { %1841 = vst.msk [vmem:[#allocation2 + $0x10] sm:$0xf] %vm1828_vm10, %v1839_v50  ;;  %v1964_v13 = vpop.permute.xlu2 %1963 }
 0x35c   :  { %1884 = vst.msk [vmem:[#allocation2 + $0x10] sm:$0xf] %vm1873_vm11, %v1882_v30 }
 0x35d   :  { %v2104_v61 = vpop.f32.mrf.mxu1 }
 0x361   :  { %v1887_v28 = vpop.permute.xlu0 %1886 }
 0x362   :  { %1889 = vst.msk [vmem:[#allocation2 + $0x10] sm:$0xf0] %vm1879_vm12, %v1887_v28  ;;  %v1867_v32 = vpop.permute.xlu1 %1866 }
 0x363   :  { %1869 = vst.msk [vmem:[#allocation2 + $0x30] sm:$0xf0] %vm1835_vm9, %v1867_v32  ;;  %v1989_v29 = vpop.permute.xlu2 %1988 }
 0x364   :  { %1907 = vst.msk [vmem:[#allocation2 + $0x30] sm:$0xf0] %vm1879_vm12, %v1905_v56 }
 0x366   :  { %v2107_v16 = vpop.f32.mrf.mxu1 }
 0x369   :  { %v1922_v42 = vpop.permute.xlu0 %1921 }
 0x36a   :  { %1924 = vst.msk [vmem:[#allocation2 + $0x10] sm:$0xe] %vm1912_vm13, %v1922_v42  ;;  %v1900_v14 = vpop.permute.xlu1 %1899 }
 0x36b   :  { %1966 = vst.msk [vmem:[#allocation2 + $0x10] sm:$0xf] %vm1955_vm14, %v1964_v13  ;;  %v1784_v10 = vpop.permute.xlu2 %1783 }
 0x36c   :  { %1902 = vst.msk [vmem:[#allocation2 + $0x30] sm:$0xf] %vm1873_vm11, %v1900_v14 }
 0x36d   :  { %1945 = vst.msk [vmem:[#allocation2 + $0x30] sm:$0xe] %vm1912_vm13, %v1943_v9 }
 0x371   :  { %v1949_v48 = vpop.permute.xlu0 %1948 }
 0x372   :  { %1951 = vst.msk [vmem:[#allocation2 + $0x30] sm:$0xe0] %vm1918_vm1, %v1949_v48  ;;  %v1928_v60 = vpop.permute.xlu1 %1927 }
 0x373   :  { %1991 = vst.msk [vmem:[#allocation2 + $0x30] sm:$0xf0] %vm1961_vm2, %v1989_v29  ;;  %v1871_v53 = vpop.permute.xlu2 %1870 }
 0x374   :  { %1930 = vst.msk [vmem:[#allocation2 + $0x10] sm:$0xe0] %vm1918_vm1, %v1928_v60 }
 0x379   :  { %v1970_v63 = vpop.permute.xlu0 %1969 }
 0x37a   :  { %1972 = vst.msk [vmem:[#allocation2 + $0x10] sm:$0xf0] %vm1961_vm2, %v1970_v63  ;;  %v1711_v27 = vpop.permute.xlu1 %1710 }
 0x37b   :  { %1714 = vst.msk [vmem:[#allocation2] sm:$0xf0] %vm1713_vm6, %v1711_v27  ;;  %v1916_v36 = vpop.permute.xlu2 %1915 }
 0x381   :  { %v1746_v22 = vpop.permute.xlu0 %1745  ;;  %v2012_v21 = vld [vmem:[#allocation2 + $0x10] sm:$0xff] }
 0x382   :  { %1749 = vst.msk [vmem:[#allocation2] sm:$0xf0] %vm1748_vm7, %v1746_v22  ;;  %v1983_v59 = vpop.permute.xlu1 %1982  ;;  %2071 = vmatmul.f32.vlgmr.msra.gmra.mxu2 %v2012_v21 }
 0x383   :  { %1787 = vst.msk [vmem:[#allocation2] sm:$0xe0] %vm1786_vm8, %v1784_v10 }
 0x384   :  { %1985 = vst.msk [vmem:[#allocation2 + $0x30] sm:$0xf] %vm1955_vm14, %v1983_v59 }
 0x389   :  { %v1826_v33 = vpop.permute.xlu0 %1825 }
 0x38a   :  { %v1777_v20 = vpop.permute.xlu1 %1776 }
 0x38b   :  { %1780 = vst.msk [vmem:[#allocation2] sm:$0xe] %vm1779_vm0, %v1777_v20  ;;  %v2016_v38 = vld [vmem:[#allocation2 + $0x30] sm:$0xff]  ;;  %vm2114_vm0 = vcmask 261120  }
 0x38c   :  { %1829 = vst.msk [vmem:[#allocation2] sm:$0xf] %vm1828_vm10, %v1826_v33  ;;  %2077 = vmatmul.f32.gmra.mxu3 %v2016_v38 }
 0x38d   :  { %1874 = vst.msk [vmem:[#allocation2] sm:$0xf] %vm1873_vm11, %v1871_v53 }
 0x391   :  { %v1877_v49 = vpop.permute.xlu0 %1876 }
 0x392   :  { %v1833_v34 = vpop.permute.xlu1 %1832 }
 0x393   :  { %1836 = vst.msk [vmem:[#allocation2] sm:$0xf0] %vm1835_vm9, %v1833_v34 }
 0x394   :  { %1880 = vst.msk [vmem:[#allocation2] sm:$0xf0] %vm1879_vm12, %v1877_v49 }
 0x395   :  { %1919 = vst.msk [vmem:[#allocation2] sm:$0xe0] %vm1918_vm1, %v1916_v36 }
 0x399   :  { %v1953_v2 = vpop.permute.xlu0 %1952 }
 0x39a   :  { %v1910_v35 = vpop.permute.xlu1 %1909 }
 0x39b   :  { %1913 = vst.msk [vmem:[#allocation2] sm:$0xe] %vm1912_vm13, %v1910_v35 }
 0x39c   :  { %1956 = vst.msk [vmem:[#allocation2] sm:$0xf] %vm1955_vm14, %v1953_v2 }
 0x3a2   :  { %v1959_v8 = vpop.permute.xlu1 %1958 }
 0x3a3   :  { %1962 = vst.msk [vmem:[#allocation2] sm:$0xf0] %vm1961_vm2, %v1959_v8 }
 0x3aa   :  { %v2010_v62 = vld [vmem:[#allocation2] sm:$0xff] }
 0x3ab   :  { %2068 = vmatmul.f32.vlgmr.msra.gmra.mxu0 %v2010_v62 }
 0x3bf   :  { %v2075_v44 = vpop.f32.mrf.mxu3 }
 0x3c0   :  { %v2076_v15 = vadd.f32 %v2326_v11, %v2075_v44 }
 0x3c2   :  { %v2105_v1 = vadd.f32 %v2104_v61, %v2076_v15 }
 0x3c4   :  { %v2112_v23 = vmax.f32 %v2105_v1, 0.0 }
 0x3c6   :  { %2117 = vst.msk [vmem:[#allocation3 + $0x10] sm:$0xff] %vm2114_vm0, %v2112_v23 }
 0x405   :  { %v2072_v47 = vpop.f32.mrf.mxu2 }
 0x406   :  { %v2073_v17 = vadd.f32 %v2326_v11, %v2072_v47 }
 0x408   :  { %v2102_v19 = vadd.f32 %v2101_v45, %v2073_v17 }
 0x40a   :  { %v2111_v0 = vmax.f32 %v2102_v19, 0.0 }
 0x40c   :  { %2116 = vst.msk [vmem:[#allocation3 + $0x8] sm:$0xff] %vm2114_vm0, %v2111_v0 }
 0x40f   :  { %v2078_v39 = vpop.f32.mrf.mxu3 }
 0x410   :  { %v2079_v58 = vadd.f32 %v2326_v11, %v2078_v39 }
 0x412   :  { %v2108_v26 = vadd.f32 %v2107_v16, %v2079_v58 }
 0x414   :  { %v2113_v3 = vmax.f32 %v2108_v26, 0.0 }
 0x416   :  { %2118 = vst.msk [vmem:[#allocation3 + $0x18] sm:$0xff] %vm2114_vm0, %v2113_v3 }
 0x428   :  { %v2069_v46 = vpop.f32.mrf.mxu0 }
 0x429   :  { %v2070_v5 = vadd.f32 %v2326_v11, %v2069_v46 }
 0x42b   :  { %v2099_v51 = vadd.f32 %v2098_v52, %v2070_v5 }
 0x42d   :  { %v2110_v37 = vmax.f32 %v2099_v51, 0.0 }
 0x42f   :  { %2115 = vst.msk [vmem:[#allocation3] sm:$0xff] %vm2114_vm0, %v2110_v37 }
 0x430   :  { %2131 = dma.vmem_to_hbm [thread:$0]  %s2124_s25, 512, %s2126_s21, [#allocation4], %s2377_s17, %s2377_s17, %s2378_s18  }
 0x431   :  { %2362 = dma.done.wait [#allocation4], 512  }
 0x432   :  { %2363 = vsyncadd [#allocation4], 4294966784 }
 0x433   :  { %2136 = vsyncpa [#allocation4], 1 }

</bundles_post_ra>
